<compile_context>
chip_gen: v7x
topology: tpu7x:2x2x1
jax: 0.10.0
libtpu: 0.0.40
codegen_flags: <defaults>
</compile_context>

<pallas_src>
import jax
import jax.numpy as jnp
from jax.experimental import pallas as pl
from jax.experimental.pallas import tpu as pltpu

EPS = 1e-5
LANE = 128


def _pad_lane(c):
    return ((c + LANE - 1) // LANE) * LANE


def _double_conv_kernel(xpad_ref, w1_ref, w2_ref, wi_ref,
                        s1_ref, b1_ref, s2_ref, b2_ref, si_ref, bi_ref,
                        out_ref, hpad_ref):
    H = out_ref.shape[1]
    W = out_ref.shape[2]
    C = out_ref.shape[3]              # lane-padded Cout
    Cin = xpad_ref.shape[3]           # lane-padded Cin

    xp = xpad_ref[0]                  # (H+2, W+2, Cin) bf16

    # --- conv1 (3x3, pad=1): one im2col slab + one big-K MXU matmul.
    cols1 = [xp[dy:dy + H, dx:dx + W, :]
             for dy in range(3) for dx in range(3)]
    patches1 = jnp.concatenate(cols1, axis=-1).reshape(H * W, 9 * Cin)
    h = jnp.dot(patches1, w1_ref[...], preferred_element_type=jnp.float32)
    h = jnp.maximum(h * s1_ref[...] + b1_ref[...], 0.0)      # BN1 + ReLU, f32

    # Padded intermediate in persistent VMEM scratch: zero only the 4 halo
    # strips (interior is fully overwritten right below).  Re-zeroed every
    # step so it is still correct if the "parallel" batch axis is split
    # across two TensorCores (program_id()==0 never runs on the second core).
    zrow = jnp.zeros((1, W + 2, C), hpad_ref.dtype)
    zcol = jnp.zeros((H + 2, 1, C), hpad_ref.dtype)
    hpad_ref[pl.ds(0, 1), :, :] = zrow
    hpad_ref[pl.ds(H + 1, 1), :, :] = zrow
    hpad_ref[:, pl.ds(0, 1), :] = zcol
    hpad_ref[:, pl.ds(W + 1, 1), :] = zcol
    hpad_ref[pl.ds(1, H), pl.ds(1, W), :] = (
        h.reshape(H, W, C).astype(hpad_ref.dtype))

    # --- conv2 (3x3, pad=1): one im2col slab + one big-K MXU matmul; BN2.
    cols2 = [hpad_ref[pl.ds(dy, H), pl.ds(dx, W), :]
             for dy in range(3) for dx in range(3)]
    patches2 = jnp.concatenate(cols2, axis=-1).reshape(H * W, 9 * C)
    main = jnp.dot(patches2, w2_ref[...], preferred_element_type=jnp.float32)
    main = main * s2_ref[...] + b2_ref[...]

    # --- identity branch: 1x1 conv with folded bias+BN; reuse conv1's
    #     center tap instead of re-slicing the input.
    xc = cols1[4].reshape(H * W, Cin)
    ident = jnp.dot(xc, wi_ref[...], preferred_element_type=jnp.float32)
    ident = ident * si_ref[...] + bi_ref[...]

    out = jnp.maximum(main + ident, 0.0)
    out_ref[0] = out.reshape(H, W, C)


def double_conv_forward(x_nchw, p):
    """x_nchw: (N, Cin, H, W) float32 -> (N, Cout, H, W) float32."""
    N, Cin, H, W = x_nchw.shape
    Cout = p["w1"].shape[0]
    Cp_in, Cp_out = _pad_lane(Cin), _pad_lane(Cout)

    # NCHW -> NHWC, pad channels to the 128-lane boundary, spatial pad 1,
    # cast to bf16 for the MXU.
    x = jnp.transpose(x_nchw, (0, 2, 3, 1)).astype(jnp.float32)
    x = jnp.pad(x, ((0, 0), (1, 1), (1, 1), (0, Cp_in - Cin)))
    xpad = x.astype(jnp.bfloat16)

    def fold_bn(g, b, m, v):
        scale = g / jnp.sqrt(v + EPS)
        return scale, b - m * scale

    s1, b1 = fold_bn(p["bn1_g"], p["bn1_b"], p["bn1_m"], p["bn1_v"])
    s2, b2 = fold_bn(p["bn2_g"], p["bn2_b"], p["bn2_m"], p["bn2_v"])
    si, bi = fold_bn(p["bni_g"], p["bni_b"], p["bni_m"], p["bni_v"])
    bi = bi + si * p["wi_bias"]     # fold the 1x1-conv bias into the BN shift

    def row(v):                     # (Cout,) f32 -> (1, Cp_out) f32
        return jnp.pad(v, (0, Cp_out - Cout)).reshape(1, Cp_out).astype(jnp.float32)

    def conv3_w(w, cin, cp_in):     # OIHW -> (9*cp_in, Cp_out) bf16
        w = jnp.transpose(w, (2, 3, 1, 0))                  # (3, 3, cin, Cout)
        w = jnp.pad(w, ((0, 0), (0, 0), (0, cp_in - cin), (0, Cp_out - Cout)))
        return w.reshape(9 * cp_in, Cp_out).astype(jnp.bfloat16)

    w1 = conv3_w(p["w1"], Cin, Cp_in)
    w2 = conv3_w(p["w2"], Cout, Cp_out)
    wi = jnp.pad(p["wi"][:, :, 0, 0].T,
                 ((0, Cp_in - Cin), (0, Cp_out - Cout))).astype(jnp.bfloat16)

    consts = [w1, w2, wi, row(s1), row(b1), row(s2), row(b2), row(si), row(bi)]

    def const_spec(a):
        nd = a.ndim
        return pl.BlockSpec(a.shape, lambda b, _nd=nd: (0,) * _nd)

    out_nhwc = pl.pallas_call(
        _double_conv_kernel,
        out_shape=jax.ShapeDtypeStruct((N, H, W, Cp_out), jnp.float32),
        grid_spec=pltpu.PrefetchScalarGridSpec(
            num_scalar_prefetch=0,
            grid=(N,),
            in_specs=[pl.BlockSpec((1, H + 2, W + 2, Cp_in),
                                   lambda b: (b, 0, 0, 0))]
                     + [const_spec(a) for a in consts],
            out_specs=pl.BlockSpec((1, H, W, Cp_out), lambda b: (b, 0, 0, 0)),
            scratch_shapes=[pltpu.VMEM((H + 2, W + 2, Cp_out), jnp.bfloat16)],
        ),
        compiler_params=pltpu.CompilerParams(
            dimension_semantics=("parallel",)),
    )(xpad, *consts)

    out = out_nhwc[..., :Cout]                      # drop channel padding
    return jnp.transpose(out, (0, 3, 1, 2))         # back to NCHW


def ref_forward(x, p, mxu_dtype=None):
    """Pure-JAX reference (eval-mode BN), NCHW.  If mxu_dtype is set, conv
    inputs/weights are quantized to it (mirrors the kernel's bf16 MXU inputs);
    all accumulation and BN math stays f32."""
    dn = ("NCHW", "OIHW", "NCHW")
    if mxu_dtype is None:
        q = lambda a: a
    else:
        q = lambda a: a.astype(mxu_dtype).astype(jnp.float32)

    def conv(x, w, pad):
        return jax.lax.conv_general_dilated(
            q(x), q(w), (1, 1), [(pad, pad), (pad, pad)], dimension_numbers=dn)

    def bn(y, g, b, m, v):
        c = lambda a: a[None, :, None, None]
        return (y - c(m)) / jnp.sqrt(c(v) + EPS) * c(g) + c(b)

    h = conv(x, p["w1"], 1)
    h = jnp.maximum(bn(h, p["bn1_g"], p["bn1_b"], p["bn1_m"], p["bn1_v"]), 0.0)
    h = conv(h, p["w2"], 1)
    h = bn(h, p["bn2_g"], p["bn2_b"], p["bn2_m"], p["bn2_v"])
    i = conv(x, p["wi"], 0) + p["wi_bias"][None, :, None, None]
    i = bn(i, p["bni_g"], p["bni_b"], p["bni_m"], p["bni_v"])
    return jnp.maximum(h + i, 0.0)


def make_params(key, cin, cout):
    ks = jax.random.split(key, 12)
    n = lambda k, shape, s=0.1: (jax.random.normal(k, shape) * s).astype(jnp.float32)
    return {
        "w1": n(ks[0], (cout, cin, 3, 3)),
        "w2": n(ks[1], (cout, cout, 3, 3)),
        "wi": n(ks[2], (cout, cin, 1, 1)),
        "wi_bias": n(ks[3], (cout,)),
        "bn1_g": 1.0 + n(ks[4], (cout,)), "bn1_b": n(ks[5], (cout,)),
        "bn1_m": n(ks[6], (cout,)),       "bn1_v": 0.5 + jnp.abs(n(ks[7], (cout,))),
        "bn2_g": 1.0 + n(ks[8], (cout,)), "bn2_b": n(ks[9], (cout,)),
        "bn2_m": n(ks[10], (cout,)),      "bn2_v": 0.5 + jnp.abs(n(ks[11], (cout,))),
        "bni_g": 1.0 + n(ks[4], (cout,)) * 0.5, "bni_b": n(ks[5], (cout,)) * 0.5,
        "bni_m": n(ks[6], (cout,)) * 0.5,       "bni_v": 0.5 + jnp.abs(n(ks[7], (cout,))) * 0.5,
    }


if __name__ == "__main__":
    key = jax.random.PRNGKey(0)
    kx, kp = jax.random.split(key)

    N, Cin, H, W = 2, 4, 16, 16
    Cout = 8

    x = jax.random.normal(kx, (N, Cin, H, W), dtype=jnp.float32)
    params = make_params(kp, Cin, Cout)

    out = jax.block_until_ready(double_conv_forward(x, params))

    # Reference with conv inputs quantized to bf16 (same precision the kernel
    # feeds the MXU); accumulation is f32 in both, so the comparison is tight.
    ref = jax.block_until_ready(ref_forward(x, params, mxu_dtype=jnp.bfloat16))

    assert out.shape == (N, Cout, H, W), out.shape
    err = float(jnp.max(jnp.abs(out - ref)))
    assert jnp.allclose(out, ref, atol=5e-3, rtol=5e-3), err

    print("KERNEL_OK")
</pallas_src>

<mosaic_0001>
module attributes {stable_mosaic.version = 11 : i64} {
  func.func @_double_conv_kernel(%arg0: i32, %arg1: memref<1x18x18x128xbf16, #tpu.memory_space<vmem>>, %arg2: memref<1152x128xbf16, #tpu.memory_space<vmem>>, %arg3: memref<1152x128xbf16, #tpu.memory_space<vmem>>, %arg4: memref<128x128xbf16, #tpu.memory_space<vmem>>, %arg5: memref<1x128xf32, #tpu.memory_space<vmem>>, %arg6: memref<1x128xf32, #tpu.memory_space<vmem>>, %arg7: memref<1x128xf32, #tpu.memory_space<vmem>>, %arg8: memref<1x128xf32, #tpu.memory_space<vmem>>, %arg9: memref<1x128xf32, #tpu.memory_space<vmem>>, %arg10: memref<1x128xf32, #tpu.memory_space<vmem>>, %arg11: memref<1x16x16x128xf32, #tpu.memory_space<vmem>>, %arg12: memref<18x18x128xbf16, #tpu.memory_space<vmem>>) attributes {dimension_semantics = [#tpu.dimension_semantics<parallel>], iteration_bounds = array<i64: 2>, scalar_prefetch = 0 : i64, scratch_operands = 1 : i64, tpu.core_type = #tpu.core_type<tc>, window_params = [{transform_indices = @transform_0, window_bounds = array<i64: 1, 18, 18, 128>}, {pipeline_mode = #tpu.pipeline_mode<synchronous>, transform_indices = @transform_1, window_bounds = array<i64: 1152, 128>}, {pipeline_mode = #tpu.pipeline_mode<synchronous>, transform_indices = @transform_2, window_bounds = array<i64: 1152, 128>}, {pipeline_mode = #tpu.pipeline_mode<synchronous>, transform_indices = @transform_3, window_bounds = array<i64: 128, 128>}, {pipeline_mode = #tpu.pipeline_mode<synchronous>, transform_indices = @transform_4, window_bounds = array<i64: 1, 128>}, {pipeline_mode = #tpu.pipeline_mode<synchronous>, transform_indices = @transform_5, window_bounds = array<i64: 1, 128>}, {pipeline_mode = #tpu.pipeline_mode<synchronous>, transform_indices = @transform_6, window_bounds = array<i64: 1, 128>}, {pipeline_mode = #tpu.pipeline_mode<synchronous>, transform_indices = @transform_7, window_bounds = array<i64: 1, 128>}, {pipeline_mode = #tpu.pipeline_mode<synchronous>, transform_indices = @transform_8, window_bounds = array<i64: 1, 128>}, {pipeline_mode = #tpu.pipeline_mode<synchronous>, transform_indices = @transform_9, window_bounds = array<i64: 1, 128>}, {transform_indices = @transform_10, window_bounds = array<i64: 1, 16, 16, 128>}]} {
    %c0 = arith.constant 0 : index
    %c0_0 = arith.constant 0 : index
    %c0_1 = arith.constant 0 : index
    %c0_2 = arith.constant 0 : index
    %0 = vector.load %arg1[%c0, %c0_0, %c0_1, %c0_2] : memref<1x18x18x128xbf16, #tpu.memory_space<vmem>>, vector<1x18x18x128xbf16>
    %1 = vector.shape_cast %0 : vector<1x18x18x128xbf16> to vector<18x18x128xbf16>
    %2 = vector.extract_strided_slice %1 {offsets = [0, 0, 0], sizes = [16, 16, 128], strides = [1, 1, 1]} : vector<18x18x128xbf16> to vector<16x16x128xbf16>
    %3 = vector.extract_strided_slice %1 {offsets = [0, 1, 0], sizes = [16, 16, 128], strides = [1, 1, 1]} : vector<18x18x128xbf16> to vector<16x16x128xbf16>
    %4 = vector.extract_strided_slice %1 {offsets = [0, 2, 0], sizes = [16, 16, 128], strides = [1, 1, 1]} : vector<18x18x128xbf16> to vector<16x16x128xbf16>
    %5 = vector.extract_strided_slice %1 {offsets = [1, 0, 0], sizes = [16, 16, 128], strides = [1, 1, 1]} : vector<18x18x128xbf16> to vector<16x16x128xbf16>
    %6 = vector.extract_strided_slice %1 {offsets = [1, 1, 0], sizes = [16, 16, 128], strides = [1, 1, 1]} : vector<18x18x128xbf16> to vector<16x16x128xbf16>
    %7 = vector.extract_strided_slice %1 {offsets = [1, 2, 0], sizes = [16, 16, 128], strides = [1, 1, 1]} : vector<18x18x128xbf16> to vector<16x16x128xbf16>
    %8 = vector.extract_strided_slice %1 {offsets = [2, 0, 0], sizes = [16, 16, 128], strides = [1, 1, 1]} : vector<18x18x128xbf16> to vector<16x16x128xbf16>
    %9 = vector.extract_strided_slice %1 {offsets = [2, 1, 0], sizes = [16, 16, 128], strides = [1, 1, 1]} : vector<18x18x128xbf16> to vector<16x16x128xbf16>
    %10 = vector.extract_strided_slice %1 {offsets = [2, 2, 0], sizes = [16, 16, 128], strides = [1, 1, 1]} : vector<18x18x128xbf16> to vector<16x16x128xbf16>
    %11 = tpu.concatenate %2, %3, %4, %5, %6, %7, %8, %9, %10 in 2 : vector<16x16x128xbf16>, vector<16x16x128xbf16>, vector<16x16x128xbf16>, vector<16x16x128xbf16>, vector<16x16x128xbf16>, vector<16x16x128xbf16>, vector<16x16x128xbf16>, vector<16x16x128xbf16>, vector<16x16x128xbf16> -> vector<16x16x1152xbf16>
    %12 = vector.shape_cast %11 : vector<16x16x1152xbf16> to vector<256x1152xbf16>
    %c0_3 = arith.constant 0 : index
    %c0_4 = arith.constant 0 : index
    %13 = vector.load %arg2[%c0_3, %c0_4] : memref<1152x128xbf16, #tpu.memory_space<vmem>>, vector<1152x128xbf16>
    %cst = arith.constant dense<0.000000e+00> : vector<256x128xf32>
    %14 = tpu.matmul %12, %13, %cst {dimension_numbers = #tpu.dot_dimension_numbers<[1], [0], [0], [1], [0, 0, 1, 1], [], []>} : vector<256x1152xbf16>, vector<1152x128xbf16>, vector<256x128xf32> -> vector<256x128xf32>
    %c0_5 = arith.constant 0 : index
    %c0_6 = arith.constant 0 : index
    %15 = vector.load %arg5[%c0_5, %c0_6] : memref<1x128xf32, #tpu.memory_space<vmem>>, vector<1x128xf32>
    %16 = vector.broadcast %15 : vector<1x128xf32> to vector<256x128xf32>
    %17 = arith.mulf %14, %16 : vector<256x128xf32>
    %c0_7 = arith.constant 0 : index
    %c0_8 = arith.constant 0 : index
    %18 = vector.load %arg6[%c0_7, %c0_8] : memref<1x128xf32, #tpu.memory_space<vmem>>, vector<1x128xf32>
    %19 = vector.broadcast %18 : vector<1x128xf32> to vector<256x128xf32>
    %20 = arith.addf %17, %19 : vector<256x128xf32>
    %cst_9 = arith.constant 0.000000e+00 : f32
    %21 = vector.broadcast %cst_9 : f32 to vector<256x128xf32>
    %22 = arith.maximumf %20, %21 : vector<256x128xf32>
    %cst_10 = arith.constant 0.000000e+00 : bf16
    %23 = vector.broadcast %cst_10 : bf16 to vector<1x18x128xbf16>
    %cst_11 = arith.constant 0.000000e+00 : bf16
    %24 = vector.broadcast %cst_11 : bf16 to vector<18x1x128xbf16>
    %c0_12 = arith.constant 0 : index
    %c0_13 = arith.constant 0 : index
    %c0_14 = arith.constant 0 : index
    %25 = vector.load %arg12[%c0_12, %c0_13, %c0_14] : memref<18x18x128xbf16, #tpu.memory_space<vmem>>, vector<1x18x128xbf16>
    tpu.vector_store %arg12[%c0_12, %c0_13, %c0_14], %23 {strides = array<i32>} : memref<18x18x128xbf16, #tpu.memory_space<vmem>>, vector<1x18x128xbf16>,
    %c17 = arith.constant 17 : index
    %c0_15 = arith.constant 0 : index
    %c0_16 = arith.constant 0 : index
    %26 = vector.load %arg12[%c17, %c0_15, %c0_16] : memref<18x18x128xbf16, #tpu.memory_space<vmem>>, vector<1x18x128xbf16>
    tpu.vector_store %arg12[%c17, %c0_15, %c0_16], %23 {strides = array<i32>} : memref<18x18x128xbf16, #tpu.memory_space<vmem>>, vector<1x18x128xbf16>,
    %c0_17 = arith.constant 0 : index
    %c0_18 = arith.constant 0 : index
    %c0_19 = arith.constant 0 : index
    %27 = vector.load %arg12[%c0_17, %c0_18, %c0_19] : memref<18x18x128xbf16, #tpu.memory_space<vmem>>, vector<18x1x128xbf16>
    tpu.vector_store %arg12[%c0_17, %c0_18, %c0_19], %24 {strides = array<i32>} : memref<18x18x128xbf16, #tpu.memory_space<vmem>>, vector<18x1x128xbf16>,
    %c0_20 = arith.constant 0 : index
    %c17_21 = arith.constant 17 : index
    %c0_22 = arith.constant 0 : index
    %28 = vector.load %arg12[%c0_20, %c17_21, %c0_22] : memref<18x18x128xbf16, #tpu.memory_space<vmem>>, vector<18x1x128xbf16>
    tpu.vector_store %arg12[%c0_20, %c17_21, %c0_22], %24 {strides = array<i32>} : memref<18x18x128xbf16, #tpu.memory_space<vmem>>, vector<18x1x128xbf16>,
    %29 = vector.shape_cast %22 : vector<256x128xf32> to vector<16x16x128xf32>
    %30 = arith.truncf %29 : vector<16x16x128xf32> to vector<16x16x128xbf16>
    %c1 = arith.constant 1 : index
    %c1_23 = arith.constant 1 : index
    %c0_24 = arith.constant 0 : index
    %31 = vector.load %arg12[%c1, %c1_23, %c0_24] : memref<18x18x128xbf16, #tpu.memory_space<vmem>>, vector<16x16x128xbf16>
    tpu.vector_store %arg12[%c1, %c1_23, %c0_24], %30 {strides = array<i32>} : memref<18x18x128xbf16, #tpu.memory_space<vmem>>, vector<16x16x128xbf16>,
    %c0_25 = arith.constant 0 : index
    %c0_26 = arith.constant 0 : index
    %c0_27 = arith.constant 0 : index
    %32 = vector.load %arg12[%c0_25, %c0_26, %c0_27] : memref<18x18x128xbf16, #tpu.memory_space<vmem>>, vector<16x16x128xbf16>
    %c0_28 = arith.constant 0 : index
    %c1_29 = arith.constant 1 : index
    %c0_30 = arith.constant 0 : index
    %33 = vector.load %arg12[%c0_28, %c1_29, %c0_30] : memref<18x18x128xbf16, #tpu.memory_space<vmem>>, vector<16x16x128xbf16>
    %c0_31 = arith.constant 0 : index
    %c2 = arith.constant 2 : index
    %c0_32 = arith.constant 0 : index
    %34 = vector.load %arg12[%c0_31, %c2, %c0_32] : memref<18x18x128xbf16, #tpu.memory_space<vmem>>, vector<16x16x128xbf16>
    %c1_33 = arith.constant 1 : index
    %c0_34 = arith.constant 0 : index
    %c0_35 = arith.constant 0 : index
    %35 = vector.load %arg12[%c1_33, %c0_34, %c0_35] : memref<18x18x128xbf16, #tpu.memory_space<vmem>>, vector<16x16x128xbf16>
    %c1_36 = arith.constant 1 : index
    %c1_37 = arith.constant 1 : index
    %c0_38 = arith.constant 0 : index
    %36 = vector.load %arg12[%c1_36, %c1_37, %c0_38] : memref<18x18x128xbf16, #tpu.memory_space<vmem>>, vector<16x16x128xbf16>
    %c1_39 = arith.constant 1 : index
    %c2_40 = arith.constant 2 : index
    %c0_41 = arith.constant 0 : index
    %37 = vector.load %arg12[%c1_39, %c2_40, %c0_41] : memref<18x18x128xbf16, #tpu.memory_space<vmem>>, vector<16x16x128xbf16>
    %c2_42 = arith.constant 2 : index
    %c0_43 = arith.constant 0 : index
    %c0_44 = arith.constant 0 : index
    %38 = vector.load %arg12[%c2_42, %c0_43, %c0_44] : memref<18x18x128xbf16, #tpu.memory_space<vmem>>, vector<16x16x128xbf16>
    %c2_45 = arith.constant 2 : index
    %c1_46 = arith.constant 1 : index
    %c0_47 = arith.constant 0 : index
    %39 = vector.load %arg12[%c2_45, %c1_46, %c0_47] : memref<18x18x128xbf16, #tpu.memory_space<vmem>>, vector<16x16x128xbf16>
    %c2_48 = arith.constant 2 : index
    %c2_49 = arith.constant 2 : index
    %c0_50 = arith.constant 0 : index
    %40 = vector.load %arg12[%c2_48, %c2_49, %c0_50] : memref<18x18x128xbf16, #tpu.memory_space<vmem>>, vector<16x16x128xbf16>
    %41 = tpu.concatenate %32, %33, %34, %35, %36, %37, %38, %39, %40 in 2 : vector<16x16x128xbf16>, vector<16x16x128xbf16>, vector<16x16x128xbf16>, vector<16x16x128xbf16>, vector<16x16x128xbf16>, vector<16x16x128xbf16>, vector<16x16x128xbf16>, vector<16x16x128xbf16>, vector<16x16x128xbf16> -> vector<16x16x1152xbf16>
    %42 = vector.shape_cast %41 : vector<16x16x1152xbf16> to vector<256x1152xbf16>
    %c0_51 = arith.constant 0 : index
    %c0_52 = arith.constant 0 : index
    %43 = vector.load %arg3[%c0_51, %c0_52] : memref<1152x128xbf16, #tpu.memory_space<vmem>>, vector<1152x128xbf16>
    %cst_53 = arith.constant dense<0.000000e+00> : vector<256x128xf32>
    %44 = tpu.matmul %42, %43, %cst_53 {dimension_numbers = #tpu.dot_dimension_numbers<[1], [0], [0], [1], [0, 0, 1, 1], [], []>} : vector<256x1152xbf16>, vector<1152x128xbf16>, vector<256x128xf32> -> vector<256x128xf32>
    %c0_54 = arith.constant 0 : index
    %c0_55 = arith.constant 0 : index
    %45 = vector.load %arg7[%c0_54, %c0_55] : memref<1x128xf32, #tpu.memory_space<vmem>>, vector<1x128xf32>
    %46 = vector.broadcast %45 : vector<1x128xf32> to vector<256x128xf32>
    %47 = arith.mulf %44, %46 : vector<256x128xf32>
    %c0_56 = arith.constant 0 : index
    %c0_57 = arith.constant 0 : index
    %48 = vector.load %arg8[%c0_56, %c0_57] : memref<1x128xf32, #tpu.memory_space<vmem>>, vector<1x128xf32>
    %49 = vector.broadcast %48 : vector<1x128xf32> to vector<256x128xf32>
    %50 = arith.addf %47, %49 : vector<256x128xf32>
    %51 = vector.shape_cast %6 : vector<16x16x128xbf16> to vector<256x128xbf16>
    %c0_58 = arith.constant 0 : index
    %c0_59 = arith.constant 0 : index
    %52 = vector.load %arg4[%c0_58, %c0_59] : memref<128x128xbf16, #tpu.memory_space<vmem>>, vector<128x128xbf16>
    %cst_60 = arith.constant dense<0.000000e+00> : vector<256x128xf32>
    %53 = tpu.matmul %51, %52, %cst_60 {dimension_numbers = #tpu.dot_dimension_numbers<[1], [0], [0], [1], [0, 0, 1, 1], [], []>} : vector<256x128xbf16>, vector<128x128xbf16>, vector<256x128xf32> -> vector<256x128xf32>
    %c0_61 = arith.constant 0 : index
    %c0_62 = arith.constant 0 : index
    %54 = vector.load %arg9[%c0_61, %c0_62] : memref<1x128xf32, #tpu.memory_space<vmem>>, vector<1x128xf32>
    %55 = vector.broadcast %54 : vector<1x128xf32> to vector<256x128xf32>
    %56 = arith.mulf %53, %55 : vector<256x128xf32>
    %c0_63 = arith.constant 0 : index
    %c0_64 = arith.constant 0 : index
    %57 = vector.load %arg10[%c0_63, %c0_64] : memref<1x128xf32, #tpu.memory_space<vmem>>, vector<1x128xf32>
    %58 = vector.broadcast %57 : vector<1x128xf32> to vector<256x128xf32>
    %59 = arith.addf %56, %58 : vector<256x128xf32>
    %60 = arith.addf %50, %59 : vector<256x128xf32>
    %cst_65 = arith.constant 0.000000e+00 : f32
    %61 = vector.broadcast %cst_65 : f32 to vector<256x128xf32>
    %62 = arith.maximumf %60, %61 : vector<256x128xf32>
    %63 = vector.shape_cast %62 : vector<256x128xf32> to vector<16x16x128xf32>
    %c0_66 = arith.constant 0 : index
    %c0_67 = arith.constant 0 : index
    %c0_68 = arith.constant 0 : index
    %c0_69 = arith.constant 0 : index
    %64 = vector.load %arg11[%c0_66, %c0_67, %c0_68, %c0_69] : memref<1x16x16x128xf32, #tpu.memory_space<vmem>>, vector<1x16x16x128xf32>
    %65 = vector.shape_cast %64 : vector<1x16x16x128xf32> to vector<16x16x128xf32>
    %66 = vector.shape_cast %63 : vector<16x16x128xf32> to vector<1x16x16x128xf32>
    tpu.vector_store %arg11[%c0_66, %c0_67, %c0_68, %c0_69], %66 {strides = array<i32>} : memref<1x16x16x128xf32, #tpu.memory_space<vmem>>, vector<1x16x16x128xf32>,
    return
  }
  func.func @transform_0(%arg0: i32) -> (i32, i32, i32, i32) {
    %c0_i32 = arith.constant 0 : i32
    %c0_i32_0 = arith.constant 0 : i32
    %c0_i32_1 = arith.constant 0 : i32
    %c0_i32_2 = arith.constant 0 : i32
    return %arg0, %c0_i32, %c0_i32_0, %c0_i32_1 : i32, i32, i32, i32
  }
  func.func @transform_1(%arg0: i32) -> (i32, i32) {
    %c0_i32 = arith.constant 0 : i32
    %c0_i32_0 = arith.constant 0 : i32
    %c0_i32_1 = arith.constant 0 : i32
    return %c0_i32, %c0_i32_0 : i32, i32
  }
  func.func @transform_2(%arg0: i32) -> (i32, i32) {
    %c0_i32 = arith.constant 0 : i32
    %c0_i32_0 = arith.constant 0 : i32
    %c0_i32_1 = arith.constant 0 : i32
    return %c0_i32, %c0_i32_0 : i32, i32
  }
  func.func @transform_3(%arg0: i32) -> (i32, i32) {
    %c0_i32 = arith.constant 0 : i32
    %c0_i32_0 = arith.constant 0 : i32
    %c0_i32_1 = arith.constant 0 : i32
    return %c0_i32, %c0_i32_0 : i32, i32
  }
  func.func @transform_4(%arg0: i32) -> (i32, i32) {
    %c0_i32 = arith.constant 0 : i32
    %c0_i32_0 = arith.constant 0 : i32
    %c0_i32_1 = arith.constant 0 : i32
    return %c0_i32, %c0_i32_0 : i32, i32
  }
  func.func @transform_5(%arg0: i32) -> (i32, i32) {
    %c0_i32 = arith.constant 0 : i32
    %c0_i32_0 = arith.constant 0 : i32
    %c0_i32_1 = arith.constant 0 : i32
    return %c0_i32, %c0_i32_0 : i32, i32
  }
  func.func @transform_6(%arg0: i32) -> (i32, i32) {
    %c0_i32 = arith.constant 0 : i32
    %c0_i32_0 = arith.constant 0 : i32
    %c0_i32_1 = arith.constant 0 : i32
    return %c0_i32, %c0_i32_0 : i32, i32
  }
  func.func @transform_7(%arg0: i32) -> (i32, i32) {
    %c0_i32 = arith.constant 0 : i32
    %c0_i32_0 = arith.constant 0 : i32
    %c0_i32_1 = arith.constant 0 : i32
    return %c0_i32, %c0_i32_0 : i32, i32
  }
  func.func @transform_8(%arg0: i32) -> (i32, i32) {
    %c0_i32 = arith.constant 0 : i32
    %c0_i32_0 = arith.constant 0 : i32
    %c0_i32_1 = arith.constant 0 : i32
    return %c0_i32, %c0_i32_0 : i32, i32
  }
  func.func @transform_9(%arg0: i32) -> (i32, i32) {
    %c0_i32 = arith.constant 0 : i32
    %c0_i32_0 = arith.constant 0 : i32
    %c0_i32_1 = arith.constant 0 : i32
    return %c0_i32, %c0_i32_0 : i32, i32
  }
  func.func @transform_10(%arg0: i32) -> (i32, i32, i32, i32) {
    %c0_i32 = arith.constant 0 : i32
    %c0_i32_0 = arith.constant 0 : i32
    %c0_i32_1 = arith.constant 0 : i32
    %c0_i32_2 = arith.constant 0 : i32
    return %arg0, %c0_i32, %c0_i32_0, %c0_i32_1 : i32, i32, i32, i32
  }
}

</mosaic_0001>

<bundles_post_ra>
// kernel: tpu_custom_call.1
= control target key start
LH: loop header
LB: loop body
LE: loop exit
PB: predicated region body
PF: predicated region fallthrough
CT: control target
= control target key end

     0   :  { %15 = vsyncpa [#allocation4], 0  ;;  %s12030_s0 = inlined_call_operand.vmem [shape: bf16[2,18,18,128], index: 0, kind: input, shape index: {}]   ;;  %s12031_s1 = inlined_call_operand.vmem [shape: bf16[1152,128], index: 1, kind: input, shape index: {}]   ;;  %s12032_s2 = inlined_call_operand.hbm [shape: bf16[1152,128], index: 2, kind: input, shape index: {}]   ;;  %s12033_s3 = inlined_call_operand.vmem [shape: bf16[128,128], index: 3, kind: input, shape index: {}]   ;;  %s12034_s4 = inlined_call_operand.vmem [shape: f32[1,128], index: 4, kind: input, shape index: {}]   ;;  %s12035_s5 = inlined_call_operand.vmem [shape: f32[1,128], index: 5, kind: input, shape index: {}]   ;;  %s12036_s6 = inlined_call_operand.vmem [shape: f32[1,128], index: 6, kind: input, shape index: {}]   ;;  %s12037_s7 = inlined_call_operand.vmem [shape: f32[1,128], index: 7, kind: input, shape index: {}]   ;;  %s12038_s8 = inlined_call_operand.vmem [shape: f32[1,128], index: 8, kind: input, shape index: {}]   ;;  %s12039_s9 = inlined_call_operand.vmem [shape: f32[1,128], index: 9, kind: input, shape index: {}]   ;;  %s12040_s10 = inlined_call_operand.hbm [shape: f32[2,16,16,128], index: 10, kind: output, shape index: {}]  }
   0x1   :  { %16 = vsyncpa [#allocation5], 0 }
   0x2   :  { %18 = vsyncpa [#allocation5 + $0x1], 0  ;;  %s9171_s13 = smov 0   ;;  %s9173_s14 = smov 0  }
   0x3   :  { %s9175_s15 = smov 0   ;;  %s9177_s16 = smov 0  }
   0x4 LB: > { %s9192_s17 = sadd.s32 4294967295, %s9107_s16   ;;  %s7024_s18 = sadd.s32 4294967294, %s9107_s16   ;;  %s9107_s16 = sphi %s9177_s16, %s12133_s16   ;;  %s9103_s15 = sphi %s9175_s15, %s12132_s15   ;;  %s9099_s14 = sphi %s9173_s14, %s12131_s14   ;;  %s9095_s13 = sphi %s9171_s13, %s12130_s13  }
   0x5   : > { %s9196_s19 = sadd.s32 1, %s9107_s16   ;;  %s246_s20 = sadd.s32 1, %s9103_s15 }
   0x6   : > { %s243_s21 = ssub.s32 %s9107_s16, %s9196_s19  ;;  %p256_p0 = scmp.ne.s32.totalorder %s9103_s15, %s9099_s14 }
   0x7   : > { %p244_p1 = scmp.eq.s32.totalorder %s243_s21, 0  ;;  %p257_p2 = scmp.eq.s32.totalorder %s9192_s17, 1 }
   0x8   : > { %p262_p3 = scmp.ne.s32.totalorder %s9099_s14, %s9095_s13  ;;  %p263_p4 = scmp.eq.s32.totalorder %s7024_s18, 1 }
   0x9   : > { %s9207_s22 = scalar_select %p244_p1, %s9103_s15, %s246_s20  }
   0xa   : > { %p9209_p5 = por %p257_p2, %p256_p0  ;;  %p9213_p6 = por %p263_p4, %p262_p3 }
   0xb   : > { %p7025_p7 = scmp.ge.s32.totalorder %s9107_s16, 1  ;;  %p270_p8 = scmp.lt.s32.totalorder %s9107_s16, 3 }
   0xc   : > { %s12054_s23 = scalar_select %p9209_p5, 1, 0 }
   0xd   : > { %s12055_s24 = scalar_select %p9213_p6, 1, 0 }
   0xe   : > { %p12041_p9 = scmp.eq.s32.totalorder %s9192_s17, 0  ;;  %p9220_p10 = pnand %p7025_p7, %p270_p8 }
   0xf   : > { %s9109_s26 = smov [#allocation3]   ;;  %s9013_s11 = scalar_lea.hbm %s12032_s2, 9216 }
  0x10   : > { %s12056_s25 = scalar_select %p9220_p10, 1, 0 }
  0x11   : > { %s285_s27 = sshll.u32 %s9109_s26, 4  ;;  %p8591_p11 = pneg %p9220_p10  ;;  %s286_s27 = int_to_ptr.vmem [resolvable:$true] %s285_s27 }
  0x12   : > { %p9014_p13 = scmp.ne.s32.totalorder %s12032_s2, %s9013_s11  ;;  %p9020_p3 = scmp.lt.u32.totalorder %s9013_s11, %s12032_s2 }
  0x13   : > { %p9228_p12 = pnand %p12041_p9, %p8591_p11 }
  0x15   : > { %p9015_p0 = pneg %p9228_p12 }
  0x17   : > { %p9016_p1 = pnand %p9015_p0, %p9014_p13 }
  0x19   : > { %p9017_p2 = pneg %p9016_p1 }
  0x1b   : > { %p9022_p4 = pnand %p9020_p3, %p9017_p2 }
  0x1d   : > { %9025 = shalt.err (!%p9022_p4)
}
  0x1e   : > { %s9026_s26 = scalar_lea.vmem %s286_s27, 9216  ;;  %p9034_p9 = scmp.lt.s32.totalorder %s286_s27, %s286_s27 }
  0x1f   : > { %p9027_p7 = scmp.ne.s32.totalorder %s286_s27, %s9026_s26  ;;  %p9035_p6 = scmp.lt.s32.totalorder %s9026_s26, %s9026_s26 }
  0x21   : > { %p9029_p8 = pnand %p9027_p7, %p9015_p0  ;;  %p9036_p5 = por %p9035_p6, %p9034_p9 }
  0x23   : > { %p9030_p11 = pneg %p9029_p8 }
  0x25   : > { %p9037_p10 = pnand %p9036_p5, %p9030_p11 }
  0x27   : > { %9040 = shalt.err (!%p9037_p10)
}
  0x28   : > { %s9110_s29 = smov 64   ;;  %s9111_s30 = smov 4  }
  0x29   : > { %8594 = dma.hbm_to_vmem [thread:$0]  (!%p9228_p12), %s12032_s2, 9216, %s286_s27, [#allocation4], %s9110_s29, %s9110_s29, %s9111_s30  }
  0x2a   : > { %p12058_p13 = scmp.ne.s32.totalorder %s12056_s25, 0 }
  0x2c   : > { %330 = sbr.rel (%p12058_p13) target bundleno = 1161 (0x489), region = 60 }
  0x33   : > { %p12059_p1 = scmp.eq.s32.totalorder %s9192_s17, 0 }
  0x35   : > { %9086 = dma.done.wait (%p12059_p1), [#allocation4], 9216   ;;  %p12060_p0 = pmov %p12059_p1 }
  0x36   : > { %v8640_v0 = vld [vmem:[%s12031_s1 + $0x40] sm:$0xff]   ;;  %v8642_v2 = vld [vmem:[%s12031_s1 + $0x48] sm:$0xff]   ;;  %p368_p5 = scmp.lt.s32.totalorder %s9192_s17, 1  ;;  %v8644_v4 = vld [vmem:[%s12031_s1 + $0x50] sm:$0xff]   ;;  %vm572_vm0 = vsmask.f32 7424 }
  0x37   : > { %9088 = vsyncadd (%p12060_p0), [#allocation4], 4294958080  ;;  %v8641_v1 = vld [vmem:[%s12031_s1] sm:$0xff]   ;;  %7456 = vmatprep.subr.bf16.mxu0 %v8640_v0  ;;  %8568 = vmatprep.subr.bf16.mxu1 %v8640_v0  ;;  %v8643_v3 = vld [vmem:[%s12031_s1 + $0x8] sm:$0xff]   ;;  %vm6086_vm1 = vsmask.f32 3328 }
  0x38   : > { %7457 = vmatpush3.bf16.msra.mxu0 %v8641_v1  ;;  %8576 = vmatpush3.bf16.msra.mxu1 %v8641_v1  ;;  %s369_s18 = scalar_select %p368_p5, %s9192_s17, 1  ;;  %v8645_v5 = vld [vmem:[%s12031_s1 + $0x10] sm:$0xff]   ;;  %v8646_v6 = vld [vmem:[%s12031_s1 + $0x58] sm:$0xff]   ;;  %v8648_v8 = vld [vmem:[%s12031_s1 + $0x60] sm:$0xff]   ;;  %vm6087_vm2 = vsmask.f32 7440 }
  0x39   : > { %7458 = vmatprep.subr.bf16.mxu0 %v8642_v2  ;;  %8569 = vmatprep.subr.bf16.mxu1 %v8642_v2  ;;  %v8647_v7 = vld [vmem:[%s12031_s1 + $0x18] sm:$0xff]   ;;  %v8649_v9 = vld [vmem:[%s12031_s1 + $0x20] sm:$0xff]   ;;  %v8650_v10 = vld [vmem:[%s12031_s1 + $0x68] sm:$0xff]   ;;  %v12061_v47 = vmov 0  ;;  %vm781_vm4 = vcmask 1046528   ;;  %vm2396_vm5 = vcmask 1040384  }
  0x3a   : > { %s8584_s25 = smul.u32 216, %s369_s18  ;;  %v8651_v18 = vld [vmem:[%s12031_s1 + $0x28] sm:$0xff]   ;;  %v8652_v22 = vld [vmem:[%s12031_s1 + $0x70] sm:$0xff]   ;;  %v8654_v40 = vld [vmem:[%s12031_s1 + $0x78] sm:$0xff]   ;;  %vm2397_vm6 = vsmask.f32 256 }
  0x3b   : > { %v8653_v35 = vld [vmem:[%s12031_s1 + $0x30] sm:$0xff]   ;;  %v8655_v44 = vld [vmem:[%s12031_s1 + $0x38] sm:$0xff]   ;;  %vm9332_vm3 = vmor %vm6086_vm1, %vm6087_vm2  ;;  %vm2453_vm8 = vsmask.f32 7938  ;;  %vm2928_vm10 = vcmask 1043456   ;;  %s365_s30 = sand.u32 1, %s9099_s14  }
  0x3c   : > { %7459 = vmatpush3.bf16.msra.mxu0 %v8643_v3  ;;  %8577 = vmatpush3.bf16.msra.mxu1 %v8643_v3  ;;  %s9289_s18 = scalar_lea.vmem %s12030_s0, %s8584_s25  ;;  %v12062_v47 = vsel %vm9332_vm3, 4294967295, %v12061_v47  ;;  %v8660_v52 = vld [vmem:[%s12031_s1 + $0xc0] sm:$0xff]   ;;  %vm10130_vm7 = vmand %vm2396_vm5, %vm2397_vm6  ;;  %vm2605_vm11 = vsmask.f32 4368  ;;  %s7030_s20 = sshll.u32 %s365_s30, 8 }
  0x3d   : > { %7460 = vmatprep.subr.bf16.mxu0 %v8644_v4  ;;  %8570 = vmatprep.subr.bf16.mxu1 %v8644_v4  ;;  %v9295_v11 = vld [vmem:[%s9289_s18] sm:$0xff]   ;;  %v9298_v12 = vld [vmem:[%s9289_s18 + $0x8] ss:$0 sps:$4 sm:$0x11]   ;;  %v410_v13 = vld [vmem:[%s9289_s18 + $0x90] sm:$0xf] }
  0x3e   : > { %v411_v14 = vld [vmem:[%s9289_s18 + $0x94] sm:$0xf]  ;;  %v412_v15 = vld [vmem:[%s9289_s18 + $0x98] sm:$0x1]  ;;  %v6354_v16 = vshrl.u32 %v410_v13, 16  ;;  %v6357_v17 = vshll.u32 %v410_v13, 16  ;;  %vm10137_vm9 = vmand %vm2396_vm5, %vm2453_vm8 }
  0x3f   : > { %v574_v19 = vshrl.u32 %v9295_v11, 16  ;;  %v576_v20 = vshll.u32 %v9295_v11, 16  ;;  %v581_v21 = vshll.u32 %v9298_v12, 16  ;;  %v9312_v23 = vcombine.low %v410_v13, %v411_v14  ;;  %12063 = vst [vmem:[#allocation9_spill] sm:$0xff] %v12062_v47  ;;  %v8661_v54 = vld [vmem:[%s12031_s1 + $0x140] sm:$0xff]   ;;  %vm10440_vm12 = vmand %vm2928_vm10, %vm2453_vm8  ;;  %s11812_s28 = scalar_lea.vmem [#allocation6], %s7030_s20 }
  0x40   : > { %7461 = vmatpush3.bf16.msra.mxu0 %v8645_v5  ;;  %8578 = vmatpush3.bf16.msra.mxu1 %v8645_v5  ;;  %v9314_v24 = vcombine.low %v412_v15, %v412_v15  ;;  %v6356_v25 = vrot.slane %v6354_v16, 4  ;;  %v6359_v26 = vrot.slane %v6357_v17, 5  ;;  %v6363_v29 = vshll.u32 %v411_v14, 16  ;;  %v377_v55 = vld [vmem:[%s9289_s18 + $0xc] sm:$0xf]  ;;  %v8662_v61 = vld [vmem:[%s12031_s1 + $0x80] sm:$0xff]   ;;  %vm10447_vm13 = vmor %vm2397_vm6, %vm2605_vm11 }
  0x41   : > { %7462 = vmatprep.subr.bf16.mxu0 %v8646_v6  ;;  %8571 = vmatprep.subr.bf16.mxu1 %v8646_v6  ;;  %v578_v27 = vrot.slane %v576_v20, 1  ;;  %v583_v28 = vrot.slane %v581_v21, 1  ;;  %v6367_v30 = vshrl.u32 %v411_v14, 16  ;;  %v718_v31 = vshrl.u32 %v9312_v23, 16  ;;  %v378_v57 = vld [vmem:[%s9289_s18 + $0x10] sm:$0xf] }
  0x42   : > { %v720_v32 = vshll.u32 %v9312_v23, 16  ;;  %v725_v33 = vshll.u32 %v9314_v24, 16  ;;  %v6360_v34 = vor.u32 %v6359_v26, %v6356_v25  ;;  %v6365_v37 = vrot.slane %v6363_v29, 5  ;;  %v379_v58 = vld [vmem:[%s9289_s18 + $0x14] sm:$0x1]  ;;  %v8663_v5 = vld [vmem:[%s12031_s1 + $0x100] sm:$0xff]  }
  0x43   : > { %v579_v36 = vor.u32 %v578_v27, %v574_v19  ;;  %v6369_v38 = vrot.slane %v6367_v30, 4  ;;  %v6373_v39 = vshll.u32 %v412_v15, 16  ;;  %v783_v46 = vrot.slane %v9298_v12, 1  ;;  %v413_v59 = vld [vmem:[%s9289_s18 + $0x9c] sm:$0xf]  ;;  %v8665_v15 = vld [vmem:[%s12031_s1 + $0x88] sm:$0xff]  }
  0x44   : > { %7463 = vmatpush3.bf16.msra.mxu0 %v8647_v7  ;;  %8579 = vmatpush3.bf16.msra.mxu1 %v8647_v7  ;;  %v722_v41 = vrot.slane %v720_v32, 1  ;;  %v727_v42 = vrot.slane %v725_v33, 1  ;;  %v6361_v43 = vrot.slane %v6360_v34, 4  ;;  %v9357_v62 = vcombine.low %v377_v55, %v378_v57  ;;  %v414_v0 = vld [vmem:[%s9289_s18 + $0xa0] sm:$0xf]  ;;  %v8670_v20 = vld [vmem:[%s12031_s1 + $0xd0] sm:$0xff]  }
  0x45   : > { %7464 = vmatprep.subr.bf16.mxu0 %v8648_v8  ;;  %8572 = vmatprep.subr.bf16.mxu1 %v8648_v8  ;;  %v584_v45 = vsel %vm572_vm0, %v579_v36, %v583_v28  ;;  %v6370_v48 = vor.u32 %v6369_v38, %v6365_v37  ;;  %v6375_v49 = vrot.slane %v6373_v39, 5  ;;  %v9359_v63 = vcombine.low %v379_v58, %v379_v58  ;;  %v415_v1 = vld [vmem:[%s9289_s18 + $0xa4] sm:$0x1]  ;;  %v8673_v21 = vld [vmem:[%s12031_s1 + $0x148] sm:$0xff]   ;;  %v380_v27 = vld [vmem:[%s9289_s18 + $0x18] sm:$0xf] }
  0x46   : > { %1506 = vmatprep.mubr.bf16.mxu0 %v584_v45  ;;  %v723_v50 = vor.u32 %v722_v41, %v718_v31  ;;  %v6366_v51 = vsel %vm9332_vm3, %v6361_v43, %v6365_v37  ;;  %v9365_v3 = vcombine.low %v413_v59, %v414_v0  ;;  %v9367_v4 = vcombine.low %v415_v1, %v415_v1  ;;  %v8675_v26 = vld [vmem:[%s12031_s1 + $0x108] sm:$0xff]   ;;  %v381_v28 = vld [vmem:[%s9289_s18 + $0x1c] sm:$0xf]  ;;  %v8671_v31 = vld [vmem:[%s12031_s1 + $0x90] sm:$0xff]   ;;  %s6950_s21 = sshll.u32 %s11812_s28, 4  ;;  %p12128_p9 = scmp.ne.s32.totalorder %s12054_s23, 0  ;;  %s11982_s21 = int_to_ptr.vmem [resolvable:$true] %s6950_s21 }
  0x47   : > { %v6371_v53 = vrot.slane %v6370_v48, 4  ;;  %v586_v6 = vshrl.u32 %v9357_v62, 16  ;;  %v588_v7 = vshll.u32 %v9357_v62, 16  ;;  %v593_v8 = vshll.u32 %v9359_v63, 16  ;;  %v382_v32 = vld [vmem:[%s9289_s18 + $0x20] sm:$0x1] }
  0x48   : > { %7465 = vmatpush3.bf16.msra.mxu0 %v8649_v9  ;;  %8580 = vmatpush3.bf16.msra.mxu1 %v8649_v9  ;;  %v9346_v56 = vsel %vm572_vm0, %v723_v50, %v727_v42  ;;  %v8664_v9 = vld [vmem:[%s12031_s1 + $0xc8] sm:$0xff]   ;;  %v732_v13 = vshll.u32 %v9365_v3, 16  ;;  %v737_v14 = vshll.u32 %v9367_v4, 16  ;;  %v782_v29 = vrot.slane %v9295_v11, 1  ;;  %v8672_v38 = vld [vmem:[%s12031_s1 + $0xd8] sm:$0xff]   ;;  %s9041_s29 = scalar_lea.vmem %s11982_s21, 4096 }
  0x49   : > { %7466 = vmatprep.subr.bf16.mxu0 %v8650_v10  ;;  %8573 = vmatprep.subr.bf16.mxu1 %v8650_v10  ;;  %v6376_v60 = vsel %vm9332_vm3, %v6371_v53, %v6375_v49  ;;  %v730_v10 = vshrl.u32 %v9365_v3, 16  ;;  %v590_v16 = vrot.slane %v588_v7, 1  ;;  %v595_v17 = vrot.slane %v593_v8, 1  ;;  %v416_v36 = vld [vmem:[%s9289_s18 + $0xa8] sm:$0xf]  ;;  %v8674_v59 = vld [vmem:[%s12031_s1 + $0x98] sm:$0xff]   ;;  %p9042_p6 = scmp.ne.s32.totalorder %s11982_s21, %s9041_s29 }
  0x4a   : > { %1602 = vmatprep.mubr.bf16.mxu1 %v9346_v56  ;;  %v9363_v2 = vcombine.low %v6366_v51, %v6376_v60  ;;  %v739_v19 = vrot.slane %v737_v14, 1  ;;  %v9405_v33 = vcombine.low %v380_v27, %v381_v28  ;;  %v6114_v34 = vshrl.u32 %v380_v27, 16  ;;  %v417_v42 = vld [vmem:[%s9289_s18 + $0xac] sm:$0xf]  ;;  %v9419_v43 = vld [vmem:[%s9289_s18 + $0xb0] sm:$0x1] }
  0x4b   : > { %v9415_v39 = vcombine.low %v382_v32, %v382_v32  ;;  %v6127_v41 = vshrl.u32 %v381_v28, 16  ;;  %v6133_v53 = vshll.u32 %v382_v32, 16  ;;  %v9425_v57 = vcombine.low %v416_v36, %v417_v42  ;;  %p9043_p10 = pnand %p9042_p6, %p12128_p9  ;;  %s9113_s12 = smov [#allocation6]  }
  0x4c   : > { %7467 = vmatpush3.bf16.msra.mxu0 %v8651_v18  ;;  %8581 = vmatpush3.bf16.msra.mxu1 %v8651_v18  ;;  %12064 = vst [vmem:[#allocation10_spill] sm:$0xff] %v9363_v2  ;;  %v734_v18 = vrot.slane %v732_v13, 1  ;;  %v600_v45 = vshll.u32 %v9405_v33, 16  ;;  %v6116_v48 = vrot.slane %v6114_v34, 4  ;;  %v9429_v58 = vcombine.low %v9419_v43, %v9419_v43  ;;  %v402_v2 = vld [vmem:[%s9289_s18 + $0x70] sm:$0xf] }
  0x4d   : > { %7468 = vmatprep.subr.bf16.mxu0 %v8652_v22  ;;  %8574 = vmatprep.subr.bf16.mxu1 %v8652_v22  ;;  %v591_v22 = vor.u32 %v590_v16, %v586_v6  ;;  %v605_v50 = vshll.u32 %v9415_v39, 16  ;;  %v6135_v0 = vrot.slane %v6133_v53, 5  ;;  %v6402_v1 = vshrl.u32 %v416_v36, 16  ;;  %v8691_v53 = vld [vmem:[%s12031_s1 + $0x110] sm:$0xff]   ;;  %p9044_p12 = pneg %p9043_p10  ;;  %s9045_s11 = sshll.u32 %s9113_s12, 4  ;;  %s9046_s11 = int_to_ptr.vmem [resolvable:$false] %s9045_s11 }
  0x4e   : > { %v735_v25 = vor.u32 %v734_v18, %v730_v10  ;;  %v742_v7 = vshrl.u32 %v9425_v57, 16  ;;  %v744_v8 = vshll.u32 %v9425_v57, 16  ;;  %v749_v13 = vshll.u32 %v9429_v58, 16  ;;  %s9047_s20 = scalar_lea.vmem %s9046_s11, 8192  ;;  %p9048_p2 = scmp.lt.s32.totalorder %s11982_s21, %s9046_s11 }
  0x4f   : > { %v9399_v30 = vsel %vm572_vm0, %v591_v22, %v595_v17  ;;  %v607_v60 = vrot.slane %v605_v50, 1  ;;  %v6404_v14 = vrot.slane %v6402_v1, 4  ;;  %p9049_p3 = scmp.lt.s32.totalorder %s9047_s20, %s9041_s29 }
  0x50   : > { %7469 = vmatpush3.bf16.msra.mxu0 %v8653_v35  ;;  %8582 = vmatpush3.bf16.msra.mxu1 %v8653_v35  ;;  %v6117_v35 = vshll.u32 %v380_v27, 16  ;;  %v9410_v37 = vsel %vm572_vm0, %v735_v25, %v739_v19  ;;  %v746_v18 = vrot.slane %v744_v8, 1  ;;  %v6411_v19 = vshll.u32 %v417_v42, 16  ;;  %v383_v27 = vld [vmem:[%s9289_s18 + $0x24] sm:$0xf] }
  0x51   : > { %7470 = vmatprep.subr.bf16.mxu0 %v8654_v40  ;;  %8575 = vmatprep.subr.bf16.mxu1 %v8654_v40  ;;  %v6123_v40 = vshll.u32 %v381_v28, 16  ;;  %v6415_v25 = vshrl.u32 %v417_v42, 16  ;;  %v8689_v28 = vld [vmem:[%s12031_s1 + $0x150] sm:$0xff]   ;;  %v8682_v42 = vld [vmem:[%s12031_s1 + $0xe8] sm:$0xff]   ;;  %p9050_p4 = por %p9049_p3, %p9048_p2 }
  0x52   : > { %v6119_v49 = vrot.slane %v6117_v35, 5  ;;  %v747_v32 = vor.u32 %v746_v18, %v742_v7  ;;  %v6413_v34 = vrot.slane %v6411_v19, 5  ;;  %v6421_v35 = vshll.u32 %v9419_v43, 16  ;;  %v8688_v7 = vld [vmem:[%s12031_s1 + $0xf0] sm:$0xff]  }
  0x53   : > { %v6125_v51 = vrot.slane %v6123_v40, 5  ;;  %p9051_p7 = pnand %p9050_p4, %p9044_p12 }
  0x54   : > { %7471 = vmatpush3.bf16.msra.mxu0 %v8655_v44  ;;  %8583 = vmatpush3.bf16.msra.mxu1 %v8655_v44  ;;  %v598_v44 = vshrl.u32 %v9405_v33, 16  ;;  %v6120_v55 = vor.u32 %v6119_v49, %v6116_v48  ;;  %v419_v48 = vld [vmem:[%s9289_s18 + $0xb4] sm:$0xf]  ;;  %v420_v49 = vld [vmem:[%s9289_s18 + $0xb8] sm:$0xf]  ;;  %v6423_v43 = vrot.slane %v6421_v35, 5 }
  0x55   : > { %7568 = vmatprep.subr.bf16.mxu1 %v8660_v52  ;;  %7680 = vmatprep.subr.bf16.mxu0 %v8661_v54  ;;  %v6129_v52 = vrot.slane %v6127_v41, 4  ;;  %v602_v54 = vrot.slane %v600_v45, 1  ;;  %v6417_v41 = vrot.slane %v6415_v25, 4 }
  0x56   : > { %v6121_v6 = vrot.slane %v6120_v55, 4 }
  0x57   : > { %1507 = vmatmul.mubr.bf16.vlgmr.msra.gmra.mrb[0].mxu0 %v9295_v11  ;;  %1603 = vmatmul.mubr.bf16.vlgmr.msra.gmra.mrb[0].mxu1 %v9312_v23  ;;  %v6418_v55 = vor.u32 %v6417_v41, %v6413_v34 }
  0x58   : > { %7569 = vmatpush3.bf16.msra.mxu1 %v8662_v61  ;;  %7681 = vmatpush3.bf16.msra.mxu0 %v8663_v5  ;;  %v6130_v61 = vor.u32 %v6129_v52, %v6125_v51  ;;  %v603_v5 = vor.u32 %v602_v54, %v598_v44  ;;  %v6126_v17 = vsel %vm9332_vm3, %v6121_v6, %v6125_v51  ;;  %v421_v51 = vld [vmem:[%s9289_s18 + $0xbc] sm:$0x1] }
  0x59   : > { %7570 = vmatprep.subr.bf16.mxu1 %v8664_v9  ;;  %7682 = vmatprep.subr.bf16.mxu0 %v8673_v21  ;;  %v8680_v9 = vld [vmem:[%s12031_s1 + $0xe0] sm:$0xff]   ;;  %v751_v21 = vrot.slane %v749_v13, 1  ;;  %v9475_v52 = vcombine.low %v419_v48, %v420_v49  ;;  %v9489_v1 = vcombine.low %v421_v51, %v421_v51 }
  0x5a   : > { %1514 = vmatprep.mubr.bf16.mxu0 %v9399_v30  ;;  %1610 = vmatprep.mubr.bf16.mxu1 %v9410_v37  ;;  %v6131_v10 = vrot.slane %v6130_v61, 4  ;;  %v9443_v16 = vsel %vm572_vm0, %v603_v5, %v607_v60 }
  0x5b   : > { %v9472_v50 = vsel %vm572_vm0, %v747_v32, %v751_v21  ;;  %v754_v5 = vshrl.u32 %v9475_v52, 16  ;;  %v756_v6 = vshll.u32 %v9475_v52, 16  ;;  %v386_v32 = vld [vmem:[%s9289_s18 + $0x30] sm:$0xf] }
  0x5c   : > { %7571 = vmatpush3.bf16.msra.mxu1 %v8665_v15  ;;  %7683 = vmatpush3.bf16.msra.mxu0 %v8675_v26  ;;  %v6405_v15 = vshll.u32 %v416_v36, 16  ;;  %v8681_v26 = vld [vmem:[%s12031_s1 + $0xa0] sm:$0xff]   ;;  %v384_v36 = vld [vmem:[%s9289_s18 + $0x28] sm:$0xf]  ;;  %v6165_v41 = vshll.u32 %v386_v32, 16 }
  0x5d   : > { %7572 = vmatprep.subr.bf16.mxu1 %v8670_v20  ;;  %v6136_v20 = vsel %vm9332_vm3, %v6131_v10, %v6135_v0  ;;  %v9465_v44 = vcombine.low %v383_v27, %v384_v36  ;;  %7684 = vmatprep.subr.bf16.mxu0 %v8689_v28  ;;  %v8697_v27 = vld [vmem:[%s12031_s1 + $0x118] sm:$0xff]  }
  0x5e   : > { %v6407_v22 = vrot.slane %v6405_v15, 5  ;;  %v761_v15 = vshll.u32 %v9489_v1, 16  ;;  %v388_v36 = vld [vmem:[%s9289_s18 + $0x38] sm:$0x1] }
  0x5f   : > { %1515 = vmatmul.mubr.bf16.gmra.mrb[4].mxu0 %v9357_v62  ;;  %1611 = vmatmul.mubr.bf16.gmra.mrb[4].mxu1 %v9365_v3  ;;  %v610_v60 = vshrl.u32 %v9465_v44, 16  ;;  %v612_v61 = vshll.u32 %v9465_v44, 16  ;;  %v9532_v48 = vcombine.low %v388_v36, %v388_v36  ;;  %v6181_v51 = vshll.u32 %v388_v36, 16 }
  0x60   : > { %7573 = vmatpush3.bf16.msra.mxu1 %v8671_v31  ;;  %1522 = vmatprep.mubr.bf16.mxu0 %v9443_v16  ;;  %v9457_v31 = vcombine.low %v6126_v17, %v6136_v20  ;;  %v6408_v40 = vor.u32 %v6407_v22, %v6404_v14  ;;  %v758_v14 = vrot.slane %v756_v6, 1  ;;  %v8696_v17 = vld [vmem:[%s12031_s1 + $0x158] sm:$0xff]   ;;  %v8690_v20 = vld [vmem:[%s12031_s1 + $0xb0] sm:$0xff]   ;;  %v763_v25 = vrot.slane %v761_v15, 1 }
  0x61   : > { %7574 = vmatprep.subr.bf16.mxu1 %v8672_v38  ;;  %v385_v38 = vld [vmem:[%s9289_s18 + $0x2c] sm:$0x1]  ;;  %1618 = vmatprep.mubr.bf16.mxu1 %v9472_v50  ;;  %v614_v10 = vrot.slane %v612_v61, 1  ;;  %v629_v61 = vshll.u32 %v9532_v48, 16  ;;  %v6183_v6 = vrot.slane %v6181_v51, 5 }
  0x62   : > { %12065 = vst [vmem:[#allocation11_spill] sm:$0xff] %v9457_v31  ;;  %v9467_v45 = vcombine.low %v385_v38, %v385_v38  ;;  %v6409_v54 = vrot.slane %v6408_v40, 4  ;;  %7685 = vmatpush3.bf16.msra.mxu0 %v8691_v53  ;;  %v759_v22 = vor.u32 %v758_v14, %v754_v5  ;;  %v6162_v40 = vshrl.u32 %v386_v32, 16  ;;  %v8702_v53 = vld [vmem:[%s12031_s1 + $0x160] sm:$0xff]  }
  0x63   : > { %v615_v19 = vor.u32 %v614_v10, %v610_v60  ;;  %7686 = vmatprep.subr.bf16.mxu0 %v8696_v17  ;;  %v6167_v60 = vrot.slane %v6165_v41, 5  ;;  %v390_v10 = vld [vmem:[%s9289_s18 + $0x40] sm:$0xf]  ;;  %v631_v14 = vrot.slane %v629_v61, 1  ;;  %v391_v17 = vld [vmem:[%s9289_s18 + $0x44] sm:$0x1] }
  0x64   : > { %7575 = vmatpush3.bf16.msra.mxu1 %v8674_v59  ;;  %v8683_v59 = vld [vmem:[%s12031_s1 + $0xa8] sm:$0xff]   ;;  %v617_v0 = vshll.u32 %v9467_v45, 16  ;;  %v6414_v8 = vsel %vm9332_vm3, %v6409_v54, %v6413_v34  ;;  %v387_v34 = vld [vmem:[%s9289_s18 + $0x34] sm:$0xf]  ;;  %v9522_v35 = vsel %vm572_vm0, %v759_v22, %v763_v25  ;;  %v8703_v41 = vld [vmem:[%s12031_s1 + $0x120] sm:$0xff]  }
  0x65   : > { %7576 = vmatprep.subr.bf16.mxu1 %v8680_v9  ;;  %v6419_v9 = vrot.slane %v6418_v55, 4  ;;  %12067 = vst [vmem:[#allocation13_spill] sm:$0xff] %v9522_v35  ;;  %v9525_v38 = vcombine.low %v386_v32, %v387_v34  ;;  %v6171_v49 = vshll.u32 %v387_v34, 16  ;;  %v394_v32 = vld [vmem:[%s9289_s18 + $0x50] sm:$0x1] }
  0x66   : > { %v619_v13 = vrot.slane %v617_v0, 1  ;;  %7687 = vmatpush3.bf16.msra.mxu0 %v8697_v27  ;;  %v393_v27 = vld [vmem:[%s9289_s18 + $0x4c] sm:$0xf]  ;;  %v9578_v51 = vcombine.low %v394_v32, %v394_v32  ;;  %v395_v61 = vld [vmem:[%s9289_s18 + $0x54] sm:$0xf] }
  0x67   : > { %1523 = vmatmul.mubr.bf16.gmra.mrb[8].mxu0 %v9405_v33  ;;  %1619 = vmatmul.mubr.bf16.gmra.mrb[8].mxu1 %v9425_v57  ;;  %v6424_v18 = vsel %vm9332_vm3, %v6419_v9, %v6423_v43  ;;  %v6175_v43 = vshrl.u32 %v387_v34, 16  ;;  %v622_v54 = vshrl.u32 %v9525_v38, 16  ;;  %v624_v55 = vshll.u32 %v9525_v38, 16  ;;  %v389_v9 = vld [vmem:[%s9289_s18 + $0x3c] sm:$0xf] }
  0x68   : > { %7577 = vmatpush3.bf16.msra.mxu1 %v8681_v26  ;;  %v9507_v21 = vcombine.low %v6414_v8, %v6424_v18  ;;  %v8692_v26 = vld [vmem:[%s12031_s1 + $0xf8] sm:$0xff]   ;;  %v9516_v28 = vsel %vm572_vm0, %v615_v19, %v619_v13  ;;  %1626 = vmatprep.mubr.bf16.mxu1 %v9522_v35  ;;  %v6173_v0 = vrot.slane %v6171_v49, 5  ;;  %v785_v13 = vrot.slane %v9357_v62, 1  ;;  %v409_v35 = vld [vmem:[%s9289_s18 + $0x8c] sm:$0x1] }
  0x69   : > { %7578 = vmatprep.subr.bf16.mxu1 %v8682_v42  ;;  %1530 = vmatprep.mubr.bf16.mxu0 %v9516_v28  ;;  %v8693_v42 = vld [vmem:[%s12031_s1 + $0xb8] sm:$0xff]   ;;  %v6177_v5 = vrot.slane %v6175_v43, 4  ;;  %v9546_v18 = vcombine.low %v389_v9, %v390_v10  ;;  %v786_v19 = vrot.slane %v9359_v63, 1  ;;  %v6219_v9 = vshll.u32 %v393_v27, 16 }
  0x6a   : > { %12066 = vst [vmem:[#allocation12_spill] sm:$0xff] %v9507_v21  ;;  %7688 = vmatprep.subr.bf16.mxu0 %v8702_v53  ;;  %v397_v10 = vld [vmem:[%s9289_s18 + $0x5c] sm:$0x1] }
  0x6b   : > { %v6178_v15 = vor.u32 %v6177_v5, %v6173_v0  ;;  %v636_v63 = vshll.u32 %v9546_v18, 16  ;;  %7689 = vmatpush3.bf16.msra.mxu0 %v8703_v41  ;;  %v8707_v5 = vld [vmem:[%s12031_s1 + $0x128] sm:$0xff]  }
  0x6c   : > { %7579 = vmatpush3.bf16.msra.mxu1 %v8683_v59  ;;  %v6164_v59 = vrot.slane %v6162_v40, 4  ;;  %v634_v40 = vshrl.u32 %v9546_v18, 16 }
  0x6d   : > { %7580 = vmatprep.subr.bf16.mxu1 %v8688_v7  ;;  %v626_v7 = vrot.slane %v624_v55, 1  ;;  %v6179_v36 = vrot.slane %v6178_v15, 4  ;;  %v638_v43 = vrot.slane %v636_v63, 1 }
  0x6e   : > { %v6168_v8 = vor.u32 %v6167_v60, %v6164_v59 }
  0x6f   : > { %1531 = vmatmul.mubr.bf16.gmra.mrb[12].mxu0 %v9465_v44  ;;  %1627 = vmatmul.mubr.bf16.gmra.mrb[12].mxu1 %v9475_v52  ;;  %v627_v22 = vor.u32 %v626_v7, %v622_v54  ;;  %v653_v7 = vshll.u32 %v9578_v51, 16 }
  0x70   : > { %7581 = vmatpush3.bf16.msra.mxu1 %v8690_v20  ;;  %1667 = vmatprep.mubr.bf16.mxu1 %v9357_v62  ;;  %v392_v20 = vld [vmem:[%s9289_s18 + $0x48] sm:$0xf]  ;;  %v6169_v25 = vrot.slane %v6168_v8, 4  ;;  %v784_v62 = vsel %vm781_vm4, %v782_v29, %v783_v46  ;;  %v6184_v29 = vsel %vm9332_vm3, %v6179_v36, %v6183_v6  ;;  %v639_v6 = vor.u32 %v638_v43, %v634_v40 }
  0x71   : > { %7582 = vmatprep.subr.bf16.mxu1 %v8692_v26  ;;  %v9550_v26 = vcombine.low %v391_v17, %v391_v17  ;;  %v6210_v34 = vshrl.u32 %v392_v20, 16  ;;  %v9565_v49 = vsel %vm572_vm0, %v627_v22, %v631_v14  ;;  %v9570_v11 = vcombine.low %v392_v20, %v393_v27  ;;  %v8706_v46 = vld [vmem:[%s12031_s1 + $0x168] sm:$0xff]   ;;  %v8712_v14 = vld [vmem:[%s12031_s1 + $0x170] sm:$0xff]  }
  0x72   : > { %1538 = vmatprep.mubr.bf16.mxu0 %v9565_v49  ;;  %v6213_v8 = vshll.u32 %v392_v20, 16  ;;  %7690 = vmatprep.subr.bf16.mxu0 %v8706_v46  ;;  %v6223_v17 = vshrl.u32 %v393_v27, 16  ;;  %v6229_v22 = vshll.u32 %v394_v32, 16  ;;  %v8713_v20 = vld [vmem:[%s12031_s1 + $0x130] sm:$0xff]   ;;  %v9604_v27 = vsel %vm781_vm4, %v785_v13, %v786_v19  ;;  %v8716_v46 = vld [vmem:[%s12031_s1 + $0x178] sm:$0xff]   ;;  %v8720_v13 = vld [vmem:[%s12031_s1 + $0x1c0] sm:$0xff]  }
  0x73   : > { %v641_v12 = vshll.u32 %v9550_v26, 16  ;;  %v6212_v53 = vrot.slane %v6210_v34, 4  ;;  %v646_v59 = vshrl.u32 %v9570_v11, 16  ;;  %v648_v60 = vshll.u32 %v9570_v11, 16  ;;  %7691 = vmatpush3.bf16.msra.mxu0 %v8707_v5  ;;  %v8717_v5 = vld [vmem:[%s12031_s1 + $0x138] sm:$0xff]  }
  0x74   : > { %7583 = vmatpush3.bf16.msra.mxu1 %v8693_v42  ;;  %v6174_v42 = vsel %vm9332_vm3, %v6169_v25, %v6173_v0  ;;  %v396_v0 = vld [vmem:[%s9289_s18 + $0x58] sm:$0xf]  ;;  %v655_v34 = vrot.slane %v653_v7, 1  ;;  %v6215_v36 = vrot.slane %v6213_v8, 5  ;;  %v6225_v63 = vrot.slane %v6223_v17, 4  ;;  %7692 = vmatprep.subr.bf16.mxu0 %v8712_v14 }
  0x75   : > { %v9580_v54 = vcombine.low %v6174_v42, %v6184_v29  ;;  %v643_v55 = vrot.slane %v641_v12, 1  ;;  %v650_v15 = vrot.slane %v648_v60, 1  ;;  %v9606_v41 = vcombine.low %v395_v61, %v396_v0  ;;  %v398_v12 = vld [vmem:[%s9289_s18 + $0x60] sm:$0xf]  ;;  %v400_v60 = vld [vmem:[%s9289_s18 + $0x68] sm:$0x1]  ;;  %7792 = vmatprep.subr.bf16.mxu1 %v8720_v13 }
  0x76   : > { %v6216_v32 = vor.u32 %v6215_v36, %v6212_v53  ;;  %v9608_v42 = vcombine.low %v397_v10, %v397_v10  ;;  %v788_v7 = vrot.slane %v9405_v33, 1  ;;  %v8721_v10 = vld [vmem:[%s12031_s1 + $0x180] sm:$0xff]   ;;  %v791_v13 = vrot.slane %v9465_v44, 1 }
  0x77   : > { %12068 = vst [vmem:[#allocation14_spill] sm:$0xff] %v9580_v54  ;;  %1539 = vmatmul.mubr.bf16.gmra.mrb[16].mxu0 %v9525_v38  ;;  %1668 = vmatmul.mubr.bf16.vlgmr.msra.gmra.mrb[16].mxu1 %v784_v62  ;;  %v9597_v25 = vsel %vm572_vm0, %v639_v6, %v643_v55  ;;  %v6221_v62 = vrot.slane %v6219_v9, 5  ;;  %v651_v40 = vor.u32 %v650_v15, %v646_v59  ;;  %v6231_v55 = vrot.slane %v6229_v22, 5  ;;  %v399_v59 = vld [vmem:[%s9289_s18 + $0x64] sm:$0xf] }
  0x78   : > { %1675 = vmatprep.mubr.bf16.mxu1 %v9405_v33  ;;  %1546 = vmatprep.mubr.bf16.mxu0 %v9597_v25  ;;  %v6217_v19 = vrot.slane %v6216_v32, 4  ;;  %v658_v53 = vshrl.u32 %v9606_v41, 16  ;;  %v660_v61 = vshll.u32 %v9606_v41, 16  ;;  %v665_v0 = vshll.u32 %v9608_v42, 16 }
  0x79   : > { %v9615_v29 = vsel %vm572_vm0, %v651_v40, %v655_v34  ;;  %v6226_v43 = vor.u32 %v6225_v63, %v6221_v62  ;;  %7693 = vmatpush3.bf16.msra.mxu0 %v8713_v20  ;;  %v9631_v8 = vcombine.low %v398_v12, %v399_v59  ;;  %v9633_v9 = vcombine.low %v400_v60, %v400_v60  ;;  %v9646_v34 = vld [vmem:[%s12031_s1 + $0x200] sm:$0xff]   ;;  %v401_v63 = vld [vmem:[%s9289_s18 + $0x6c] sm:$0xf] }
  0x7a   : > { %v6222_v14 = vsel %vm9332_vm3, %v6217_v19, %v6221_v62  ;;  %v789_v15 = vrot.slane %v9415_v39, 1  ;;  %v662_v17 = vrot.slane %v660_v61, 1  ;;  %v6258_v22 = vshrl.u32 %v398_v12, 16  ;;  %7694 = vmatprep.subr.bf16.mxu0 %v8716_v46  ;;  %v8723_v39 = vld [vmem:[%s12031_s1 + $0x1c8] sm:$0xff]   ;;  %7793 = vmatpush3.bf16.msra.mxu1 %v8721_v10 }
  0x7b   : > { %v6227_v6 = vrot.slane %v6226_v43, 4  ;;  %12069 = vst [vmem:[#allocation15_spill] sm:$0xff] %v9631_v8  ;;  %v667_v20 = vrot.slane %v665_v0, 1  ;;  %v672_v40 = vshll.u32 %v9631_v8, 16  ;;  %v677_v62 = vshll.u32 %v9633_v9, 16  ;;  %7794 = vmatprep.subr.bf16.mxu1 %v8723_v39 }
  0x7c   : > { %v663_v43 = vor.u32 %v662_v17, %v658_v53  ;;  %v6260_v19 = vrot.slane %v6258_v22, 4  ;;  %v6261_v61 = vshll.u32 %v398_v12, 16  ;;  %v6271_v21 = vshrl.u32 %v399_v59, 16  ;;  %v8724_v12 = vld [vmem:[%s12031_s1 + $0x188] sm:$0xff]   ;;  %v403_v22 = vld [vmem:[%s9289_s18 + $0x74] sm:$0x1] }
  0x7d   : > { %v6232_v36 = vsel %vm9332_vm3, %v6227_v6, %v6231_v55  ;;  %7695 = vmatpush3.bf16.msra.mxu0 %v8717_v5  ;;  %v670_v55 = vshrl.u32 %v9631_v8, 16  ;;  %v674_v0 = vrot.slane %v672_v40, 1  ;;  %v6267_v6 = vshll.u32 %v399_v59, 16 }
  0x7e   : > { %v9656_v32 = vcombine.low %v6222_v14, %v6232_v36  ;;  %8424 = vmatprep.subr.bf16.mxu0 %v9646_v34  ;;  %v9662_v46 = vsel %vm781_vm4, %v788_v7, %v789_v15  ;;  %v6263_v53 = vrot.slane %v6261_v61, 5  ;;  %v6277_v14 = vshll.u32 %v400_v60, 16  ;;  %7795 = vmatpush3.bf16.msra.mxu1 %v8724_v12  ;;  %v8726_v60 = vld [vmem:[%s12031_s1 + $0x1d0] sm:$0xff]   ;;  %v406_v12 = vld [vmem:[%s9289_s18 + $0x80] sm:$0x1] }
  0x7f   : > { %1547 = vmatmul.mubr.bf16.gmra.mrb[20].mxu0 %v9546_v18  ;;  %1676 = vmatmul.mubr.bf16.gmra.mrb[20].mxu1 %v9604_v27  ;;  %v9669_v5 = vsel %vm572_vm0, %v663_v43, %v667_v20  ;;  %v792_v59 = vrot.slane %v9467_v45, 1  ;;  %v6269_v10 = vrot.slane %v6267_v6, 5  ;;  %v6273_v17 = vrot.slane %v6271_v21, 4  ;;  %v8727_v21 = vld [vmem:[%s12031_s1 + $0x190] sm:$0xff]   ;;  %v404_v43 = vld [vmem:[%s9289_s18 + $0x78] sm:$0xf] }
  0x80   : > { %1554 = vmatprep.mubr.bf16.mxu0 %v9615_v29  ;;  %1683 = vmatprep.mubr.bf16.mxu1 %v9465_v44  ;;  %12070 = vst [vmem:[#allocation16_spill] sm:$0xff] %v9656_v32  ;;  %v679_v36 = vrot.slane %v677_v62, 1  ;;  %v6264_v40 = vor.u32 %v6263_v53, %v6260_v19  ;;  %v9673_v7 = vcombine.low %v401_v63, %v402_v2  ;;  %v6279_v20 = vrot.slane %v6277_v14, 5  ;;  %v405_v19 = vld [vmem:[%s9289_s18 + $0x7c] sm:$0xf] }
  0x81   : > { %v675_v15 = vor.u32 %v674_v0, %v670_v55  ;;  %v6274_v45 = vor.u32 %v6273_v17, %v6269_v10  ;;  %v9685_v62 = vcombine.low %v403_v22, %v403_v22  ;;  %7796 = vmatprep.subr.bf16.mxu1 %v8726_v60  ;;  %v6306_v55 = vshrl.u32 %v404_v43, 16  ;;  %v408_v32 = vld [vmem:[%s9289_s18 + $0x88] sm:$0xf] }
  0x82   : > { %v6265_v2 = vrot.slane %v6264_v40, 4  ;;  %v684_v63 = vshll.u32 %v9673_v7, 16  ;;  %7797 = vmatpush3.bf16.msra.mxu1 %v8727_v21  ;;  %v9693_v0 = vsel %vm781_vm4, %v791_v13, %v792_v59  ;;  %v682_v14 = vshrl.u32 %v9673_v7, 16 }
  0x83   : > { %v6275_v39 = vrot.slane %v6274_v45, 4  ;;  %v9696_v6 = vsel %vm572_vm0, %v675_v15, %v679_v36  ;;  %v689_v40 = vshll.u32 %v9685_v62, 16  ;;  %v6308_v60 = vrot.slane %v6306_v55, 4 }
  0x84   : > { %v6270_v61 = vsel %vm9332_vm3, %v6265_v2, %v6269_v10  ;;  %v686_v22 = vrot.slane %v684_v63, 1  ;;  %v9705_v10 = vcombine.low %v404_v43, %v405_v19  ;;  %v6309_v45 = vshll.u32 %v404_v43, 16  ;;  %v8730_v43 = vld [vmem:[%s12031_s1 + $0x198] sm:$0xff]  }
  0x85   : > { %v6280_v53 = vsel %vm9332_vm3, %v6275_v39, %v6279_v20  ;;  %v6315_v13 = vshll.u32 %v405_v19, 16  ;;  %v6319_v59 = vshrl.u32 %v405_v19, 16  ;;  %v794_v36 = vrot.slane %v9525_v38, 1  ;;  %v8729_v20 = vld [vmem:[%s12031_s1 + $0x1d8] sm:$0xff]  }
  0x86   : > { %v9702_v17 = vcombine.low %v6270_v61, %v6280_v53  ;;  %v795_v15 = vrot.slane %v9532_v48, 1  ;;  %v6325_v21 = vshll.u32 %v406_v12, 16  ;;  %v6311_v2 = vrot.slane %v6309_v45, 5  ;;  %7798 = vmatprep.subr.bf16.mxu1 %v8729_v20 }
  0x87   : > { %1555 = vmatmul.mubr.bf16.gmra.mrb[24].mxu0 %v9570_v11  ;;  %1684 = vmatmul.mubr.bf16.gmra.mrb[24].mxu1 %v9662_v46  ;;  %v6317_v63 = vrot.slane %v6315_v13, 5  ;;  %v6321_v39 = vrot.slane %v6319_v59, 4  ;;  %v691_v48 = vrot.slane %v689_v40, 1  ;;  %v9719_v19 = vcombine.low %v406_v12, %v406_v12  ;;  %v8731_v13 = vld [vmem:[%s12031_s1 + $0x1e0] sm:$0xff]  }
  0x88   : > { %1562 = vmatprep.mubr.bf16.mxu0 %v9669_v5  ;;  %1691 = vmatprep.mubr.bf16.mxu1 %v9525_v38  ;;  %12071 = vst [vmem:[#allocation17_spill] sm:$0xff] %v9702_v17  ;;  %v696_v61 = vshll.u32 %v9705_v10, 16  ;;  %v687_v55 = vor.u32 %v686_v22, %v682_v14  ;;  %v6312_v53 = vor.u32 %v6311_v2, %v6308_v60  ;;  %v6327_v17 = vrot.slane %v6325_v21, 5  ;;  %v407_v59 = vld [vmem:[%s9289_s18 + $0x84] sm:$0xf] }
  0x89   : > { %v6322_v45 = vor.u32 %v6321_v39, %v6317_v63  ;;  %7799 = vmatpush3.bf16.msra.mxu1 %v8730_v43  ;;  %v9729_v12 = vsel %vm781_vm4, %v794_v36, %v795_v15  ;;  %v694_v14 = vshrl.u32 %v9705_v10, 16  ;;  %v701_v40 = vshll.u32 %v9719_v19, 16  ;;  %v8733_v36 = vld [vmem:[%s12031_s1 + $0x1a0] sm:$0xff]   ;;  %v8734_v43 = vld [vmem:[%s12031_s1 + $0x1e8] sm:$0xff]  }
  0x8a   : > { %v6313_v54 = vrot.slane %v6312_v53, 4  ;;  %7800 = vmatprep.subr.bf16.mxu1 %v8731_v13  ;;  %v698_v22 = vrot.slane %v696_v61, 1  ;;  %v9734_v60 = vsel %vm572_vm0, %v687_v55, %v691_v48  ;;  %v9740_v2 = vcombine.low %v407_v59, %v408_v32  ;;  %v8735_v61 = vld [vmem:[%s12031_s1 + $0x1a8] sm:$0xff]   ;;  %v9776_v59 = vld [vmem:[%s9289_s18 + $0xc0] sm:$0xf] }
  0x8b   : > { %v6323_v31 = vrot.slane %v6322_v45, 4  ;;  %v9747_v39 = vcombine.low %v409_v35, %v409_v35  ;;  %v703_v32 = vrot.slane %v701_v40, 1  ;;  %v800_v35 = vrot.slane %v9570_v11, 1 }
  0x8c   : > { %v6318_v21 = vsel %vm9332_vm3, %v6313_v54, %v6317_v63  ;;  %v798_v54 = vrot.slane %v9550_v26, 1  ;;  %v699_v63 = vor.u32 %v698_v22, %v694_v14  ;;  %v708_v48 = vshll.u32 %v9740_v2, 16  ;;  %v8737_v26 = vld [vmem:[%s12031_s1 + $0x1f0] sm:$0xff]  }
  0x8d   : > { %v6328_v20 = vsel %vm9332_vm3, %v6323_v31, %v6327_v17  ;;  %v797_v31 = vrot.slane %v9546_v18, 1  ;;  %v801_v17 = vrot.slane %v9578_v51, 1  ;;  %7801 = vmatpush3.bf16.msra.mxu1 %v8733_v36  ;;  %v713_v55 = vshll.u32 %v9747_v39, 16 }
  0x8e   : > { %v9745_v15 = vcombine.low %v6318_v21, %v6328_v20  ;;  %7802 = vmatprep.subr.bf16.mxu1 %v8734_v43  ;;  %v9772_v51 = vsel %vm572_vm0, %v699_v63, %v703_v32  ;;  %v706_v45 = vshrl.u32 %v9740_v2, 16  ;;  %v710_v13 = vrot.slane %v708_v48, 1  ;;  %v8738_v21 = vld [vmem:[%s12031_s1 + $0x1b0] sm:$0xff]   ;;  %v9786_v20 = vld [vmem:[%s9289_s18 + $0xc4] sm:$0xf]  ;;  %v8740_v48 = vld [vmem:[%s12031_s1 + $0x1b8] sm:$0xff]  }
  0x8f   : > { %1563 = vmatmul.mubr.bf16.gmra.mrb[28].mxu0 %v9606_v41  ;;  %1692 = vmatmul.mubr.bf16.gmra.mrb[28].mxu1 %v9693_v0  ;;  %v9769_v53 = vsel %vm781_vm4, %v797_v31, %v798_v54  ;;  %v715_v14 = vrot.slane %v713_v55, 1  ;;  %v6450_v22 = vshrl.u32 %v9776_v59, 16  ;;  %v6453_v40 = vshll.u32 %v9776_v59, 16  ;;  %v8739_v54 = vld [vmem:[%s12031_s1 + $0x1f8] sm:$0xff]  }
  0x90   : > { %1570 = vmatprep.mubr.bf16.mxu0 %v9696_v6  ;;  %1699 = vmatprep.mubr.bf16.mxu1 %v9546_v18  ;;  %12072 = vst [vmem:[#allocation18_spill] sm:$0xff] %v9745_v15  ;;  %v6459_v31 = vshll.u32 %v9786_v20, 16  ;;  %v711_v32 = vor.u32 %v710_v13, %v706_v45  ;;  %v6463_v63 = vshrl.u32 %v9786_v20, 16  ;;  %v803_v55 = vrot.slane %v9606_v41, 1  ;;  %v9825_v15 = vld [vmem:[%s9289_s18 + $0xc8] sm:$0x1] }
  0x91   : > { %7803 = vmatpush3.bf16.msra.mxu1 %v8735_v61  ;;  %v6452_v36 = vrot.slane %v6450_v22, 4  ;;  %v6455_v43 = vrot.slane %v6453_v40, 5  ;;  %v9799_v61 = vsel %vm781_vm4, %v800_v35, %v801_v17  ;;  %v807_v35 = vrot.slane %v9633_v9, 1 }
  0x92   : > { %7804 = vmatprep.subr.bf16.mxu1 %v8737_v26  ;;  %v804_v26 = vrot.slane %v9608_v42, 1  ;;  %v9804_v40 = vsel %vm572_vm0, %v711_v32, %v715_v14  ;;  %v6461_v45 = vrot.slane %v6459_v31, 5  ;;  %v6465_v13 = vrot.slane %v6463_v63, 4 }
  0x93   : > { %v6456_v22 = vor.u32 %v6455_v43, %v6452_v36  ;;  %v809_v17 = vrot.slane %v9673_v7, 1  ;;  %v810_v42 = vrot.slane %v9685_v62, 1  ;;  %v812_v14 = vrot.slane %v9705_v10, 1 }
  0x94   : > { %v6466_v43 = vor.u32 %v6465_v13, %v6461_v45  ;;  %v813_v31 = vrot.slane %v9719_v19, 1  ;;  %v816_v32 = vrot.slane %v9747_v39, 1  ;;  %v818_v9 = vrot.slane %v9312_v23, 1 }
  0x95   : > { %7805 = vmatpush3.bf16.msra.mxu1 %v8738_v21  ;;  %v806_v21 = vrot.slane %v9631_v8, 1  ;;  %v6457_v36 = vrot.slane %v6456_v22, 4  ;;  %v819_v63 = vrot.slane %v9314_v24, 1  ;;  %v821_v62 = vrot.slane %v9365_v3, 1 }
  0x96   : > { %7806 = vmatprep.subr.bf16.mxu1 %v8739_v54  ;;  %v815_v54 = vrot.slane %v9740_v2, 1  ;;  %v6469_v19 = vshll.u32 %v9825_v15, 16  ;;  %v822_v39 = vrot.slane %v9367_v4, 1  ;;  %v8728_v4 = vld [vmem:[%s12031_s1 + $0x210] sm:$0xff]  }
  0x97   : > { %1571 = vmatmul.mubr.bf16.gmra.mrb[32].mxu0 %v9631_v8  ;;  %1700 = vmatmul.mubr.bf16.gmra.mrb[32].mxu1 %v9729_v12  ;;  %v6462_v22 = vsel %vm9332_vm3, %v6457_v36, %v6461_v45  ;;  %v8725_v45 = vld [vmem:[%s12031_s1 + $0x208] sm:$0xff]   ;;  %v9843_v13 = vsel %vm781_vm4, %v806_v21, %v807_v35  ;;  %v8743_v35 = vld [vmem:[%s12031_s1 + $0x230] sm:$0xff]  }
  0x98   : > { %1578 = vmatprep.mubr.bf16.mxu0 %v9734_v60  ;;  %1707 = vmatprep.mubr.bf16.mxu1 %v9570_v11  ;;  %v6471_v24 = vrot.slane %v6469_v19, 5  ;;  %v8742_v21 = vld [vmem:[%s12031_s1 + $0x228] sm:$0xff]   ;;  %v9897_v36 = vsel %vm781_vm4, %v821_v62, %v822_v39 }
  0x99   : > { %7807 = vmatpush3.bf16.msra.mxu1 %v8740_v48  ;;  %v9822_v48 = vsel %vm781_vm4, %v803_v55, %v804_v26  ;;  %v8749_v62 = vld [vmem:[#allocation3] sm:$0xff]  }
  0x9f   : > { %1579 = vmatmul.mubr.bf16.gmra.mrb[36].mxu0 %v9673_v7  ;;  %1708 = vmatmul.mubr.bf16.gmra.mrb[36].mxu1 %v9769_v53 }
  0xa0   : > { %1586 = vmatprep.mubr.bf16.mxu0 %v9772_v51  ;;  %1715 = vmatprep.mubr.bf16.mxu1 %v9606_v41 }
  0xa7   : > { %1587 = vmatmul.mubr.bf16.gmra.mrb[40].mxu0 %v9705_v10  ;;  %1716 = vmatmul.mubr.bf16.gmra.mrb[40].mxu1 %v9799_v61 }
  0xa8   : > { %1594 = vmatprep.mubr.bf16.mxu0 %v9804_v40  ;;  %1723 = vmatprep.mubr.bf16.mxu1 %v9631_v8  ;;  %v6467_v8 = vrot.slane %v6466_v43, 4  ;;  %v824_v43 = vrot.slane %v9425_v57, 1 }
  0xaa   : > { %v6472_v55 = vsel %vm9332_vm3, %v6467_v8, %v6471_v24  ;;  %v8732_v8 = vld [vmem:[%s12031_s1 + $0x218] sm:$0xff]  }
  0xab   : > { %v9837_v26 = vcombine.low %v6462_v22, %v6472_v55 }
  0xad   : > { %12073 = vst [vmem:[#allocation19_spill] sm:$0xff] %v9837_v26 }
  0xaf   : > { %1595 = vmatmul.mubr.bf16.gmra.mrb[44].mxu0 %v9740_v2  ;;  %1724 = vmatmul.mubr.bf16.gmra.mrb[44].mxu1 %v9822_v48 }
  0xb0   : > { %1731 = vmatprep.mubr.bf16.mxu1 %v9673_v7  ;;  %1828 = vmatprep.mubr.bf16.mxu0 %v9604_v27  ;;  %v9854_v27 = vsel %vm781_vm4, %v809_v17, %v810_v42  ;;  %v9880_v17 = vsel %vm781_vm4, %v815_v54, %v816_v32  ;;  %v8744_v42 = vld [vmem:[%s12031_s1 + $0x238] sm:$0xff]   ;;  %v9910_v32 = vcombine.low %v9776_v59, %v9786_v20 }
  0xb7   : > { %1732 = vmatmul.mubr.bf16.gmra.mrb[48].mxu1 %v9843_v13  ;;  %1829 = vmatmul.mubr.bf16.vlgmr.msra.gmra.mrb[48].mxu0 %v9399_v30  ;;  %v8741_v30 = vld [vmem:[%s12031_s1 + $0x220] sm:$0xff]  }
  0xb8   : > { %8425 = vmatpush3.bf16.msra.mxu0 %v9646_v34  ;;  %1739 = vmatprep.mubr.bf16.mxu1 %v9705_v10  ;;  %v9867_v34 = vsel %vm781_vm4, %v812_v14, %v813_v31  ;;  %v9890_v14 = vsel %vm781_vm4, %v818_v9, %v819_v63  ;;  %v825_v31 = vrot.slane %v9429_v58, 1  ;;  %v827_v9 = vrot.slane %v9475_v52, 1 }
  0xb9   : > { %1836 = vmatprep.mubr.bf16.mxu0 %v9662_v46  ;;  %8426 = vmatprep.subr.bf16.mxu0 %v8725_v45  ;;  %v828_v63 = vrot.slane %v9489_v1, 1 }
  0xba   : > { %v9906_v54 = vsel %vm781_vm4, %v824_v43, %v825_v31 }
  0xbb   : > { %v9919_v58 = vsel %vm781_vm4, %v827_v9, %v828_v63 }
  0xbc   : > { %8427 = vmatpush3.bf16.msra.mxu0 %v8725_v45 }
  0xbd   : > { %8428 = vmatprep.subr.bf16.mxu0 %v8728_v4 }
  0xbf   : > { %1740 = vmatmul.mubr.bf16.gmra.mrb[52].mxu1 %v9854_v27  ;;  %1837 = vmatmul.mubr.bf16.gmra.mrb[52].mxu0 %v9443_v16 }
  0xc0   : > { %1747 = vmatprep.mubr.bf16.mxu1 %v9740_v2  ;;  %1844 = vmatprep.mubr.bf16.mxu0 %v9693_v0 }
  0xc1   : > { %8429 = vmatpush3.bf16.msra.mxu0 %v8728_v4 }
  0xc2   : > { %8430 = vmatprep.subr.bf16.mxu0 %v8732_v8 }
  0xc5   : > { %8431 = vmatpush3.bf16.msra.mxu0 %v8732_v8 }
  0xc6   : > { %8432 = vmatprep.subr.bf16.mxu0 %v8741_v30 }
  0xc7   : > { %1748 = vmatmul.mubr.bf16.gmra.mrb[56].mxu1 %v9867_v34  ;;  %1845 = vmatmul.mubr.bf16.gmra.mrb[56].mxu0 %v9516_v28 }
  0xc8   : > { %1755 = vmatprep.mubr.bf16.mxu1 %v9312_v23  ;;  %1852 = vmatprep.mubr.bf16.mxu0 %v9729_v12 }
  0xc9   : > { %8433 = vmatpush3.bf16.msra.mxu0 %v8741_v30 }
  0xca   : > { %8434 = vmatprep.subr.bf16.mxu0 %v8742_v21 }
  0xcd   : > { %8435 = vmatpush3.bf16.msra.mxu0 %v8742_v21 }
  0xce   : > { %8436 = vmatprep.subr.bf16.mxu0 %v8743_v35 }
  0xcf   : > { %1756 = vmatmul.mubr.bf16.gmra.mrb[60].mxu1 %v9880_v17  ;;  %1853 = vmatmul.mubr.bf16.gmra.mrb[60].mxu0 %v9565_v49 }
  0xd0   : > { %1763 = vmatprep.mubr.bf16.mxu1 %v9365_v3  ;;  %1860 = vmatprep.mubr.bf16.mxu0 %v9769_v53 }
  0xd1   : > { %8437 = vmatpush3.bf16.msra.mxu0 %v8743_v35 }
  0xd2   : > { %8438 = vmatprep.subr.bf16.mxu0 %v8744_v42 }
  0xd5   : > { %8439 = vmatpush3.bf16.msra.mxu0 %v8744_v42 }
  0xd7   : > { %1764 = vmatmul.mubr.bf16.gmra.mrb[64].mxu1 %v9890_v14  ;;  %1861 = vmatmul.mubr.bf16.gmra.mrb[64].mxu0 %v9597_v25 }
  0xd8   : > { %1771 = vmatprep.mubr.bf16.mxu1 %v9425_v57  ;;  %1868 = vmatprep.mubr.bf16.mxu0 %v9799_v61 }
  0xdf   : > { %1772 = vmatmul.mubr.bf16.gmra.mrb[68].mxu1 %v9897_v36  ;;  %1869 = vmatmul.mubr.bf16.gmra.mrb[68].mxu0 %v9615_v29 }
  0xe0   : > { %1779 = vmatprep.mubr.bf16.mxu1 %v9475_v52  ;;  %1876 = vmatprep.mubr.bf16.mxu0 %v9822_v48 }
  0xe7   : > { %1780 = vmatmul.mubr.bf16.gmra.mrb[72].mxu1 %v9906_v54  ;;  %1877 = vmatmul.mubr.bf16.gmra.mrb[72].mxu0 %v9669_v5 }
  0xe8   : > { %1787 = vmatprep.mubr.bf16.mxu1 %v9910_v32  ;;  %1884 = vmatprep.mubr.bf16.mxu0 %v9843_v13 }
  0xef   : > { %1788 = vmatmul.mubr.bf16.gmra.mrb[76].mxu1 %v9919_v58  ;;  %1885 = vmatmul.mubr.bf16.gmra.mrb[76].mxu0 %v9696_v6 }
  0xf0   : > { %1892 = vmatprep.mubr.bf16.mxu0 %v9854_v27  ;;  %1989 = vmatprep.mubr.bf16.mxu1 %v9443_v16  ;;  %v858_v16 = vshll.u32 %v9910_v32, 16 }
  0xf7   : > { %1893 = vmatmul.mubr.bf16.gmra.mrb[80].mxu0 %v9734_v60  ;;  %1990 = vmatmul.mubr.bf16.vlgmr.msra.gmra.mrb[80].mxu1 %v9405_v33  ;;  %v7065_v33 = vcombine.low %v9825_v15, %v9825_v15 }
  0xf8   : > { %1900 = vmatprep.mubr.bf16.mxu0 %v9867_v34  ;;  %1997 = vmatprep.mubr.bf16.mxu1 %v9516_v28  ;;  %v856_v28 = vshrl.u32 %v9910_v32, 16 }
  0xf9   : > { %v869_v1 = vrot.slane %v7065_v33, 1 }
  0xff   : > { %1901 = vmatmul.mubr.bf16.gmra.mrb[84].mxu0 %v9772_v51  ;;  %1998 = vmatmul.mubr.bf16.gmra.mrb[84].mxu1 %v9465_v44  ;;  %v868_v44 = vrot.slane %v9910_v32, 1 }
 0x100   : > { %1908 = vmatprep.mubr.bf16.mxu0 %v9880_v17  ;;  %2005 = vmatprep.mubr.bf16.mxu1 %v9565_v49 }
 0x101   : > { %v9955_v49 = vsel %vm781_vm4, %v868_v44, %v869_v1 }
 0x107   : > { %1909 = vmatmul.mubr.bf16.gmra.mrb[88].mxu0 %v9804_v40  ;;  %2006 = vmatmul.mubr.bf16.gmra.mrb[88].mxu1 %v9525_v38  ;;  %v860_v38 = vrot.slane %v858_v16, 1 }
 0x108   : > { %1916 = vmatprep.mubr.bf16.mxu0 %v9890_v14  ;;  %2013 = vmatprep.mubr.bf16.mxu1 %v9597_v25  ;;  %v12075_v25 = vld [vmem:[#allocation15_spill] sm:$0xff] }
 0x10f   : > { %1917 = vmatmul.mubr.bf16.gmra.mrb[92].mxu0 %v9346_v56  ;;  %2014 = vmatmul.mubr.bf16.gmra.mrb[92].mxu1 %v9546_v18  ;;  %v863_v18 = vshll.u32 %v7065_v33, 16 }
 0x110   : > { %1924 = vmatprep.mubr.bf16.mxu0 %v9897_v36  ;;  %2021 = vmatprep.mubr.bf16.mxu1 %v9615_v29 }
 0x111   : > { %v865_v29 = vrot.slane %v863_v18, 1 }
 0x117   : > { %1925 = vmatmul.mubr.bf16.gmra.mrb[96].mxu0 %v9410_v37  ;;  %2022 = vmatmul.mubr.bf16.gmra.mrb[96].mxu1 %v9570_v11  ;;  %v12074_v11 = vld [vmem:[#allocation13_spill] sm:$0xff] }
 0x118   : > { %1932 = vmatprep.mubr.bf16.mxu0 %v9906_v54  ;;  %2029 = vmatprep.mubr.bf16.mxu1 %v9669_v5  ;;  %v8748_v5 = vld [vmem:[#allocation3 + $0x40] sm:$0xff]  }
 0x119   : > { %7928 = vmatprep.subr.bf16.mxu1 %v8748_v5 }
 0x11a   : > { %7929 = vmatpush3.bf16.msra.mxu1 %v8749_v62 }
 0x11f   : > { %1933 = vmatmul.mubr.bf16.gmra.mrb[100].mxu0 %v9472_v50  ;;  %2030 = vmatmul.mubr.bf16.gmra.mrb[100].mxu1 %v9606_v41  ;;  %v861_v41 = vor.u32 %v860_v38, %v856_v28  ;;  %v8751_v38 = vld [vmem:[#allocation3 + $0x8] sm:$0xff]  }
 0x120   : > { %1940 = vmatprep.mubr.bf16.mxu0 %v9919_v58  ;;  %2037 = vmatprep.mubr.bf16.mxu1 %v9696_v6 }
 0x121   : > { %v9966_v45 = vsel %vm572_vm0, %v861_v41, %v865_v29 }
 0x127   : > { %1941 = vmatmul.mubr.bf16.gmra.mrb[104].mxu0 %v12074_v11  ;;  %2038 = vmatmul.mubr.bf16.gmra.mrb[104].mxu1 %v12075_v25 }
 0x128   : > { %1948 = vmatprep.mubr.bf16.mxu0 %v9955_v49  ;;  %2045 = vmatprep.mubr.bf16.mxu1 %v9734_v60 }
 0x12a   : > { %v7472_v6 = vpop.f32.mrb[0].mxu0  ;;  %v7544_v15 = vpop.f32.mrb[0].mxu1 }
 0x12b   : > { %v7473_v59 = vpop.f32.mrb[1].mxu0  ;;  %v7545_v20 = vpop.f32.mrb[1].mxu1 }
 0x12c   : > { %v9961_v22 = vadd.f32 %v7473_v59, %v7472_v6  ;;  %v7475_v19 = vpop.f32.mrb[2].mxu0  ;;  %v9963_v39 = vadd.f32 %v7545_v20, %v7544_v15  ;;  %v7547_v24 = vpop.f32.mrb[2].mxu1 }
 0x12d   : > { %v7476_v55 = vpop.f32.mrb[3].mxu0  ;;  %v7548_v60 = vpop.f32.mrb[3].mxu1 }
 0x12e   : > { %v9968_v4 = vadd.f32 %v7476_v55, %v7475_v19  ;;  %v9970_v8 = vadd.f32 %v7548_v60, %v7547_v24 }
 0x12f   : > { %1949 = vmatmul.mubr.bf16.gmra.mrb[108].mxu0 %v9966_v45  ;;  %2046 = vmatmul.mubr.bf16.gmra.mrb[108].mxu1 %v9673_v7 }
 0x130   : > { %2053 = vmatprep.mubr.bf16.mxu1 %v9772_v51  ;;  %8440 = vmatprep.mubr.bf16.mxu0 %v9662_v46  ;;  %v8750_v46 = vld [vmem:[#allocation3 + $0x48] sm:$0xff]  }
 0x131   : > { %7930 = vmatprep.subr.bf16.mxu1 %v8750_v46 }
 0x132   : > { %v7478_v30 = vpop.f32.mrb[4].mxu0  ;;  %v7550_v21 = vpop.f32.mrb[4].mxu1  ;;  %7931 = vmatpush3.bf16.msra.mxu1 %v8751_v38 }
 0x133   : > { %v7479_v35 = vpop.f32.mrb[5].mxu0  ;;  %v7551_v42 = vpop.f32.mrb[5].mxu1 }
 0x134   : > { %v9976_v43 = vadd.f32 %v7479_v35, %v7478_v30  ;;  %v7481_v31 = vpop.f32.mrb[6].mxu0  ;;  %v9978_v9 = vadd.f32 %v7551_v42, %v7550_v21  ;;  %v7553_v63 = vpop.f32.mrb[6].mxu1  ;;  %v8753_v35 = vld [vmem:[#allocation3 + $0x10] sm:$0xff]  }
 0x135   : > { %v7482_v33 = vpop.f32.mrb[7].mxu0  ;;  %v7554_v16 = vpop.f32.mrb[7].mxu1 }
 0x136   : > { %v9980_v44 = vadd.f32 %v7482_v33, %v7481_v31  ;;  %v9982_v1 = vadd.f32 %v7554_v16, %v7553_v63 }
 0x137   : > { %2054 = vmatmul.mubr.bf16.gmra.mrb[112].mxu1 %v9705_v10  ;;  %8441 = vmatmul.mubr.bf16.vlgmr.msra.gmra.mrb[112].mxu0 %v9693_v0 }
 0x138   : > { %2061 = vmatprep.mubr.bf16.mxu1 %v9804_v40  ;;  %8444 = vmatprep.mubr.bf16.mxu0 %v9729_v12 }
 0x13a   : > { %v7484_v7 = vpop.f32.mrb[8].mxu0  ;;  %v7556_v28 = vpop.f32.mrb[8].mxu1 }
 0x13b   : > { %v7485_v51 = vpop.f32.mrb[9].mxu0  ;;  %v7557_v41 = vpop.f32.mrb[9].mxu1 }
 0x13c   : > { %v9988_v18 = vadd.f32 %v7485_v51, %v7484_v7  ;;  %v7487_v25 = vpop.f32.mrb[10].mxu0  ;;  %v9990_v5 = vadd.f32 %v7557_v41, %v7556_v28  ;;  %v7559_v10 = vpop.f32.mrb[10].mxu1 }
 0x13d   : > { %v7488_v29 = vpop.f32.mrb[11].mxu0  ;;  %v7560_v40 = vpop.f32.mrb[11].mxu1 }
 0x13e   : > { %v9992_v0 = vadd.f32 %v7488_v29, %v7487_v25  ;;  %v9994_v6 = vadd.f32 %v7560_v40, %v7559_v10 }
 0x13f   : > { %2062 = vmatmul.mubr.bf16.gmra.mrb[116].mxu1 %v9740_v2  ;;  %8445 = vmatmul.mubr.bf16.gmra.mrb[116].mxu0 %v9769_v53 }
 0x140   : > { %2069 = vmatprep.mubr.bf16.mxu1 %v9346_v56  ;;  %8448 = vmatprep.mubr.bf16.mxu0 %v9799_v61  ;;  %v8752_v56 = vld [vmem:[#allocation3 + $0x50] sm:$0xff]  }
 0x141   : > { %7932 = vmatprep.subr.bf16.mxu1 %v8752_v56 }
 0x142   : > { %v7490_v12 = vpop.f32.mrb[12].mxu0  ;;  %v7562_v59 = vpop.f32.mrb[12].mxu1  ;;  %7933 = vmatpush3.bf16.msra.mxu1 %v8753_v35 }
 0x143   : > { %v7491_v15 = vpop.f32.mrb[13].mxu0  ;;  %v7563_v19 = vpop.f32.mrb[13].mxu1 }
 0x144   : > { %v10000_v20 = vadd.f32 %v7491_v15, %v7490_v12  ;;  %v7493_v62 = vpop.f32.mrb[14].mxu0  ;;  %v10002_v55 = vadd.f32 %v7563_v19, %v7562_v59  ;;  %v7565_v60 = vpop.f32.mrb[14].mxu1  ;;  %v8754_v59 = vld [vmem:[#allocation3 + $0x58] sm:$0xff]  }
 0x145   : > { %v7494_v24 = vpop.f32.mrb[15].mxu0  ;;  %v7566_v2 = vpop.f32.mrb[15].mxu1  ;;  %7934 = vmatprep.subr.bf16.mxu1 %v8754_v59  ;;  %v8756_v59 = vld [vmem:[#allocation3 + $0x60] sm:$0xff]  }
 0x146   : > { %v10004_v30 = vadd.f32 %v7494_v24, %v7493_v62  ;;  %v10006_v21 = vadd.f32 %v7566_v2, %v7565_v60  ;;  %v8747_v62 = vld [vmem:[%s9289_s18 + $0xd4] ss:$0 sps:$4 sm:$0x11]  }
 0x147   : > { %2070 = vmatmul.mubr.bf16.gmra.mrb[120].mxu1 %v9312_v23  ;;  %8449 = vmatmul.mubr.bf16.gmra.mrb[120].mxu0 %v9822_v48 }
 0x148   : > { %2077 = vmatprep.mubr.bf16.mxu1 %v9410_v37  ;;  %8452 = vmatprep.mubr.bf16.mxu0 %v9843_v13 }
 0x14a   : > { %v7496_v53 = vpop.f32.mrb[16].mxu0  ;;  %v7584_v61 = vpop.f32.mrb[16].mxu1 }
 0x14b   : > { %v7497_v42 = vpop.f32.mrb[17].mxu0  ;;  %v7585_v31 = vpop.f32.mrb[17].mxu1 }
 0x14c   : > { %v10012_v63 = vadd.f32 %v7497_v42, %v7496_v53  ;;  %v7586_v33 = vadd.f32 %v7585_v31, %v7584_v61  ;;  %v7499_v16 = vpop.f32.mrb[18].mxu0  ;;  %v7587_v46 = vpop.f32.mrb[18].mxu1  ;;  %v889_v42 = vshll.u32 %v8747_v62, 16 }
 0x14d   : > { %v7500_v23 = vpop.f32.mrb[19].mxu0  ;;  %v7588_v7 = vpop.f32.mrb[19].mxu1 }
 0x14e   : > { %v10014_v48 = vadd.f32 %v7500_v23, %v7499_v16  ;;  %v7589_v37 = vadd.f32 %v7588_v7, %v7587_v46  ;;  %v10017_v13 = vadd.f32 %v7586_v33, %v9961_v22  ;;  %v891_v7 = vrot.slane %v889_v42, 1 }
 0x14f   : > { %2078 = vmatmul.mubr.bf16.gmra.mrb[124].mxu1 %v9365_v3  ;;  %8453 = vmatmul.mubr.bf16.gmra.mrb[124].mxu0 %v9854_v27  ;;  %v10029_v27 = vld [vmem:[%s9289_s18 + $0xcc] sm:$0xff]  }
 0x150   : > { %2085 = vmatprep.mubr.bf16.mxu1 %v9472_v50  ;;  %8456 = vmatprep.mubr.bf16.mxu0 %v9867_v34  ;;  %v10024_v51 = vadd.f32 %v7589_v37, %v9968_v4  ;;  %v884_v19 = vshll.u32 %v10029_v27, 16 }
 0x152   : > { %v7502_v28 = vpop.f32.mrb[20].mxu0  ;;  %v7590_v38 = vpop.f32.mrb[20].mxu1  ;;  %v886_v35 = vrot.slane %v884_v19, 1 }
 0x153   : > { %v7503_v25 = vpop.f32.mrb[21].mxu0  ;;  %v7591_v41 = vpop.f32.mrb[21].mxu1 }
 0x154   : > { %v10026_v29 = vadd.f32 %v7503_v25, %v7502_v28  ;;  %v7592_v22 = vadd.f32 %v7591_v41, %v7590_v38  ;;  %v7505_v10 = vpop.f32.mrb[22].mxu0  ;;  %v7593_v40 = vpop.f32.mrb[22].mxu1 }
 0x155   : > { %v7506_v3 = vpop.f32.mrb[23].mxu0  ;;  %v7594_v12 = vpop.f32.mrb[23].mxu1 }
 0x156   : > { %v10031_v50 = vadd.f32 %v7506_v3, %v7505_v10  ;;  %v7595_v34 = vadd.f32 %v7594_v12, %v7593_v40  ;;  %v10034_v4 = vadd.f32 %v7592_v22, %v9976_v43  ;;  %v8755_v43 = vld [vmem:[#allocation3 + $0x18] sm:$0xff]   ;;  %v894_v3 = vrot.slane %v10029_v27, 1 }
 0x157   : > { %2086 = vmatmul.mubr.bf16.gmra.mrb[128].mxu1 %v9425_v57  ;;  %8457 = vmatmul.mubr.bf16.gmra.mrb[128].mxu0 %v9880_v17  ;;  %v895_v12 = vrot.slane %v8747_v62, 1 }
 0x158   : > { %2093 = vmatprep.mubr.bf16.mxu1 %v12074_v11  ;;  %8460 = vmatprep.mubr.bf16.mxu0 %v9890_v14  ;;  %v10041_v15 = vadd.f32 %v7595_v34, %v9980_v44  ;;  %v882_v44 = vshrl.u32 %v10029_v27, 16 }
 0x159   : > { %7935 = vmatpush3.bf16.msra.mxu1 %v8755_v43 }
 0x15a   : > { %v7508_v24 = vpop.f32.mrb[24].mxu0  ;;  %v7596_v60 = vpop.f32.mrb[24].mxu1  ;;  %v887_v23 = vor.u32 %v886_v35, %v882_v44  ;;  %7936 = vmatprep.subr.bf16.mxu1 %v8756_v59 }
 0x15b   : > { %v7509_v2 = vpop.f32.mrb[25].mxu0  ;;  %v7597_v56 = vpop.f32.mrb[25].mxu1 }
 0x15c   : > { %v10045_v57 = vadd.f32 %v7509_v2, %v7508_v24  ;;  %v7598_v17 = vadd.f32 %v7597_v56, %v7596_v60  ;;  %v7511_v53 = vpop.f32.mrb[26].mxu0  ;;  %v7599_v11 = vpop.f32.mrb[26].mxu1  ;;  %v8757_v60 = vld [vmem:[#allocation3 + $0x20] sm:$0xff]  }
 0x15d   : > { %v7512_v14 = vpop.f32.mrb[27].mxu0  ;;  %v7600_v61 = vpop.f32.mrb[27].mxu1  ;;  %7937 = vmatpush3.bf16.msra.mxu1 %v8757_v60 }
 0x15e   : > { %v10048_v31 = vadd.f32 %v7512_v14, %v7511_v53  ;;  %v7601_v33 = vadd.f32 %v7600_v61, %v7599_v11  ;;  %v10051_v16 = vadd.f32 %v7598_v17, %v9988_v18  ;;  %v8758_v14 = vld [vmem:[#allocation3 + $0xc0] sm:$0xff]  }
 0x15f   : > { %2094 = vmatmul.mubr.bf16.gmra.mrb[132].mxu1 %v9475_v52  ;;  %8461 = vmatmul.mubr.bf16.gmra.mrb[132].mxu0 %v9897_v36  ;;  %v8759_v61 = vld [vmem:[#allocation3 + $0x80] sm:$0xff]  }
 0x160   : > { %2101 = vmatprep.mubr.bf16.mxu1 %v9966_v45  ;;  %8464 = vmatprep.mubr.bf16.mxu0 %v9906_v54  ;;  %v10058_v46 = vadd.f32 %v7601_v33, %v9992_v0  ;;  %v892_v45 = vsel %vm572_vm0, %v887_v23, %v891_v7 }
 0x161   : > { %8040 = vmatprep.subr.bf16.mxu0 %v8758_v14 }
 0x162   : > { %v7514_v37 = vpop.f32.mrb[28].mxu0  ;;  %v7602_v28 = vpop.f32.mrb[28].mxu1  ;;  %8041 = vmatpush3.bf16.msra.mxu0 %v8759_v61 }
 0x163   : > { %v7515_v38 = vpop.f32.mrb[29].mxu0  ;;  %v7603_v25 = vpop.f32.mrb[29].mxu1 }
 0x164   : > { %v10060_v41 = vadd.f32 %v7515_v38, %v7514_v37  ;;  %v7604_v18 = vadd.f32 %v7603_v25, %v7602_v28  ;;  %v7517_v22 = vpop.f32.mrb[30].mxu0  ;;  %v7605_v52 = vpop.f32.mrb[30].mxu1 }
 0x165   : > { %v7518_v10 = vpop.f32.mrb[31].mxu0  ;;  %v7606_v36 = vpop.f32.mrb[31].mxu1 }
 0x166   : > { %v10063_v40 = vadd.f32 %v7518_v10, %v7517_v22  ;;  %v7607_v54 = vadd.f32 %v7606_v36, %v7605_v52  ;;  %v10066_v0 = vadd.f32 %v7604_v18, %v10000_v20  ;;  %v8761_v52 = vld [vmem:[#allocation3 + $0x88] sm:$0xff]  }
 0x167   : > { %2102 = vmatmul.mubr.bf16.gmra.mrb[136].mxu1 %v9910_v32  ;;  %8465 = vmatmul.mubr.bf16.gmra.mrb[136].mxu0 %v9919_v58  ;;  %v8762_v36 = vld [vmem:[#allocation3 + $0x68] sm:$0xff]  }
 0x168   : > { %2109 = vmatprep.mubr.bf16.mxu1 %v892_v45  ;;  %8468 = vmatprep.mubr.bf16.mxu0 %v9955_v49  ;;  %v10073_v34 = vadd.f32 %v7607_v54, %v10004_v30  ;;  %v896_v49 = vsel %vm781_vm4, %v894_v3, %v895_v12  ;;  %v8763_v3 = vld [vmem:[#allocation3 + $0x28] sm:$0xff]  }
 0x169   : > { %7938 = vmatprep.subr.bf16.mxu1 %v8762_v36 }
 0x16a   : > { %v7520_v19 = vpop.f32.mrb[32].mxu0  ;;  %v7608_v24 = vpop.f32.mrb[32].mxu1  ;;  %7939 = vmatpush3.bf16.msra.mxu1 %v8763_v3 }
 0x16b   : > { %v7521_v20 = vpop.f32.mrb[33].mxu0  ;;  %v7609_v43 = vpop.f32.mrb[33].mxu1 }
 0x16c   : > { %v10075_v2 = vadd.f32 %v7521_v20, %v7520_v19  ;;  %v7610_v32 = vadd.f32 %v7609_v43, %v7608_v24  ;;  %v7523_v58 = vpop.f32.mrb[34].mxu0  ;;  %v7611_v56 = vpop.f32.mrb[34].mxu1 }
 0x16d   : > { %v7524_v17 = vpop.f32.mrb[35].mxu0  ;;  %v7612_v62 = vpop.f32.mrb[35].mxu1 }
 0x16e   : > { %v10078_v53 = vadd.f32 %v7524_v17, %v7523_v58  ;;  %v7613_v30 = vadd.f32 %v7612_v62, %v7611_v56  ;;  %v10081_v11 = vadd.f32 %v7610_v32, %v10012_v63  ;;  %v8764_v56 = vld [vmem:[#allocation3 + $0xd0] sm:$0xff]  }
 0x16f   : > { %2110 = vmatmul.mubr.bf16.gmra.mrb[140].mxu1 %v10029_v27  ;;  %8469 = vmatmul.mubr.bf16.gmra.mrb[140].mxu0 %v896_v49  ;;  %v8765_v49 = vld [vmem:[#allocation3 + $0x90] sm:$0xff]  }
 0x170   : > { %v10085_v44 = vadd.f32 %v7613_v30, %v10014_v48  ;;  %v8760_v48 = vld [vmem:[#allocation3 + $0xc8] sm:$0xff]  }
 0x171   : > { %8042 = vmatprep.subr.bf16.mxu0 %v8760_v48  ;;  %v8768_v48 = vld [vmem:[#allocation3 + $0x70] sm:$0xff]  }
 0x172   : > { %v7526_v35 = vpop.f32.mrb[36].mxu0  ;;  %v7614_v42 = vpop.f32.mrb[36].mxu1  ;;  %8043 = vmatpush3.bf16.msra.mxu0 %v8761_v52  ;;  %7940 = vmatprep.subr.bf16.mxu1 %v8768_v48 }
 0x173   : > { %v7527_v33 = vpop.f32.mrb[37].mxu0  ;;  %v7615_v23 = vpop.f32.mrb[37].mxu1  ;;  %8044 = vmatprep.subr.bf16.mxu0 %v8764_v56 }
 0x174   : > { %v10087_v7 = vadd.f32 %v7527_v33, %v7526_v35  ;;  %v7616_v37 = vadd.f32 %v7615_v23, %v7614_v42  ;;  %v7529_v28 = vpop.f32.mrb[38].mxu0  ;;  %v7617_v63 = vpop.f32.mrb[38].mxu1 }
 0x175   : > { %v7530_v38 = vpop.f32.mrb[39].mxu0  ;;  %v7618_v25 = vpop.f32.mrb[39].mxu1 }
 0x176   : > { %v10089_v18 = vadd.f32 %v7530_v38, %v7529_v28  ;;  %v7619_v27 = vadd.f32 %v7618_v25, %v7617_v63  ;;  %v10092_v22 = vadd.f32 %v7616_v37, %v10026_v29  ;;  %8045 = vmatpush3.bf16.msra.mxu0 %v8765_v49  ;;  %v8767_v25 = vld [vmem:[#allocation3 + $0x98] sm:$0xff]  }
 0x178   : > { %v10095_v10 = vadd.f32 %v7619_v27, %v10031_v50 }
 0x17a   : > { %v7532_v45 = vpop.f32.mrb[40].mxu0  ;;  %v7620_v54 = vpop.f32.mrb[40].mxu1 }
 0x17b   : > { %v7533_v12 = vpop.f32.mrb[41].mxu0  ;;  %v7621_v59 = vpop.f32.mrb[41].mxu1 }
 0x17c   : > { %v10097_v19 = vadd.f32 %v7533_v12, %v7532_v45  ;;  %v7622_v24 = vadd.f32 %v7621_v59, %v7620_v54  ;;  %v7535_v60 = vpop.f32.mrb[42].mxu0  ;;  %v7623_v29 = vpop.f32.mrb[42].mxu1 }
 0x17d   : > { %v7536_v20 = vpop.f32.mrb[43].mxu0  ;;  %v7624_v43 = vpop.f32.mrb[43].mxu1 }
 0x17e   : > { %v10099_v32 = vadd.f32 %v7536_v20, %v7535_v60  ;;  %v7625_v50 = vadd.f32 %v7624_v43, %v7623_v29  ;;  %v10102_v58 = vadd.f32 %v7622_v24, %v10045_v57 }
 0x180   : > { %v10105_v17 = vadd.f32 %v7625_v50, %v10048_v31  ;;  %v8766_v31 = vld [vmem:[#allocation3 + $0xd8] sm:$0xff]  }
 0x181   : > { %8046 = vmatprep.subr.bf16.mxu0 %v8766_v31 }
 0x182   : > { %v7538_v62 = vpop.f32.mrb[44].mxu0  ;;  %v7626_v30 = vpop.f32.mrb[44].mxu1  ;;  %8047 = vmatpush3.bf16.msra.mxu0 %v8767_v25  ;;  %v2458_v25 = vld [vmem:[#allocation2 + $0x14] sm:$0x1] }
 0x183   : > { %v7539_v14 = vpop.f32.mrb[45].mxu0  ;;  %v7627_v61 = vpop.f32.mrb[45].mxu1 }
 0x184   : > { %v10107_v35 = vadd.f32 %v7539_v14, %v7538_v62  ;;  %v7628_v42 = vadd.f32 %v7627_v61, %v7626_v30  ;;  %v7541_v33 = vpop.f32.mrb[46].mxu0  ;;  %v7629_v23 = vpop.f32.mrb[46].mxu1 }
 0x185   : > { %v7542_v37 = vpop.f32.mrb[47].mxu0  ;;  %v7630_v28 = vpop.f32.mrb[47].mxu1 }
 0x186   : > { %v10109_v57 = vadd.f32 %v7542_v37, %v7541_v33  ;;  %v7631_v63 = vadd.f32 %v7630_v28, %v7629_v23  ;;  %v10112_v38 = vadd.f32 %v7628_v42, %v10060_v41  ;;  %v2461_v33 = vld [vmem:[#allocation2 + $0x20] sm:$0x1] }
 0x187   : > { %v2462_v31 = vsel %vm10137_vm9, 0, %v2461_v33  ;;  %v2408_v33 = vld [vmem:[#allocation2 + $0x24] sm:$0x1] }
 0x188   : > { %v10115_v27 = vadd.f32 %v7631_v63, %v10063_v40  ;;  %2463 = vst [vmem:[#allocation2 + $0x20] sm:$0x1] %v2462_v31  ;;  %v8772_v31 = vld [vmem:[#allocation3 + $0xe8] sm:$0xff]  }
 0x18a   : > { %v7632_v52 = vpop.f32.mrb[48].mxu1  ;;  %v7696_v36 = vpop.f32.mrb[48].mxu0 }
 0x18b   : > { %v7633_v45 = vpop.f32.mrb[49].mxu1  ;;  %v7697_v54 = vpop.f32.mrb[49].mxu0 }
 0x18c   : > { %v7634_v3 = vadd.f32 %v7633_v45, %v7632_v52  ;;  %v7698_v12 = vadd.f32 %v7697_v54, %v7696_v36  ;;  %v7635_v59 = vpop.f32.mrb[50].mxu1  ;;  %v7699_v24 = vpop.f32.mrb[50].mxu0  ;;  %v2459_v36 = vsel %vm10137_vm9, 0, %v2458_v25  ;;  %v2409_v25 = vsel %vm10130_vm7, 0, %v2408_v33 }
 0x18d   : > { %v7636_v60 = vpop.f32.mrb[51].mxu1  ;;  %v7700_v41 = vpop.f32.mrb[51].mxu0  ;;  %2460 = vst [vmem:[#allocation2 + $0x14] sm:$0x1] %v2459_v36  ;;  %2410 = vst [vmem:[#allocation2 + $0x24] sm:$0x1] %v2409_v25 }
 0x18e   : > { %v10118_v29 = vadd.f32 %v7634_v3, %v10075_v2  ;;  %v10121_v40 = vadd.f32 %v7698_v12, %v10017_v13  ;;  %v7637_v20 = vadd.f32 %v7636_v60, %v7635_v59  ;;  %v7701_v43 = vadd.f32 %v7700_v41, %v7699_v24  ;;  %v2405_v2 = vld [vmem:[#allocation2 + $0x18] sm:$0x1]  ;;  %v8774_v25 = vld [vmem:[#allocation3 + $0x78] sm:$0xff]  }
 0x18f   : > { %v2406_v30 = vsel %vm10130_vm7, 0, %v2405_v2  ;;  %v8770_v60 = vld [vmem:[#allocation3 + $0xe0] sm:$0xff]  }
 0x190   : > { %v10124_v50 = vadd.f32 %v7637_v20, %v10078_v53  ;;  %v10127_v56 = vadd.f32 %v7701_v43, %v10024_v51  ;;  %v12078_v53 = vmov 0  ;;  %v2402_v51 = vld [vmem:[#allocation2 + $0xc] sm:$0x1]  ;;  %2407 = vst [vmem:[#allocation2 + $0x18] sm:$0x1] %v2406_v30  ;;  %v8771_v41 = vld [vmem:[#allocation3 + $0xa0] sm:$0xff]   ;;  %8048 = vmatprep.subr.bf16.mxu0 %v8770_v60 }
 0x191   : > { %v12079_v53 = vsel %vm10137_vm9, 4294967295, %v12078_v53  ;;  %v2403_v42 = vsel %vm10130_vm7, 0, %v2402_v51  ;;  %v2411_v20 = vld [vmem:[#allocation2 + $0x30] sm:$0x1]  ;;  %v9112_v43 = vmov 0   ;;  %8049 = vmatpush3.bf16.msra.mxu0 %v8771_v41 }
 0x192   : > { %v7638_v62 = vpop.f32.mrb[52].mxu1  ;;  %v7702_v13 = vpop.f32.mrb[52].mxu0  ;;  %12080 = vst [vmem:[#allocation13_spill] sm:$0xff] %v12079_v53  ;;  %2404 = vst [vmem:[#allocation2 + $0xc] sm:$0x1] %v2403_v42  ;;  %8050 = vmatprep.subr.bf16.mxu0 %v8772_v31 }
 0x193   : > { %v7639_v14 = vpop.f32.mrb[53].mxu1  ;;  %v7703_v61 = vpop.f32.mrb[53].mxu0  ;;  %2389 = vst [vmem:[#allocation2] sm:$0xf] %v9112_v43  ;;  %2390 = vst [vmem:[#allocation2 + $0x4] sm:$0xf] %v9112_v43 }
 0x194   : > { %v7640_v23 = vadd.f32 %v7639_v14, %v7638_v62  ;;  %v7704_v37 = vadd.f32 %v7703_v61, %v7702_v13  ;;  %v7641_v28 = vpop.f32.mrb[54].mxu1  ;;  %v7705_v63 = vpop.f32.mrb[54].mxu0  ;;  %2391 = vst [vmem:[#allocation2 + $0x8] sm:$0x1] %v9112_v43  ;;  %2393 = vst [vmem:[#allocation2 + $0xcc] sm:$0xf] %v9112_v43 }
 0x195   : > { %v7642_v48 = vpop.f32.mrb[55].mxu1  ;;  %v7706_v52 = vpop.f32.mrb[55].mxu0  ;;  %2394 = vst [vmem:[#allocation2 + $0xd0] sm:$0xf] %v9112_v43  ;;  %2395 = vst [vmem:[#allocation2 + $0xd4] sm:$0x1] %v9112_v43 }
 0x196   : > { %v10148_v45 = vadd.f32 %v7640_v23, %v10087_v7  ;;  %v10151_v54 = vadd.f32 %v7704_v37, %v10034_v4  ;;  %v7643_v3 = vadd.f32 %v7642_v48, %v7641_v28  ;;  %v7707_v12 = vadd.f32 %v7706_v52, %v7705_v63  ;;  %v8769_v14 = vld [vmem:[#allocation3 + $0x30] sm:$0xff]  }
 0x197   : > { %7941 = vmatpush3.bf16.msra.mxu1 %v8769_v14 }
 0x198   : > { %v10154_v59 = vadd.f32 %v7643_v3, %v10089_v18  ;;  %v10157_v24 = vadd.f32 %v7707_v12, %v10041_v15  ;;  %v2412_v18 = vsel %vm10130_vm7, 0, %v2411_v20  ;;  %7942 = vmatprep.subr.bf16.mxu1 %v8774_v25 }
 0x199   : > { %2413 = vst [vmem:[#allocation2 + $0x30] sm:$0x1] %v2412_v18 }
 0x19a   : > { %v7644_v4 = vpop.f32.mrb[56].mxu1  ;;  %v7708_v7 = vpop.f32.mrb[56].mxu0 }
 0x19b   : > { %v7645_v2 = vpop.f32.mrb[57].mxu1  ;;  %v7709_v62 = vpop.f32.mrb[57].mxu0  ;;  %v2455_v41 = vld [vmem:[#allocation2 + $0x8] sm:$0x1] }
 0x19c   : > { %v7646_v15 = vadd.f32 %v7645_v2, %v7644_v4  ;;  %v7710_v13 = vadd.f32 %v7709_v62, %v7708_v7  ;;  %v7647_v30 = vpop.f32.mrb[58].mxu1  ;;  %v7711_v51 = vpop.f32.mrb[58].mxu0  ;;  %v2467_v2 = vld [vmem:[#allocation2 + $0x38] sm:$0x1] }
 0x19d   : > { %v7648_v61 = vpop.f32.mrb[59].mxu1  ;;  %v7712_v42 = vpop.f32.mrb[59].mxu0  ;;  %v2468_v14 = vsel %vm10137_vm9, 0, %v2467_v2  ;;  %v2473_v2 = vld [vmem:[#allocation2 + $0x50] sm:$0x1] }
 0x19e   : > { %v10162_v23 = vadd.f32 %v7646_v15, %v10097_v19  ;;  %v10165_v37 = vadd.f32 %v7710_v13, %v10051_v16  ;;  %v7649_v28 = vadd.f32 %v7648_v61, %v7647_v30  ;;  %v7713_v63 = vadd.f32 %v7712_v42, %v7711_v51  ;;  %v2399_v19 = vld [vmem:[#allocation2] sm:$0x1]  ;;  %v2464_v51 = vld [vmem:[#allocation2 + $0x2c] sm:$0x1]  ;;  %2469 = vst [vmem:[#allocation2 + $0x38] sm:$0x1] %v2468_v14 }
 0x19f   : > { %v2400_v16 = vsel %vm10130_vm7, 0, %v2399_v19  ;;  %v8773_v61 = vld [vmem:[#allocation3 + $0xa8] sm:$0xff]   ;;  %v2465_v42 = vsel %vm10137_vm9, 0, %v2464_v51  ;;  %v8776_v19 = vld [vmem:[#allocation3 + $0xf0] sm:$0xff]  }
 0x1a0   : > { %v10170_v48 = vadd.f32 %v7649_v28, %v10099_v32  ;;  %v10173_v52 = vadd.f32 %v7713_v63, %v10058_v46  ;;  %2401 = vst [vmem:[#allocation2] sm:$0x1] %v2400_v16  ;;  %v2456_v46 = vsel %vm10137_vm9, 0, %v2455_v41  ;;  %2466 = vst [vmem:[#allocation2 + $0x2c] sm:$0x1] %v2465_v42  ;;  %8051 = vmatpush3.bf16.msra.mxu0 %v8773_v61 }
 0x1a1   : > { %2457 = vst [vmem:[#allocation2 + $0x8] sm:$0x1] %v2456_v46  ;;  %8052 = vmatprep.subr.bf16.mxu0 %v8776_v19 }
 0x1a2   : > { %v7650_v36 = vpop.f32.mrb[60].mxu1  ;;  %v7714_v3 = vpop.f32.mrb[60].mxu0 }
 0x1a3   : > { %v7651_v12 = vpop.f32.mrb[61].mxu1  ;;  %v7715_v60 = vpop.f32.mrb[61].mxu0 }
 0x1a4   : > { %v7652_v20 = vadd.f32 %v7651_v12, %v7650_v36  ;;  %v7716_v43 = vadd.f32 %v7715_v60, %v7714_v3  ;;  %v7653_v4 = vpop.f32.mrb[62].mxu1  ;;  %v7717_v32 = vpop.f32.mrb[62].mxu0  ;;  %v2417_v12 = vld [vmem:[#allocation2 + $0x48] sm:$0x1] }
 0x1a5   : > { %v7654_v7 = vpop.f32.mrb[63].mxu1  ;;  %v7718_v18 = vpop.f32.mrb[63].mxu0 }
 0x1a6   : > { %v10180_v62 = vadd.f32 %v7652_v20, %v10107_v35  ;;  %v10183_v15 = vadd.f32 %v7716_v43, %v10066_v0  ;;  %v7655_v13 = vadd.f32 %v7654_v7, %v7653_v4  ;;  %v7719_v30 = vadd.f32 %v7718_v18, %v7717_v32  ;;  %v10195_v35 = vld [vmem:[#allocation2 + $0x4] sm:$0xf]  ;;  %v2414_v4 = vld [vmem:[#allocation2 + $0x3c] sm:$0x1]  ;;  %v8777_v32 = vld [vmem:[#allocation3 + $0xb0] sm:$0xff]  }
 0x1a7   : > { %v3042_v0 = vld [vmem:[#allocation2] sm:$0xf]  ;;  %v2418_v43 = vsel %vm10130_vm7, 0, %v2417_v12  ;;  %v2415_v18 = vsel %vm10130_vm7, 0, %v2414_v4  ;;  %8053 = vmatpush3.bf16.msra.mxu0 %v8777_v32 }
 0x1a8   : > { %v10190_v33 = vadd.f32 %v7655_v13, %v10109_v57  ;;  %v10193_v28 = vadd.f32 %v7719_v30, %v10073_v34  ;;  %v7174_v16 = vcombine.low %v3042_v0, %v10195_v35  ;;  %v8775_v57 = vld [vmem:[#allocation3 + $0x38] sm:$0xff]   ;;  %2419 = vst [vmem:[#allocation2 + $0x48] sm:$0x1] %v2418_v43  ;;  %2416 = vst [vmem:[#allocation2 + $0x3c] sm:$0x1] %v2415_v18  ;;  %v2474_v0 = vsel %vm10137_vm9, 0, %v2473_v2 }
 0x1a9   : > { %7943 = vmatpush3.bf16.msra.mxu1 %v8775_v57  ;;  %v10208_v42 = vld [vmem:[#allocation2 + $0x8] ss:$0 sps:$4 sm:$0x11]   ;;  %2475 = vst [vmem:[#allocation2 + $0x50] sm:$0x1] %v2474_v0 }
 0x1aa   : > { %v7656_v63 = vpop.f32.mrb[64].mxu1  ;;  %v7720_v31 = vpop.f32.mrb[64].mxu0  ;;  %v3382_v13 = vshll.u32 %v7174_v16, 16  ;;  %v2423_v2 = vld [vmem:[#allocation2 + $0x60] sm:$0x1] }
 0x1ab   : > { %v7657_v36 = vpop.f32.mrb[65].mxu1  ;;  %v7721_v3 = vpop.f32.mrb[65].mxu0 }
 0x1ac   : > { %v7658_v60 = vadd.f32 %v7657_v36, %v7656_v63  ;;  %v7722_v41 = vadd.f32 %v7721_v3, %v7720_v31  ;;  %v7659_v34 = vpop.f32.mrb[66].mxu1  ;;  %v7723_v20 = vpop.f32.mrb[66].mxu0  ;;  %v3380_v63 = vshrl.u32 %v7174_v16, 16  ;;  %v3384_v19 = vrot.slane %v3382_v13, 1 }
 0x1ad   : > { %v7660_v46 = vpop.f32.mrb[67].mxu1  ;;  %v7724_v7 = vpop.f32.mrb[67].mxu0  ;;  %v3387_v36 = vshll.u32 %v10208_v42, 16 }
 0x1ae   : > { %v10203_v30 = vadd.f32 %v7658_v60, %v9963_v39  ;;  %v10206_v51 = vadd.f32 %v7722_v41, %v10081_v11  ;;  %v7661_v14 = vadd.f32 %v7660_v46, %v7659_v34  ;;  %v7725_v61 = vadd.f32 %v7724_v7, %v7723_v20  ;;  %v2470_v39 = vld [vmem:[#allocation2 + $0x44] sm:$0x1]  ;;  %v8778_v11 = vld [vmem:[#allocation3 + $0xf8] sm:$0xff]  }
 0x1af   : > { %v2471_v3 = vsel %vm10137_vm9, 0, %v2470_v39  ;;  %8054 = vmatprep.subr.bf16.mxu0 %v8778_v11  ;;  %v8779_v60 = vld [vmem:[#allocation3 + $0xb8] sm:$0xff]   ;;  %v3385_v41 = vor.u32 %v3384_v19, %v3380_v63  ;;  %v2424_v39 = vsel %vm10130_vm7, 0, %v2423_v2  ;;  %v2479_v19 = vld [vmem:[#allocation2 + $0x68] sm:$0x1] }
 0x1b0   : > { %v10213_v31 = vadd.f32 %v7661_v14, %v9970_v8  ;;  %v10216_v25 = vadd.f32 %v7725_v61, %v10085_v44  ;;  %2472 = vst [vmem:[#allocation2 + $0x44] sm:$0x1] %v2471_v3  ;;  %v3389_v8 = vrot.slane %v3387_v36, 1  ;;  %8055 = vmatpush3.bf16.msra.mxu0 %v8779_v60  ;;  %v2420_v63 = vld [vmem:[#allocation2 + $0x54] sm:$0x1] }
 0x1b1   : > { %v2421_v11 = vsel %vm10130_vm7, 0, %v2420_v63  ;;  %2425 = vst [vmem:[#allocation2 + $0x60] sm:$0x1] %v2424_v39 }
 0x1b2   : > { %v7662_v12 = vpop.f32.mrb[68].mxu1  ;;  %v7726_v57 = vpop.f32.mrb[68].mxu0  ;;  %v3390_v46 = vsel %vm572_vm0, %v3385_v41, %v3389_v8  ;;  %2422 = vst [vmem:[#allocation2 + $0x54] sm:$0x1] %v2421_v11 }
 0x1b3   : > { %v7663_v34 = vpop.f32.mrb[69].mxu1  ;;  %v7727_v20 = vpop.f32.mrb[69].mxu0  ;;  %5235 = vmatprep.mubr.bf16.mxu1 %v3390_v46 }
 0x1b4   : > { %v7664_v44 = vadd.f32 %v7663_v34, %v7662_v12  ;;  %v7728_v43 = vadd.f32 %v7727_v20, %v7726_v57  ;;  %v7665_v4 = vpop.f32.mrb[70].mxu1  ;;  %v7729_v32 = vpop.f32.mrb[70].mxu0  ;;  %5236 = vmatmul.mubr.bf16.vlgmr.msra.gmra.mrb[144].mxu1 %v7174_v16  ;;  %v2476_v12 = vld [vmem:[#allocation2 + $0x5c] sm:$0x1] }
 0x1b5   : > { %v7666_v7 = vpop.f32.mrb[71].mxu1  ;;  %v7730_v18 = vpop.f32.mrb[71].mxu0  ;;  %v2477_v41 = vsel %vm10137_vm9, 0, %v2476_v12 }
 0x1b6   : > { %v10223_v13 = vadd.f32 %v7664_v44, %v9978_v9  ;;  %v10226_v14 = vadd.f32 %v7728_v43, %v10092_v22  ;;  %v7667_v61 = vadd.f32 %v7666_v7, %v7665_v4  ;;  %v7731_v0 = vadd.f32 %v7730_v18, %v7729_v32  ;;  %2478 = vst [vmem:[#allocation2 + $0x5c] sm:$0x1] %v2477_v41 }
 0x1b7   : > { %v2480_v22 = vsel %vm10137_vm9, 0, %v2479_v19 }
 0x1b8   : > { %v10233_v36 = vadd.f32 %v7667_v61, %v9982_v1  ;;  %v10236_v9 = vadd.f32 %v7731_v0, %v10095_v10  ;;  %2481 = vst [vmem:[#allocation2 + $0x68] sm:$0x1] %v2480_v22 }
 0x1ba   : > { %v7668_v16 = vpop.f32.mrb[72].mxu1  ;;  %v7732_v3 = vpop.f32.mrb[72].mxu0 }
 0x1bb   : > { %v7669_v57 = vpop.f32.mrb[73].mxu1  ;;  %v7733_v60 = vpop.f32.mrb[73].mxu0 }
 0x1bc   : > { %v7670_v8 = vadd.f32 %v7669_v57, %v7668_v16  ;;  %v7734_v1 = vadd.f32 %v7733_v60, %v7732_v3  ;;  %v7671_v34 = vpop.f32.mrb[74].mxu1  ;;  %v7735_v20 = vpop.f32.mrb[74].mxu0  ;;  %v2429_v3 = vld [vmem:[#allocation2 + $0x78] sm:$0x1] }
 0x1bd   : > { %v7672_v10 = vpop.f32.mrb[75].mxu1  ;;  %v7736_v44 = vpop.f32.mrb[75].mxu0  ;;  %v2430_v60 = vsel %vm10130_vm7, 0, %v2429_v3 }
 0x1be   : > { %v10243_v43 = vadd.f32 %v7670_v8, %v9990_v5  ;;  %v10246_v4 = vadd.f32 %v7734_v1, %v10102_v58  ;;  %v7673_v32 = vadd.f32 %v7672_v10, %v7671_v34  ;;  %v7737_v46 = vadd.f32 %v7736_v44, %v7735_v20  ;;  %v8784_v58 = vld [vmem:[#allocation3 + $0x140] sm:$0xff]   ;;  %2431 = vst [vmem:[#allocation2 + $0x78] sm:$0x1] %v2430_v60  ;;  %v3090_v10 = vld [vmem:[#allocation2] sm:$0xe] }
 0x1bf   : > { %8152 = vmatprep.subr.bf16.mxu1 %v8784_v58  ;;  %v8789_v58 = vld [vmem:[#allocation3 + $0x1c0] sm:$0xff]   ;;  %v2482_v60 = vld [vmem:[#allocation2 + $0x74] sm:$0x1] }
 0x1c0   : > { %v10249_v7 = vadd.f32 %v7673_v32, %v9994_v6  ;;  %v10252_v18 = vadd.f32 %v7737_v46, %v10105_v17  ;;  %8264 = vmatprep.subr.bf16.mxu0 %v8789_v58 }
 0x1c2   : > { %v7674_v2 = vpop.f32.mrb[76].mxu1  ;;  %v7738_v61 = vpop.f32.mrb[76].mxu0 }
 0x1c3   : > { %v7675_v0 = vpop.f32.mrb[77].mxu1  ;;  %v7739_v63 = vpop.f32.mrb[77].mxu0 }
 0x1c4   : > { %v7676_v39 = vadd.f32 %v7675_v0, %v7674_v2  ;;  %v7740_v11 = vadd.f32 %v7739_v63, %v7738_v61  ;;  %v7677_v19 = vpop.f32.mrb[78].mxu1  ;;  %v7741_v5 = vpop.f32.mrb[78].mxu0  ;;  %v7206_v2 = vcombine.low %v3090_v10, %v10195_v35  ;;  %v8786_v35 = vld [vmem:[#allocation3 + $0x100] sm:$0xff]   ;;  %v2483_v10 = vsel %vm10137_vm9, 0, %v2482_v60 }
 0x1c5   : > { %v7678_v22 = vpop.f32.mrb[79].mxu1  ;;  %v7742_v16 = vpop.f32.mrb[79].mxu0  ;;  %8153 = vmatpush3.bf16.msra.mxu1 %v8786_v35  ;;  %2484 = vst [vmem:[#allocation2 + $0x74] sm:$0x1] %v2483_v10 }
 0x1c6   : > { %v10255_v12 = vadd.f32 %v7676_v39, %v10002_v55  ;;  %v10258_v6 = vadd.f32 %v7740_v11, %v10112_v38  ;;  %v7679_v17 = vadd.f32 %v7678_v22, %v7677_v19  ;;  %v7743_v57 = vadd.f32 %v7742_v16, %v7741_v5  ;;  %v2426_v16 = vld [vmem:[#allocation2 + $0x6c] sm:$0x1] }
 0x1c7   : > { %v3635_v11 = vrot.slane %v7206_v2, 1  ;;  %v3636_v19 = vrot.slane %v10208_v42, 1  ;;  %v2427_v3 = vsel %vm10130_vm7, 0, %v2426_v16 }
 0x1c8   : > { %v10263_v41 = vadd.f32 %v7679_v17, %v10006_v21  ;;  %v10266_v8 = vadd.f32 %v7743_v57, %v10115_v27  ;;  %2428 = vst [vmem:[#allocation2 + $0x6c] sm:$0x1] %v2427_v3 }
 0x1ca   : > { %v7744_v1 = vpop.f32.mrb[80].mxu0  ;;  %v7808_v34 = vpop.f32.mrb[80].mxu1 }
 0x1cb   : > { %v7745_v55 = vpop.f32.mrb[81].mxu0  ;;  %v7809_v20 = vpop.f32.mrb[81].mxu1 }
 0x1cc   : > { %v7746_v38 = vadd.f32 %v7745_v55, %v7744_v1  ;;  %v7810_v44 = vadd.f32 %v7809_v20, %v7808_v34  ;;  %v7747_v32 = vpop.f32.mrb[82].mxu0  ;;  %v7811_v46 = vpop.f32.mrb[82].mxu1 }
 0x1cd   : > { %v7748_v61 = vpop.f32.mrb[83].mxu0  ;;  %v7812_v0 = vpop.f32.mrb[83].mxu1 }
 0x1ce   : > { %v10270_v21 = vadd.f32 %v7746_v38, %v10118_v29  ;;  %v7749_v63 = vadd.f32 %v7748_v61, %v7747_v32  ;;  %v7813_v27 = vadd.f32 %v7812_v0, %v7811_v46  ;;  %v10273_v39 = vadd.f32 %v7810_v44, %v10121_v40  ;;  %v2485_v40 = vld [vmem:[#allocation2 + $0x80] sm:$0x1]  ;;  %v2435_v38 = vld [vmem:[#allocation2 + $0x90] sm:$0x1] }
 0x1cf   : > { %v10283_v29 = vsel %vm781_vm4, %v3635_v11, %v3636_v19  ;;  %v2436_v46 = vsel %vm10130_vm7, 0, %v2435_v38 }
 0x1d0   : > { %v10277_v5 = vadd.f32 %v7749_v63, %v10124_v50  ;;  %v10280_v22 = vadd.f32 %v7813_v27, %v10127_v56  ;;  %v2486_v50 = vsel %vm10137_vm9, 0, %v2485_v40  ;;  %2437 = vst [vmem:[#allocation2 + $0x90] sm:$0x1] %v2436_v46 }
 0x1d1   : > { %2487 = vst [vmem:[#allocation2 + $0x80] sm:$0x1] %v2486_v50 }
 0x1d2   : > { %v7750_v17 = vpop.f32.mrb[84].mxu0  ;;  %v7814_v57 = vpop.f32.mrb[84].mxu1 }
 0x1d3   : > { %v7751_v56 = vpop.f32.mrb[85].mxu0  ;;  %v7815_v42 = vpop.f32.mrb[85].mxu1 }
 0x1d4   : > { %v7752_v1 = vadd.f32 %v7751_v56, %v7750_v17  ;;  %v7816_v34 = vadd.f32 %v7815_v42, %v7814_v57  ;;  %v7753_v55 = vpop.f32.mrb[86].mxu0  ;;  %v7817_v20 = vpop.f32.mrb[86].mxu1  ;;  %v2432_v56 = vld [vmem:[#allocation2 + $0x84] sm:$0x1] }
 0x1d5   : > { %v7754_v44 = vpop.f32.mrb[87].mxu0  ;;  %v7818_v32 = vpop.f32.mrb[87].mxu1 }
 0x1d6   : > { %v10294_v2 = vadd.f32 %v7752_v1, %v10148_v45  ;;  %v7755_v61 = vadd.f32 %v7754_v44, %v7753_v55  ;;  %v7819_v0 = vadd.f32 %v7818_v32, %v7817_v20  ;;  %v10297_v63 = vadd.f32 %v7816_v34, %v10151_v54 }
 0x1d8   : > { %v10300_v27 = vadd.f32 %v7755_v61, %v10154_v59  ;;  %v10303_v11 = vadd.f32 %v7819_v0, %v10157_v24  ;;  %v2433_v24 = vsel %vm10130_vm7, 0, %v2432_v56  ;;  %v8802_v56 = vld [vmem:[#allocation3 + $0x108] sm:$0xff]  }
 0x1d9   : > { %2434 = vst [vmem:[#allocation2 + $0x84] sm:$0x1] %v2433_v24 }
 0x1da   : > { %v7756_v19 = vpop.f32.mrb[88].mxu0  ;;  %v7820_v35 = vpop.f32.mrb[88].mxu1 }
 0x1db   : > { %v7757_v16 = vpop.f32.mrb[89].mxu0  ;;  %v7821_v58 = vpop.f32.mrb[89].mxu1 }
 0x1dc   : > { %v7758_v3 = vadd.f32 %v7757_v16, %v7756_v19  ;;  %v7822_v40 = vadd.f32 %v7821_v58, %v7820_v35  ;;  %v7759_v45 = vpop.f32.mrb[90].mxu0  ;;  %v7823_v17 = vpop.f32.mrb[90].mxu1 }
 0x1dd   : > { %v7760_v57 = vpop.f32.mrb[91].mxu0  ;;  %v7824_v50 = vpop.f32.mrb[91].mxu1 }
 0x1de   : > { %v10306_v54 = vadd.f32 %v7758_v3, %v10162_v23  ;;  %v7761_v42 = vadd.f32 %v7760_v57, %v7759_v45  ;;  %v7825_v59 = vadd.f32 %v7824_v50, %v7823_v17  ;;  %v10309_v60 = vadd.f32 %v7822_v40, %v10165_v37  ;;  %v2488_v40 = vld [vmem:[#allocation2 + $0x8c] sm:$0x1]  ;;  %v8798_v45 = vld [vmem:[#allocation3 + $0x148] sm:$0xff]   ;;  %v2441_v17 = vld [vmem:[#allocation2 + $0xa8] sm:$0x1] }
 0x1df   : > { %8154 = vmatprep.subr.bf16.mxu1 %v8798_v45  ;;  %v2497_v45 = vld [vmem:[#allocation2 + $0xb0] sm:$0x1] }
 0x1e0   : > { %v10314_v1 = vadd.f32 %v7761_v42, %v10170_v48  ;;  %v10317_v34 = vadd.f32 %v7825_v59, %v10173_v52  ;;  %v2491_v52 = vld [vmem:[#allocation2 + $0x98] sm:$0x1]  ;;  %v2438_v42 = vld [vmem:[#allocation2 + $0x9c] sm:$0x1]  ;;  %8155 = vmatpush3.bf16.msra.mxu1 %v8802_v56 }
 0x1e1   : > { %v2492_v3 = vsel %vm10137_vm9, 0, %v2491_v52 }
 0x1e2   : > { %v7762_v55 = vpop.f32.mrb[92].mxu0  ;;  %v7826_v20 = vpop.f32.mrb[92].mxu1  ;;  %2493 = vst [vmem:[#allocation2 + $0x98] sm:$0x1] %v2492_v3 }
 0x1e3   : > { %v7763_v10 = vpop.f32.mrb[93].mxu0  ;;  %v7827_v23 = vpop.f32.mrb[93].mxu1 }
 0x1e4   : > { %v7764_v38 = vadd.f32 %v7763_v10, %v7762_v55  ;;  %v7828_v44 = vadd.f32 %v7827_v23, %v7826_v20  ;;  %v7765_v32 = vpop.f32.mrb[94].mxu0  ;;  %v7829_v46 = vpop.f32.mrb[94].mxu1  ;;  %v2439_v10 = vsel %vm10130_vm7, 0, %v2438_v42 }
 0x1e5   : > { %v7766_v37 = vpop.f32.mrb[95].mxu0  ;;  %v7830_v61 = vpop.f32.mrb[95].mxu1  ;;  %2440 = vst [vmem:[#allocation2 + $0x9c] sm:$0x1] %v2439_v10 }
 0x1e6   : > { %v10320_v0 = vadd.f32 %v7764_v38, %v10180_v62  ;;  %v7767_v19 = vadd.f32 %v7766_v37, %v7765_v32  ;;  %v7831_v48 = vadd.f32 %v7830_v61, %v7829_v46  ;;  %v10323_v35 = vadd.f32 %v7828_v44, %v10183_v15 }
 0x1e7   : > { %v2489_v62 = vsel %vm10137_vm9, 0, %v2488_v40  ;;  %v2442_v15 = vsel %vm10130_vm7, 0, %v2441_v17 }
 0x1e8   : > { %v10326_v16 = vadd.f32 %v7767_v19, %v10190_v33  ;;  %v10329_v58 = vadd.f32 %v7831_v48, %v10193_v28  ;;  %2490 = vst [vmem:[#allocation2 + $0x8c] sm:$0x1] %v2489_v62  ;;  %2443 = vst [vmem:[#allocation2 + $0xa8] sm:$0x1] %v2442_v15 }
 0x1ea   : > { %v7768_v57 = vpop.f32.mrb[96].mxu0  ;;  %v7832_v50 = vpop.f32.mrb[96].mxu1 }
 0x1eb   : > { %v7769_v33 = vpop.f32.mrb[97].mxu0  ;;  %v7833_v28 = vpop.f32.mrb[97].mxu1 }
 0x1ec   : > { %v7770_v59 = vadd.f32 %v7769_v33, %v7768_v57  ;;  %v7834_v24 = vadd.f32 %v7833_v28, %v7832_v50  ;;  %v7771_v55 = vpop.f32.mrb[98].mxu0  ;;  %v7835_v20 = vpop.f32.mrb[98].mxu1  ;;  %v2498_v57 = vsel %vm10137_vm9, 0, %v2497_v45 }
 0x1ed   : > { %v7772_v23 = vpop.f32.mrb[99].mxu0  ;;  %v7836_v38 = vpop.f32.mrb[99].mxu1  ;;  %2499 = vst [vmem:[#allocation2 + $0xb0] sm:$0x1] %v2498_v57  ;;  %v2444_v57 = vld [vmem:[#allocation2 + $0xb4] sm:$0x1] }
 0x1ee   : > { %v10340_v44 = vadd.f32 %v7770_v59, %v10203_v30  ;;  %v7773_v32 = vadd.f32 %v7772_v23, %v7771_v55  ;;  %v7837_v46 = vadd.f32 %v7836_v38, %v7835_v20  ;;  %v10343_v37 = vadd.f32 %v7834_v24, %v10206_v51  ;;  %v2494_v59 = vld [vmem:[#allocation2 + $0xa4] sm:$0x1] }
 0x1ef   : > { %v2495_v20 = vsel %vm10137_vm9, 0, %v2494_v59 }
 0x1f0   : > { %12081 = vst [vmem:[#allocation15_spill] sm:$0xff] %v10340_v44  ;;  %v10346_v61 = vadd.f32 %v7773_v32, %v10213_v31  ;;  %v10349_v19 = vadd.f32 %v7837_v46, %v10216_v25  ;;  %2496 = vst [vmem:[#allocation2 + $0xa4] sm:$0x1] %v2495_v20  ;;  %v2447_v46 = vld [vmem:[#allocation2 + $0xc0] sm:$0x1] }
 0x1f1   : > { %v2979_v44 = vld [vmem:[#allocation2 + $0x60] sm:$0xf] }
 0x1f2   : > { %12082 = vst [vmem:[#allocation20_spill] sm:$0xff] %v10346_v61  ;;  %v7774_v48 = vpop.f32.mrb[100].mxu0  ;;  %v7838_v52 = vpop.f32.mrb[100].mxu1 }
 0x1f3   : > { %v7775_v3 = vpop.f32.mrb[101].mxu0  ;;  %v7839_v40 = vpop.f32.mrb[101].mxu1 }
 0x1f4   : > { %v7776_v17 = vadd.f32 %v7775_v3, %v7774_v48  ;;  %v7840_v62 = vadd.f32 %v7839_v40, %v7838_v52  ;;  %v7777_v30 = vpop.f32.mrb[102].mxu0  ;;  %v7841_v15 = vpop.f32.mrb[102].mxu1 }
 0x1f5   : > { %v7778_v51 = vpop.f32.mrb[103].mxu0  ;;  %v7842_v50 = vpop.f32.mrb[103].mxu1 }
 0x1f6   : > { %v10354_v31 = vadd.f32 %v7776_v17, %v10223_v13  ;;  %v7779_v25 = vadd.f32 %v7778_v51, %v7777_v30  ;;  %v7843_v33 = vadd.f32 %v7842_v50, %v7841_v15  ;;  %v10357_v28 = vadd.f32 %v7840_v62, %v10226_v14 }
 0x1f8   : > { %v10360_v56 = vadd.f32 %v7779_v25, %v10233_v36  ;;  %v10363_v42 = vadd.f32 %v7843_v33, %v10236_v9  ;;  %v2448_v9 = vsel %vm10130_vm7, 0, %v2447_v46  ;;  %v2503_v25 = vld [vmem:[#allocation2 + $0xc8] sm:$0x1] }
 0x1f9   : > { %2449 = vst [vmem:[#allocation2 + $0xc0] sm:$0x1] %v2448_v9  ;;  %v8812_v46 = vld [vmem:[#allocation3 + $0x150] sm:$0xff]  }
 0x1fa   : > { %12083 = vst [vmem:[#allocation21_spill] sm:$0xff] %v10360_v56  ;;  %v7780_v24 = vpop.f32.mrb[104].mxu0  ;;  %v7844_v55 = vpop.f32.mrb[104].mxu1  ;;  %8156 = vmatprep.subr.bf16.mxu1 %v8812_v46 }
 0x1fb   : > { %v7781_v10 = vpop.f32.mrb[105].mxu0  ;;  %v7845_v13 = vpop.f32.mrb[105].mxu1 }
 0x1fc   : > { %v7782_v23 = vadd.f32 %v7781_v10, %v7780_v24  ;;  %v7846_v38 = vadd.f32 %v7845_v13, %v7844_v55  ;;  %v7783_v32 = vpop.f32.mrb[106].mxu0  ;;  %v7847_v14 = vpop.f32.mrb[106].mxu1 }
 0x1fd   : > { %v7784_v48 = vpop.f32.mrb[107].mxu0  ;;  %v7848_v36 = vpop.f32.mrb[107].mxu1 }
 0x1fe   : > { %v10370_v52 = vadd.f32 %v7782_v23, %v10243_v43  ;;  %v7785_v3 = vadd.f32 %v7784_v48, %v7783_v32  ;;  %v7849_v40 = vadd.f32 %v7848_v36, %v7847_v14  ;;  %v10373_v45 = vadd.f32 %v7846_v38, %v10246_v4  ;;  %v2500_v14 = vld [vmem:[#allocation2 + $0xbc] sm:$0x1]  ;;  %v8816_v48 = vld [vmem:[#allocation3 + $0x110] sm:$0xff]  }
 0x1ff   : > { %v2445_v43 = vsel %vm10130_vm7, 0, %v2444_v57  ;;  %8157 = vmatpush3.bf16.msra.mxu1 %v8816_v48 }
 0x200   : > { %12084 = vst [vmem:[#allocation22_spill] sm:$0xff] %v10370_v52  ;;  %v10376_v17 = vadd.f32 %v7785_v3, %v10249_v7  ;;  %v10379_v62 = vadd.f32 %v7849_v40, %v10252_v18  ;;  %2446 = vst [vmem:[#allocation2 + $0xb4] sm:$0x1] %v2445_v43  ;;  %v2504_v7 = vsel %vm10137_vm9, 0, %v2503_v25 }
 0x201   : > { %2505 = vst [vmem:[#allocation2 + $0xc8] sm:$0x1] %v2504_v7 }
 0x202   : > { %12085 = vst [vmem:[#allocation23_spill] sm:$0xff] %v10376_v17  ;;  %v7786_v30 = vpop.f32.mrb[108].mxu0  ;;  %v7850_v15 = vpop.f32.mrb[108].mxu1 }
 0x203   : > { %v7787_v51 = vpop.f32.mrb[109].mxu0  ;;  %v7851_v50 = vpop.f32.mrb[109].mxu1 }
 0x204   : > { %v7788_v33 = vadd.f32 %v7787_v51, %v7786_v30  ;;  %v7852_v59 = vadd.f32 %v7851_v50, %v7850_v15  ;;  %v7789_v4 = vpop.f32.mrb[110].mxu0  ;;  %v7853_v24 = vpop.f32.mrb[110].mxu1 }
 0x205   : > { %v7790_v55 = vpop.f32.mrb[111].mxu0  ;;  %v7854_v18 = vpop.f32.mrb[111].mxu1 }
 0x206   : > { %v10386_v20 = vadd.f32 %v7788_v33, %v10255_v12  ;;  %v7791_v10 = vadd.f32 %v7790_v55, %v7789_v4  ;;  %v7855_v13 = vadd.f32 %v7854_v18, %v7853_v24  ;;  %v10389_v23 = vadd.f32 %v7852_v59, %v10258_v6  ;;  %v10400_v12 = vld [vmem:[%s12034_s4] ss:$0 sm:$0xff] }
 0x207   : > { %v2501_v6 = vsel %vm10137_vm9, 0, %v2500_v14  ;;  %v8826_v33 = vld [vmem:[#allocation3 + $0x158] sm:$0xff]  }
 0x208   : > { %12086 = vst [vmem:[#allocation24_spill] sm:$0xff] %v10386_v20  ;;  %v10392_v38 = vadd.f32 %v7791_v10, %v10263_v41  ;;  %v10395_v32 = vadd.f32 %v7855_v13, %v10266_v8  ;;  %2502 = vst [vmem:[#allocation2 + $0xbc] sm:$0x1] %v2501_v6  ;;  %v10408_v8 = vld [vmem:[%s12035_s5] ss:$0 sm:$0xff]  ;;  %8158 = vmatprep.subr.bf16.mxu1 %v8826_v33 }
 0x20a   : > { %12087 = vst [vmem:[#allocation25_spill] sm:$0xff] %v10392_v38  ;;  %v7856_v36 = vpop.f32.mrb[112].mxu1  ;;  %v8442_v9 = vpop.f32.mrb[112].mxu0 }
 0x20b   : > { %v2161_v3 = vadd.f32 %v8442_v9, %v10297_v63  ;;  %v7857_v41 = vpop.f32.mrb[113].mxu1  ;;  %v2152_v40 = vpop.f32.mrb[113].mxu0 }
 0x20c   : > { %v7858_v30 = vadd.f32 %v7857_v41, %v7856_v36  ;;  %v2153_v15 = vadd.f32 %v2152_v40, %v10273_v39  ;;  %v7859_v57 = vpop.f32.mrb[114].mxu1  ;;  %v8443_v51 = vpop.f32.mrb[114].mxu0 }
 0x20d   : > { %v2288_v50 = vmul.f32 %v10400_v12, %v2161_v3  ;;  %v2164_v43 = vadd.f32 %v8443_v51, %v10303_v11  ;;  %v7860_v63 = vpop.f32.mrb[115].mxu1  ;;  %v2155_v25 = vpop.f32.mrb[115].mxu0 }
 0x20e   : > { %v2286_v59 = vmul.f32 %v10400_v12, %v2153_v15  ;;  %v7861_v4 = vadd.f32 %v7860_v63, %v7859_v57  ;;  %v2156_v24 = vadd.f32 %v2155_v25, %v10280_v22  ;;  %v10416_v7 = vadd.f32 %v7858_v30, %v10270_v21 }
 0x20f   : > { %v2327_v39 = vadd.f32 %v10408_v8, %v2288_v50  ;;  %v2289_v55 = vmul.f32 %v10400_v12, %v2164_v43  ;;  %v8830_v50 = vld [vmem:[#allocation3 + $0x118] sm:$0xff]  }
 0x210   : > { %v2325_v18 = vadd.f32 %v10408_v8, %v2286_v59  ;;  %v2287_v11 = vmul.f32 %v10400_v12, %v2156_v24  ;;  %v10423_v10 = vadd.f32 %v7861_v4, %v10277_v5  ;;  %8159 = vmatpush3.bf16.msra.mxu1 %v8830_v50 }
 0x211   : > { %v2359_v13 = vmax.f32 %v2327_v39, 0.0  ;;  %v2328_v14 = vadd.f32 %v10408_v8, %v2289_v55 }
 0x212   : > { %v2357_v22 = vmax.f32 %v2325_v18, 0.0  ;;  %v2326_v21 = vadd.f32 %v10408_v8, %v2287_v11  ;;  %v7862_v46 = vpop.f32.mrb[116].mxu1  ;;  %v8446_v48 = vpop.f32.mrb[116].mxu0 }
 0x213   : > { %v7425_v36 = vpack.c.bf16 %v2359_v13, %v2359_v13  ;;  %v2360_v9 = vmax.f32 %v2328_v14, 0.0  ;;  %v2177_v6 = vadd.f32 %v8446_v48, %v10323_v35  ;;  %v7863_v3 = vpop.f32.mrb[117].mxu1  ;;  %v2168_v41 = vpop.f32.mrb[117].mxu0 }
 0x214   : > { %v7423_v40 = vpack.c.bf16 %v2357_v22, %v2357_v22  ;;  %v2358_v30 = vmax.f32 %v2326_v21, 0.0  ;;  %v10428_v5 = vadd.f32 %v7863_v3, %v7862_v46  ;;  %v2169_v15 = vadd.f32 %v2168_v41, %v10309_v60  ;;  %v10431_v57 = vpop.f32.mrb[118].mxu1  ;;  %v10433_v51 = vpop.f32.mrb[118].mxu0  ;;  %v2937_v60 = vld [vmem:[#allocation2 + $0x18] sm:$0xf] }
 0x215   : > { %v2625_v43 = vshrl.u32 %v7425_v36, 16  ;;  %v2628_v63 = vshll.u32 %v7425_v36, 16  ;;  %v7426_v25 = vpack.c.bf16 %v2360_v9, %v2360_v9  ;;  %v2292_v33 = vmul.f32 %v10400_v12, %v2177_v6  ;;  %v7866_v59 = vpop.f32.mrb[119].mxu1  ;;  %v2171_v35 = vpop.f32.mrb[119].mxu0  ;;  %v2930_v46 = vld [vmem:[#allocation2 + $0xc] sm:$0xf] }
 0x216   : > { %v2608_v4 = vshrl.u32 %v7423_v40, 16  ;;  %v2611_v24 = vshll.u32 %v7423_v40, 16  ;;  %v7424_v39 = vpack.c.bf16 %v2358_v30, %v2358_v30  ;;  %v2290_v55 = vmul.f32 %v10400_v12, %v2169_v15  ;;  %v2941_v40 = vld [vmem:[#allocation2 + $0x20] sm:$0x1] }
 0x217   : > { %v2627_v18 = vrot.slane %v2625_v43, 7  ;;  %v2633_v11 = vshrl.u32 %v7426_v25, 16  ;;  %v2636_v13 = vshll.u32 %v7426_v25, 16  ;;  %v2331_v14 = vadd.f32 %v10408_v8, %v2292_v33 }
 0x218   : > { %v2610_v21 = vrot.slane %v2608_v4, 7  ;;  %v2616_v48 = vshrl.u32 %v7424_v39, 16  ;;  %v2619_v36 = vshll.u32 %v7424_v39, 16  ;;  %v2329_v9 = vadd.f32 %v10408_v8, %v2290_v55 }
 0x219   : > { %v2630_v6 = vor.u32 %v2628_v63, %v2627_v18  ;;  %v2631_v3 = vrot.slane %v2627_v18, 4  ;;  %v2635_v41 = vrot.slane %v2633_v11, 7  ;;  %v2363_v30 = vmax.f32 %v2331_v14, 0.0  ;;  %v2934_v18 = vld [vmem:[#allocation2 + $0x14] sm:$0x1] }
 0x21a   : > { %v2613_v15 = vor.u32 %v2611_v24, %v2610_v21  ;;  %v2614_v50 = vrot.slane %v2610_v21, 4  ;;  %v2618_v25 = vrot.slane %v2616_v48, 7  ;;  %v2361_v33 = vmax.f32 %v2329_v9, 0.0  ;;  %v7868_v4 = vpop.f32.mrb[120].mxu1  ;;  %v8450_v26 = vpop.f32.mrb[120].mxu0 }
 0x21b   : > { %v2938_v39 = vsel %vm10440_vm12, %v2630_v6, %v2937_v60  ;;  %v2638_v63 = vor.u32 %v2636_v13, %v2635_v41  ;;  %v2640_v55 = vrot.slane %v2635_v41, 4  ;;  %v7429_v11 = vpack.c.bf16 %v2363_v30, %v2363_v30  ;;  %v7869_v14 = vpop.f32.mrb[121].mxu1  ;;  %v2184_v24 = vpop.f32.mrb[121].mxu0 }
 0x21c   : > { %2939 = vst [vmem:[#allocation2 + $0x18] sm:$0xf] %v2938_v39  ;;  %v2931_v21 = vsel %vm10440_vm12, %v2613_v15, %v2930_v46  ;;  %v2621_v47 = vor.u32 %v2619_v36, %v2618_v25  ;;  %v2623_v53 = vrot.slane %v2618_v25, 4  ;;  %v7427_v38 = vpack.c.bf16 %v2361_v33, %v2361_v33  ;;  %v7871_v48 = vpop.f32.mrb[122].mxu1  ;;  %v8451_v9 = vpop.f32.mrb[122].mxu0  ;;  %v8840_v39 = vld [vmem:[#allocation3 + $0x160] sm:$0xff]  }
 0x21d   : > { %2932 = vst [vmem:[#allocation2 + $0xc] sm:$0xf] %v2931_v21  ;;  %v2639_v17 = vsel %vm10447_vm13, %v2631_v3, %v2638_v63  ;;  %v2942_v60 = vsel %vm10130_vm7, %v2640_v55, %v2941_v40  ;;  %v2659_v13 = vshrl.u32 %v7429_v11, 16  ;;  %v2662_v6 = vshll.u32 %v7429_v11, 16  ;;  %v7872_v41 = vpop.f32.mrb[123].mxu1  ;;  %v2187_v30 = vpop.f32.mrb[123].mxu0  ;;  %8160 = vmatprep.subr.bf16.mxu1 %v8840_v39 }
 0x21e   : > { %2940 = vst [vmem:[#allocation2 + $0x1c] sm:$0xf] %v2639_v17  ;;  %2943 = vst [vmem:[#allocation2 + $0x20] sm:$0x1] %v2942_v60  ;;  %v2622_v46 = vsel %vm10447_vm13, %v2614_v50, %v2621_v47  ;;  %v2935_v36 = vsel %vm10130_vm7, %v2623_v53, %v2934_v18  ;;  %v2642_v15 = vshrl.u32 %v7427_v38, 16  ;;  %v2645_v25 = vshll.u32 %v7427_v38, 16 }
 0x21f   : > { %2933 = vst [vmem:[#allocation2 + $0x10] sm:$0xf] %v2622_v46  ;;  %2936 = vst [vmem:[#allocation2 + $0x14] sm:$0x1] %v2935_v36  ;;  %v10463_v3 = vrot.slane %v2659_v13, 7  ;;  %v2180_v40 = vadd.f32 %v10433_v51, %v10329_v58  ;;  %v10468_v33 = vadd.f32 %v7866_v59, %v10431_v57  ;;  %v2172_v17 = vadd.f32 %v2171_v35, %v10317_v34 }
 0x220   : > { %v2951_v63 = vld [vmem:[#allocation2 + $0x30] sm:$0xf]  ;;  %v10471_v47 = vrot.slane %v2642_v15, 7  ;;  %v2193_v53 = vadd.f32 %v8450_v26, %v10357_v28  ;;  %v10474_v50 = vadd.f32 %v7869_v14, %v7868_v4  ;;  %v2185_v38 = vadd.f32 %v2184_v24, %v10343_v37  ;;  %v2944_v58 = vld [vmem:[#allocation2 + $0x24] sm:$0xf] }
 0x221   : > { %v2664_v55 = vor.u32 %v2662_v6, %v10463_v3  ;;  %v2293_v57 = vmul.f32 %v10400_v12, %v2180_v40  ;;  %v2291_v51 = vmul.f32 %v10400_v12, %v2172_v17  ;;  %v2196_v24 = vadd.f32 %v8451_v9, %v10363_v42  ;;  %v2958_v59 = vld [vmem:[#allocation2 + $0x3c] sm:$0xf] }
 0x222   : > { %v2647_v34 = vor.u32 %v2645_v25, %v10471_v47  ;;  %v2296_v35 = vmul.f32 %v10400_v12, %v2193_v53  ;;  %v2294_v26 = vmul.f32 %v10400_v12, %v2185_v38  ;;  %v7874_v28 = vpop.f32.mrb[124].mxu1  ;;  %v8454_v4 = vpop.f32.mrb[124].mxu0  ;;  %v10494_v46 = vadd.f32 %v7872_v41, %v7871_v48 }
 0x223   : > { %v2952_v37 = vsel %vm10440_vm12, %v2664_v55, %v2951_v63  ;;  %v2332_v11 = vadd.f32 %v10408_v8, %v2293_v57  ;;  %v2330_v14 = vadd.f32 %v10408_v8, %v2291_v51  ;;  %v7875_v21 = vpop.f32.mrb[125].mxu1  ;;  %v2200_v60 = vpop.f32.mrb[125].mxu0  ;;  %v2297_v42 = vmul.f32 %v10400_v12, %v2196_v24 }
 0x224   : > { %2953 = vst [vmem:[#allocation2 + $0x30] sm:$0xf] %v2952_v37  ;;  %v2945_v13 = vsel %vm10440_vm12, %v2647_v34, %v2944_v58  ;;  %v2335_v6 = vadd.f32 %v10408_v8, %v2296_v35  ;;  %v2333_v39 = vadd.f32 %v10408_v8, %v2294_v26  ;;  %v10496_v36 = vpop.f32.mrb[126].mxu1  ;;  %v10498_v15 = vpop.f32.mrb[126].mxu0  ;;  %v2188_v9 = vadd.f32 %v2187_v30, %v10349_v19  ;;  %v8844_v26 = vld [vmem:[#allocation3 + $0x120] sm:$0xff]  }
 0x225   : > { %2946 = vst [vmem:[#allocation2 + $0x24] sm:$0xf] %v2945_v13  ;;  %v2364_v25 = vmax.f32 %v2332_v11, 0.0  ;;  %v2362_v40 = vmax.f32 %v2330_v14, 0.0  ;;  %v10502_v17 = vpop.f32.mrb[127].mxu1  ;;  %v10504_v63 = vpop.f32.mrb[127].mxu0  ;;  %v2209_v48 = vadd.f32 %v8454_v4, %v10389_v23  ;;  %v10507_v41 = vadd.f32 %v7875_v21, %v7874_v28  ;;  %8161 = vmatpush3.bf16.msra.mxu1 %v8844_v26 }
 0x226   : > { %v2367_v53 = vmax.f32 %v2335_v6, 0.0  ;;  %v2365_v38 = vmax.f32 %v2333_v39, 0.0  ;;  %v2336_v57 = vadd.f32 %v10408_v8, %v2297_v42  ;;  %v2295_v51 = vmul.f32 %v10400_v12, %v2188_v9  ;;  %v2955_v23 = vld [vmem:[#allocation2 + $0x38] sm:$0x1]  ;;  %v2948_v28 = vld [vmem:[#allocation2 + $0x2c] sm:$0x1] }
 0x227   : > { %v7430_v55 = vpack.c.bf16 %v2364_v25, %v2364_v25  ;;  %v7428_v58 = vpack.c.bf16 %v2362_v40, %v2362_v40  ;;  %v2300_v19 = vmul.f32 %v10400_v12, %v2209_v48  ;;  %v2201_v30 = vadd.f32 %v2200_v60, %v10373_v45  ;;  %v2965_v48 = vld [vmem:[#allocation2 + $0x48] sm:$0xf] }
 0x228   : > { %v7433_v34 = vpack.c.bf16 %v2367_v53, %v2367_v53  ;;  %v7431_v35 = vpack.c.bf16 %v2365_v38, %v2365_v38  ;;  %v2368_v9 = vmax.f32 %v2336_v57, 0.0  ;;  %v2334_v45 = vadd.f32 %v10408_v8, %v2295_v51 }
 0x229   : > { %v2667_v37 = vshrl.u32 %v7430_v55, 16  ;;  %v2670_v11 = vshll.u32 %v7430_v55, 16  ;;  %v2650_v14 = vshrl.u32 %v7428_v58, 16  ;;  %v2653_v24 = vshll.u32 %v7428_v58, 16 }
 0x22a   : > { %v2693_v4 = vshrl.u32 %v7433_v34, 16  ;;  %v2696_v21 = vshll.u32 %v7433_v34, 16  ;;  %v2676_v13 = vshrl.u32 %v7431_v35, 16  ;;  %v2679_v6 = vshll.u32 %v7431_v35, 16  ;;  %v10513_v39 = vpop.f32.mrb[128].mxu1  ;;  %v10515_v25 = vpop.f32.mrb[128].mxu0 }
 0x22b   : > { %v2669_v40 = vrot.slane %v2667_v37, 7  ;;  %v2652_v42 = vrot.slane %v2650_v14, 7  ;;  %v10518_v60 = vpop.f32.mrb[129].mxu1  ;;  %v10520_v53 = vpop.f32.mrb[129].mxu0  ;;  %v2339_v58 = vadd.f32 %v10408_v8, %v2300_v19  ;;  %v2298_v34 = vmul.f32 %v10400_v12, %v2201_v30 }
 0x22c   : > { %v10522_v38 = vrot.slane %v2693_v4, 7  ;;  %v10524_v55 = vrot.slane %v2676_v13, 7  ;;  %v10528_v35 = vpop.f32.mrb[130].mxu1  ;;  %v10530_v26 = vpop.f32.mrb[130].mxu0  ;;  %v12092_v30 = vrot.slane %v10463_v3, 4 }
 0x22d   : > { %v2672_v57 = vor.u32 %v2670_v11, %v2669_v40  ;;  %v2674_v37 = vrot.slane %v2669_v40, 4  ;;  %v2655_v51 = vor.u32 %v2653_v24, %v2652_v42  ;;  %v2657_v14 = vrot.slane %v2652_v42, 4  ;;  %v10532_v18 = vpop.f32.mrb[131].mxu1  ;;  %v10534_v4 = vpop.f32.mrb[131].mxu0 }
 0x22e   : > { %v2698_v13 = vor.u32 %v2696_v21, %v10522_v38  ;;  %v2681_v19 = vor.u32 %v2679_v6, %v10524_v55  ;;  %v12093_v24 = vrot.slane %v10471_v47, 4  ;;  %v7434_v42 = vpack.c.bf16 %v2368_v9, %v2368_v9  ;;  %v8854_v47 = vld [vmem:[#allocation3 + $0x168] sm:$0xff]  }
 0x22f   : > { %v2673_v52 = vsel %vm10447_vm13, %v12092_v30, %v2672_v57  ;;  %v2956_v11 = vsel %vm10130_vm7, %v2674_v37, %v2955_v23  ;;  %v2949_v21 = vsel %vm10130_vm7, %v2657_v14, %v2948_v28  ;;  %v2366_v23 = vmax.f32 %v2334_v45, 0.0  ;;  %v3107_v57 = vld [vmem:[#allocation2 + $0x10] sm:$0xf]  ;;  %8162 = vmatprep.subr.bf16.mxu1 %v8854_v47  ;;  %v8805_v30 = vld [vmem:[#allocation3 + $0x1c8] sm:$0xff]  }
 0x230   : > { %v2656_v40 = vsel %vm10447_vm13, %v12093_v24, %v2655_v51  ;;  %2954 = vst [vmem:[#allocation2 + $0x34] sm:$0xf] %v2673_v52  ;;  %2957 = vst [vmem:[#allocation2 + $0x38] sm:$0x1] %v2956_v11  ;;  %v2966_v3 = vsel %vm10440_vm12, %v2698_v13, %v2965_v48  ;;  %v2959_v6 = vsel %vm10440_vm12, %v2681_v19, %v2958_v59  ;;  %v2371_v37 = vmax.f32 %v2339_v58, 0.0  ;;  %v8790_v48 = vld [vmem:[#allocation3 + $0x180] sm:$0xff]  }
 0x231   : > { %2947 = vst [vmem:[#allocation2 + $0x28] sm:$0xf] %v2656_v40  ;;  %2950 = vst [vmem:[#allocation2 + $0x2c] sm:$0x1] %v2949_v21  ;;  %v2337_v51 = vadd.f32 %v10408_v8, %v2298_v34  ;;  %v2212_v52 = vadd.f32 %v10498_v15, %v10395_v32  ;;  %v10560_v28 = vadd.f32 %v10502_v17, %v10496_v36  ;;  %v2682_v14 = vrot.slane %v10524_v55, 4 }
 0x232   : > { %2967 = vst [vmem:[#allocation2 + $0x48] sm:$0xf] %v2966_v3  ;;  %2960 = vst [vmem:[#allocation2 + $0x3c] sm:$0xf] %v2959_v6  ;;  %v2701_v59 = vshrl.u32 %v7434_v42, 16  ;;  %v7432_v9 = vpack.c.bf16 %v2366_v23, %v2366_v23  ;;  %v2204_v45 = vadd.f32 %v10504_v63, %v10379_v62  ;;  %v10565_v19 = vpop.f32.mrb[132].mxu1  ;;  %v7437_v34 = vpack.c.bf16 %v2371_v37, %v2371_v37 }
 0x233   : > { %v3106_v13 = vld [vmem:[#allocation2 + $0xc] sm:$0xf]  ;;  %v10567_v58 = vpop.f32.mrb[132].mxu0  ;;  %v2369_v32 = vmax.f32 %v2337_v51, 0.0  ;;  %v2301_v15 = vmul.f32 %v10400_v12, %v2212_v52  ;;  %v10572_v17 = vpop.f32.mrb[133].mxu1  ;;  %v2704_v24 = vshll.u32 %v7434_v42, 16 }
 0x234   : > { %v10570_v36 = vcombine.low %v3106_v13, %v3107_v57  ;;  %v10574_v55 = vpop.f32.mrb[133].mxu0  ;;  %v2703_v11 = vrot.slane %v2701_v59, 7  ;;  %v2684_v62 = vshrl.u32 %v7432_v9, 16  ;;  %v2299_v63 = vmul.f32 %v10400_v12, %v2204_v45  ;;  %v10577_v40 = vpop.f32.mrb[134].mxu1  ;;  %v8858_v3 = vld [vmem:[#allocation3 + $0x128] sm:$0xff]  }
 0x235   : > { %v10579_v21 = vpop.f32.mrb[134].mxu0  ;;  %v2969_v6 = vld [vmem:[#allocation2 + $0x50] sm:$0x1]  ;;  %v2687_v23 = vshll.u32 %v7432_v9, 16  ;;  %v2727_v47 = vshrl.u32 %v7437_v34, 16  ;;  %v7435_v57 = vpack.c.bf16 %v2369_v32, %v2369_v32  ;;  %v2340_v37 = vadd.f32 %v10408_v8, %v2301_v15  ;;  %v10583_v51 = vpop.f32.mrb[135].mxu1  ;;  %8163 = vmatpush3.bf16.msra.mxu1 %v8858_v3 }
 0x236   : > { %12094 = vst [vmem:[#allocation26_spill] sm:$0xff] %v10570_v36  ;;  %5396 = vmatprep.mubr.bf16.mxu0 %v10570_v36  ;;  %v10585_v52 = vpop.f32.mrb[135].mxu0  ;;  %v2706_v42 = vor.u32 %v2704_v24, %v2703_v11  ;;  %v2708_v59 = vrot.slane %v2703_v11, 4  ;;  %v2686_v45 = vrot.slane %v2684_v62, 7  ;;  %v2962_v13 = vld [vmem:[#allocation2 + $0x44] sm:$0x1]  ;;  %v2338_v20 = vadd.f32 %v10408_v8, %v2299_v63 }
 0x237   : > { %5397 = vmatmul.mubr.bf16.vlgmr.msra.gmra.mrb[144].mxu0 %v10283_v29  ;;  %v10589_v9 = vrot.slane %v2727_v47, 7  ;;  %v2730_v32 = vshll.u32 %v7437_v34, 16  ;;  %v2710_v61 = vshrl.u32 %v7435_v57, 16  ;;  %v2372_v15 = vmax.f32 %v2340_v37, 0.0  ;;  %v8806_v36 = vld [vmem:[#allocation3 + $0x188] sm:$0xff]   ;;  %v8819_v29 = vld [vmem:[#allocation3 + $0x1d0] sm:$0xff]  }
 0x238   : > { %8265 = vmatpush3.bf16.msra.mxu0 %v8790_v48  ;;  %v12095_v56 = vrot.slane %v10522_v38, 4  ;;  %v2970_v11 = vsel %vm10130_vm7, %v2708_v59, %v2969_v6  ;;  %v2689_v62 = vor.u32 %v2687_v23, %v2686_v45  ;;  %v2691_v63 = vrot.slane %v2686_v45, 4  ;;  %v2972_v6 = vld [vmem:[#allocation2 + $0x54] sm:$0xf]  ;;  %v3109_v59 = vld [vmem:[#allocation2 + $0x1c] sm:$0xf] }
 0x239   : > { %8266 = vmatprep.subr.bf16.mxu0 %v8805_v30  ;;  %2971 = vst [vmem:[#allocation2 + $0x50] sm:$0x1] %v2970_v11  ;;  %v2732_v34 = vor.u32 %v2730_v32, %v10589_v9  ;;  %v10598_v3 = vrot.slane %v2710_v61, 7  ;;  %v2713_v48 = vshll.u32 %v7435_v57, 16  ;;  %v7438_v47 = vpack.c.bf16 %v2372_v15, %v2372_v15  ;;  %v8833_v11 = vld [vmem:[#allocation3 + $0x1d8] sm:$0xff]  }
 0x23a   : > { %v2707_v24 = vsel %vm10447_vm13, %v12095_v56, %v2706_v42  ;;  %v2690_v38 = vsel %vm10447_vm13, %v2682_v14, %v2689_v62  ;;  %v2963_v56 = vsel %vm10130_vm7, %v2691_v63, %v2962_v13  ;;  %v2370_v23 = vmax.f32 %v2338_v20, 0.0  ;;  %v10604_v37 = vpop.f32.mrb[136].mxu1  ;;  %v10606_v30 = vpop.f32.mrb[136].mxu0  ;;  %v8820_v13 = vld [vmem:[#allocation3 + $0x190] sm:$0xff]  }
 0x23b   : > { %2968 = vst [vmem:[#allocation2 + $0x4c] sm:$0xf] %v2707_v24  ;;  %2961 = vst [vmem:[#allocation2 + $0x40] sm:$0xf] %v2690_v38  ;;  %v2980_v61 = vsel %vm10440_vm12, %v2732_v34, %v2979_v44  ;;  %v2715_v57 = vor.u32 %v2713_v48, %v10598_v3  ;;  %v2735_v42 = vshrl.u32 %v7438_v47, 16  ;;  %v10611_v45 = vpop.f32.mrb[137].mxu1  ;;  %v2064_v34 = vadd.f32 %v10428_v5, %v10294_v2 }
 0x23c   : > { %2964 = vst [vmem:[#allocation2 + $0x44] sm:$0x1] %v2963_v56  ;;  %v10613_v14 = vpop.f32.mrb[137].mxu0  ;;  %8267 = vmatpush3.bf16.msra.mxu0 %v8806_v36  ;;  %2981 = vst [vmem:[#allocation2 + $0x60] sm:$0xf] %v2980_v61  ;;  %v2738_v20 = vshll.u32 %v7438_v47, 16  ;;  %v7436_v32 = vpack.c.bf16 %v2370_v23, %v2370_v23  ;;  %v10625_v36 = vadd.f32 %v10518_v60, %v10513_v39 }
 0x23d   : > { %v10615_v15 = vpop.f32.mrb[138].mxu1  ;;  %v10617_v24 = vpop.f32.mrb[138].mxu0  ;;  %8268 = vmatprep.subr.bf16.mxu0 %v8819_v29  ;;  %v2973_v44 = vsel %vm10440_vm12, %v2715_v57, %v2972_v6  ;;  %v2737_v62 = vrot.slane %v2735_v42, 7  ;;  %v2983_v63 = vld [vmem:[#allocation2 + $0x68] sm:$0x1]  ;;  %v2733_v38 = vrot.slane %v10589_v9, 4  ;;  %v2217_v56 = vadd.f32 %v10520_v53, %v10416_v7 }
 0x23e   : > { %v10627_v48 = vpop.f32.mrb[139].mxu1  ;;  %v10629_v47 = vpop.f32.mrb[139].mxu0  ;;  %2974 = vst [vmem:[#allocation2 + $0x54] sm:$0xf] %v2973_v44  ;;  %v2718_v29 = vshrl.u32 %v7436_v32, 16  ;;  %v8868_v23 = vld [vmem:[#allocation3 + $0x170] sm:$0xff]   ;;  %v2225_v2 = vadd.f32 %v10515_v25, %v2064_v34  ;;  %v2067_v9 = vadd.f32 %v10468_v33, %v10300_v27 }
 0x23f   : > { %12096 = vst [vmem:[#allocation27_spill] sm:$0xff] %v10629_v47  ;;  %v3108_v6 = vld [vmem:[#allocation2 + $0x18] sm:$0xf]  ;;  %v2740_v61 = vor.u32 %v2738_v20, %v2737_v62  ;;  %v2742_v57 = vrot.slane %v2737_v62, 4  ;;  %v8834_v39 = vld [vmem:[#allocation3 + $0x198] sm:$0xff]   ;;  %v2721_v42 = vshll.u32 %v7436_v32, 16  ;;  %v2302_v47 = vmul.f32 %v10400_v12, %v2217_v56  ;;  %8164 = vmatprep.subr.bf16.mxu1 %v8868_v23 }
 0x240   : > { %v10635_v5 = vcombine.low %v3108_v6, %v3109_v59  ;;  %8269 = vmatpush3.bf16.msra.mxu0 %v8820_v13  ;;  %v2720_v60 = vrot.slane %v2718_v29, 7  ;;  %v10640_v44 = vld [vmem:[#allocation2 + $0x10] sm:$0xf]  ;;  %v8847_v7 = vld [vmem:[#allocation3 + $0x1e0] sm:$0xff]   ;;  %v2716_v53 = vrot.slane %v10598_v3, 4  ;;  %v2304_v20 = vmul.f32 %v10400_v12, %v2225_v2 }
 0x241   : > { %8270 = vmatprep.subr.bf16.mxu0 %v8833_v11  ;;  %v2741_v25 = vsel %vm10447_vm13, %v2733_v38, %v2740_v61  ;;  %v2984_v59 = vsel %vm10130_vm7, %v2742_v57, %v2983_v63  ;;  %v2976_v13 = vld [vmem:[#allocation2 + $0x5c] sm:$0x1]  ;;  %v3044_v32 = vld [vmem:[#allocation2 + $0xc] sm:$0xf]  ;;  %v2341_v11 = vadd.f32 %v10408_v8, %v2302_v47  ;;  %v2228_v3 = vadd.f32 %v10530_v26, %v2067_v9 }
 0x242   : > { %12097 = vst [vmem:[#allocation28_spill] sm:$0xff] %v10635_v5  ;;  %5404 = vmatprep.mubr.bf16.mxu0 %v10635_v5  ;;  %2982 = vst [vmem:[#allocation2 + $0x64] sm:$0xf] %v2741_v25  ;;  %v2723_v27 = vor.u32 %v2721_v42, %v2720_v60  ;;  %v2725_v33 = vrot.slane %v2720_v60, 4  ;;  %v10653_v34 = vpop.f32.mrb[140].mxu1  ;;  %v10655_v38 = vpop.f32.mrb[140].mxu0  ;;  %v2343_v63 = vadd.f32 %v10408_v8, %v2304_v20 }
 0x243   : > { %2985 = vst [vmem:[#allocation2 + $0x68] sm:$0x1] %v2984_v59  ;;  %v10651_v62 = vld [vmem:[#allocation2 + $0x14] ss:$0 sps:$4 sm:$0x11]   ;;  %12098 = vst [vmem:[#allocation29_spill] sm:$0xff] %v10655_v38  ;;  %v10660_v29 = vadd.f32 %v10532_v18, %v10528_v35  ;;  %v2220_v56 = vadd.f32 %v10534_v4, %v10423_v10  ;;  %v10665_v6 = vcombine.low %v3044_v32, %v10640_v44 }
 0x244   : > { %v10667_v47 = vpop.f32.mrb[141].mxu1  ;;  %v10669_v26 = vpop.f32.mrb[141].mxu0  ;;  %8271 = vmatpush3.bf16.msra.mxu0 %v8834_v39  ;;  %v8848_v23 = vld [vmem:[#allocation3 + $0x1a0] sm:$0xff]   ;;  %v2724_v61 = vsel %vm10447_vm13, %v2716_v53, %v2723_v27  ;;  %v2977_v57 = vsel %vm10130_vm7, %v2725_v33, %v2976_v13  ;;  %v2373_v18 = vmax.f32 %v2341_v11, 0.0  ;;  %v2305_v35 = vmul.f32 %v10400_v12, %v2228_v3  ;;  %v8861_v60 = vld [vmem:[#allocation3 + $0x1e8] sm:$0xff]   ;;  %v8872_v13 = vld [vmem:[#allocation3 + $0x130] sm:$0xff]  }
 0x245   : > { %v10676_v2 = vld [vmem:[#allocation2 + $0x1c] sm:$0xf]  ;;  %v10678_v10 = vpop.f32.mrb[142].mxu1  ;;  %v10680_v4 = vpop.f32.mrb[142].mxu0  ;;  %8272 = vmatprep.subr.bf16.mxu0 %v8847_v7  ;;  %2975 = vst [vmem:[#allocation2 + $0x58] sm:$0xf] %v2724_v61  ;;  %v2303_v42 = vmul.f32 %v10400_v12, %v2220_v56  ;;  %v2080_v27 = vadd.f32 %v10507_v41, %v10320_v0  ;;  %8165 = vmatpush3.bf16.msra.mxu1 %v8872_v13 }
 0x246   : > { %12099 = vst [vmem:[#allocation30_spill] sm:$0xff] %v10678_v10  ;;  %12100 = vst [vmem:[#allocation31_spill] sm:$0xff] %v10680_v4  ;;  %v2375_v39 = vmax.f32 %v2343_v63, 0.0  ;;  %v3392_v9 = vshrl.u32 %v10665_v6, 16  ;;  %v3394_v53 = vshll.u32 %v10665_v6, 16  ;;  %v10685_v25 = vpop.f32.mrb[143].mxu1  ;;  %v7439_v20 = vpack.c.bf16 %v2373_v18, %v2373_v18 }
 0x247   : > { %2978 = vst [vmem:[#allocation2 + $0x5c] sm:$0x1] %v2977_v57  ;;  %12101 = vst [vmem:[#allocation32_spill] sm:$0xff] %v10685_v25  ;;  %v10687_v59 = vpop.f32.mrb[143].mxu0  ;;  %v2344_v32 = vadd.f32 %v10408_v8, %v2305_v35  ;;  %v3399_v7 = vshll.u32 %v10651_v62, 16  ;;  %v2342_v3 = vadd.f32 %v10408_v8, %v2303_v42  ;;  %v8862_v61 = vld [vmem:[#allocation3 + $0x1a8] sm:$0xff]  }
 0x248   : > { %12102 = vst [vmem:[#allocation33_spill] sm:$0xff] %v10687_v59  ;;  %v3046_v33 = vld [vmem:[#allocation2 + $0x18] sm:$0xf]  ;;  %v7441_v11 = vpack.c.bf16 %v2375_v39, %v2375_v39  ;;  %v3396_v63 = vrot.slane %v3394_v53, 1  ;;  %8273 = vmatpush3.bf16.msra.mxu0 %v8848_v23  ;;  %v2744_v57 = vshrl.u32 %v7439_v20, 16  ;;  %v2747_v18 = vshll.u32 %v7439_v20, 16 }
 0x249   : > { %v10695_v56 = vcombine.low %v3046_v33, %v10676_v2  ;;  %v2376_v5 = vmax.f32 %v2344_v32, 0.0  ;;  %v3401_v35 = vrot.slane %v3399_v7, 1  ;;  %8274 = vmatprep.subr.bf16.mxu0 %v8861_v60  ;;  %v8875_v4 = vld [vmem:[#allocation3 + $0x1f0] sm:$0xff]   ;;  %v2374_v0 = vmax.f32 %v2342_v3, 0.0  ;;  %v2993_v7 = vld [vmem:[#allocation2 + $0x78] sm:$0xf] }
 0x24a   : > { %v2761_v59 = vshrl.u32 %v7441_v11, 16  ;;  %v2764_v25 = vshll.u32 %v7441_v11, 16  ;;  %v3397_v41 = vor.u32 %v3396_v63, %v3392_v9  ;;  %v2746_v39 = vrot.slane %v2744_v57, 7  ;;  %v2986_v10 = vld [vmem:[#allocation2 + $0x6c] sm:$0xf]  ;;  %v8882_v57 = vld [vmem:[#allocation3 + $0x178] sm:$0xff]  }
 0x24b   : > { %v7442_v42 = vpack.c.bf16 %v2376_v5, %v2376_v5  ;;  %v2241_v53 = vadd.f32 %v10567_v58, %v2080_v27  ;;  %v3404_v33 = vshrl.u32 %v10695_v56, 16  ;;  %v7440_v38 = vpack.c.bf16 %v2374_v0, %v2374_v0  ;;  %v10700_v20 = vld [vmem:[#allocation2 + $0x20] ss:$0 sps:$4 sm:$0x11]   ;;  %v8876_v32 = vld [vmem:[#allocation3 + $0x1b0] sm:$0xff]   ;;  %8166 = vmatprep.subr.bf16.mxu1 %v8882_v57 }
 0x24c   : > { %v2763_v23 = vrot.slane %v2761_v59, 7  ;;  %v3402_v13 = vsel %vm572_vm0, %v3397_v41, %v3401_v35  ;;  %v3406_v60 = vshll.u32 %v10695_v56, 16  ;;  %8275 = vmatpush3.bf16.msra.mxu0 %v8862_v61  ;;  %v2749_v11 = vor.u32 %v2747_v18, %v2746_v39  ;;  %v3091_v18 = vld [vmem:[#allocation2 + $0xc] sm:$0xe]  ;;  %v3058_v43 = vld [vmem:[#allocation2 + $0x60] sm:$0xf] }
 0x24d   : > { %v2750_v9 = vrot.slane %v2746_v39, 4  ;;  %v2769_v3 = vshrl.u32 %v7442_v42, 16  ;;  %v2772_v63 = vshll.u32 %v7442_v42, 16  ;;  %5243 = vmatprep.mubr.bf16.mxu1 %v3402_v13  ;;  %8276 = vmatprep.subr.bf16.mxu0 %v8875_v4  ;;  %v2752_v27 = vshrl.u32 %v7440_v38, 16  ;;  %v2997_v4 = vld [vmem:[#allocation2 + $0x80] sm:$0x1] }
 0x24e   : > { %v2766_v58 = vor.u32 %v2764_v25, %v2763_v23  ;;  %v2767_v5 = vrot.slane %v2763_v23, 4  ;;  %v2755_v59 = vshll.u32 %v7440_v38, 16  ;;  %5244 = vmatmul.mubr.bf16.gmra.mrb[148].mxu1 %v10665_v6  ;;  %v2987_v35 = vsel %vm10440_vm12, %v2749_v11, %v2986_v10  ;;  %v2990_v23 = vld [vmem:[#allocation2 + $0x74] sm:$0x1] }
 0x24f   : > { %v2771_v0 = vrot.slane %v2769_v3, 7  ;;  %v2308_v61 = vmul.f32 %v10400_v12, %v2241_v53  ;;  %v3408_v41 = vrot.slane %v3406_v60, 1  ;;  %2988 = vst [vmem:[#allocation2 + $0x6c] sm:$0xf] %v2987_v35  ;;  %v2754_v25 = vrot.slane %v2752_v27, 7 }
 0x250   : > { %v2994_v39 = vsel %vm10440_vm12, %v2766_v58, %v2993_v7  ;;  %v3411_v42 = vshll.u32 %v10700_v20, 16  ;;  %v7207_v38 = vcombine.low %v3091_v18, %v10640_v44  ;;  %8277 = vmatpush3.bf16.msra.mxu0 %v8876_v32  ;;  %v3111_v60 = vld [vmem:[#allocation2 + $0x28] sm:$0xf]  ;;  %v3639_v57 = vrot.slane %v10651_v62, 1 }
 0x251   : > { %2995 = vst [vmem:[#allocation2 + $0x78] sm:$0xf] %v2994_v39  ;;  %v2774_v6 = vor.u32 %v2772_v63, %v2771_v0  ;;  %v2776_v10 = vrot.slane %v2771_v0, 4  ;;  %v2347_v53 = vadd.f32 %v10408_v8, %v2308_v61  ;;  %v3409_v13 = vor.u32 %v3408_v41, %v3404_v33  ;;  %v10724_v0 = vld [vmem:[#allocation2 + $0x28] sm:$0xf]  ;;  %v8886_v39 = vld [vmem:[#allocation3 + $0x138] sm:$0xff]  }
 0x252   : > { %v2757_v11 = vor.u32 %v2755_v59, %v2754_v25  ;;  %v2759_v3 = vrot.slane %v2754_v25, 4  ;;  %v3413_v7 = vrot.slane %v3411_v42, 1  ;;  %v3638_v58 = vrot.slane %v7207_v38, 1  ;;  %v10731_v18 = vld [vmem:[#allocation2 + $0x2c] ss:$0 sps:$4 sm:$0x11]   ;;  %8167 = vmatpush3.bf16.msra.mxu1 %v8886_v39 }
 0x253   : > { %v2775_v27 = vsel %vm10447_vm13, %v2767_v5, %v2774_v6  ;;  %v2998_v44 = vsel %vm10130_vm7, %v2776_v10, %v2997_v4  ;;  %v2379_v32 = vmax.f32 %v2347_v53, 0.0  ;;  %v7888_v35 = vadd.f32 %v10572_v17, %v10565_v19  ;;  %v3110_v5 = vld [vmem:[#allocation2 + $0x24] sm:$0xf]  ;;  %v8889_v25 = vld [vmem:[#allocation3 + $0x1f8] sm:$0xff]  }
 0x254   : > { %2996 = vst [vmem:[#allocation2 + $0x7c] sm:$0xf] %v2775_v27  ;;  %2999 = vst [vmem:[#allocation2 + $0x80] sm:$0x1] %v2998_v44  ;;  %v2758_v63 = vsel %vm10447_vm13, %v2750_v9, %v2757_v11  ;;  %v2991_v33 = vsel %vm10130_vm7, %v2759_v3, %v2990_v23  ;;  %v3414_v59 = vsel %vm572_vm0, %v3409_v13, %v3413_v7  ;;  %v8890_v42 = vld [vmem:[#allocation3 + $0x1b8] sm:$0xff]   ;;  %8278 = vmatprep.subr.bf16.mxu0 %v8889_v25 }
 0x255   : > { %2989 = vst [vmem:[#allocation2 + $0x70] sm:$0xf] %v2758_v63  ;;  %2992 = vst [vmem:[#allocation2 + $0x74] sm:$0x1] %v2991_v33  ;;  %v7445_v61 = vpack.c.bf16 %v2379_v32, %v2379_v32  ;;  %5251 = vmatprep.mubr.bf16.mxu1 %v3414_v59  ;;  %v3640_v62 = vsel %vm781_vm4, %v3638_v58, %v3639_v57  ;;  %v2072_v9 = vadd.f32 %v10474_v50, %v10306_v54  ;;  %v3048_v6 = vld [vmem:[#allocation2 + $0x24] sm:$0xf] }
 0x256   : > { %v10729_v41 = vcombine.low %v3110_v5, %v3111_v60  ;;  %5405 = vmatmul.mubr.bf16.gmra.mrb[148].mxu0 %v3640_v62  ;;  %v2083_v19 = vadd.f32 %v10560_v28, %v10326_v16  ;;  %v10737_v17 = vadd.f32 %v10583_v51, %v10577_v40  ;;  %v2075_v4 = vadd.f32 %v10494_v46, %v10314_v1  ;;  %v3092_v1 = vld [vmem:[#allocation2 + $0x18] sm:$0xe] }
 0x257   : > { %v2795_v38 = vshrl.u32 %v7445_v61, 16  ;;  %v2798_v54 = vshll.u32 %v7445_v61, 16  ;;  %v2233_v50 = vadd.f32 %v10574_v55, %v2072_v9  ;;  %5252 = vmatmul.mubr.bf16.gmra.mrb[152].mxu1 %v10695_v56  ;;  %v2096_v40 = vadd.f32 %v7888_v35, %v10354_v31  ;;  %v3007_v56 = vld [vmem:[#allocation2 + $0x90] sm:$0xf]  ;;  %8279 = vmatpush3.bf16.msra.mxu0 %v8890_v42  ;;  %v8895_v9 = vld [vmem:[#allocation3 + $0x200] sm:$0xff]  }
 0x258   : > { %5412 = vmatprep.mubr.bf16.mxu0 %v10729_v41  ;;  %v2244_v16 = vadd.f32 %v10579_v21, %v2083_v19  ;;  %v2236_v28 = vadd.f32 %v10585_v52, %v2075_v4  ;;  %v7177_v51 = vcombine.low %v3048_v6, %v10724_v0  ;;  %v3423_v55 = vshll.u32 %v10731_v18, 16  ;;  %v3113_v42 = vld [vmem:[#allocation2 + $0x34] sm:$0xf]  ;;  %8472 = vmatprep.subr.bf16.mxu1 %v8895_v9 }
 0x259   : > { %v10748_v46 = vrot.slane %v2795_v38, 7  ;;  %v2306_v10 = vmul.f32 %v10400_v12, %v2233_v50  ;;  %v7208_v23 = vcombine.low %v3092_v1, %v10676_v2  ;;  %v2257_v31 = vadd.f32 %v10606_v30, %v2096_v40  ;;  %v10777_v1 = vld [vmem:[%s12034_s4] ss:$0 sm:$0xff] }
 0x25a   : > { %v2309_v21 = vmul.f32 %v10400_v12, %v2244_v16  ;;  %v2307_v52 = vmul.f32 %v10400_v12, %v2236_v28  ;;  %v3416_v60 = vshrl.u32 %v7177_v51, 16  ;;  %v3418_v11 = vshll.u32 %v7177_v51, 16  ;;  %v3000_v16 = vld [vmem:[#allocation2 + $0x84] sm:$0xf]  ;;  %v3011_v28 = vld [vmem:[#allocation2 + $0x98] sm:$0x1] }
 0x25b   : > { %v2800_v53 = vor.u32 %v2798_v54, %v10748_v46  ;;  %v2345_v13 = vadd.f32 %v10408_v8, %v2306_v10  ;;  %v2312_v2 = vmul.f32 %v10400_v12, %v2257_v31  ;;  %v3425_v58 = vrot.slane %v3423_v55, 1  ;;  %v12103_v12 = vld [vmem:[#allocation15_spill] sm:$0xff]  ;;  %v3112_v54 = vld [vmem:[#allocation2 + $0x30] sm:$0xf] }
 0x25c   : > { %v2348_v3 = vadd.f32 %v10408_v8, %v2309_v21  ;;  %v2346_v7 = vadd.f32 %v10408_v8, %v2307_v52  ;;  %v3420_v32 = vrot.slane %v3418_v11, 1  ;;  %v3641_v30 = vrot.slane %v7208_v23, 1  ;;  %v12104_v21 = vld [vmem:[#allocation21_spill] sm:$0xff] }
 0x25d   : > { %v3008_v27 = vsel %vm10440_vm12, %v2800_v53, %v3007_v56  ;;  %v2377_v44 = vmax.f32 %v2345_v13, 0.0  ;;  %v2351_v33 = vadd.f32 %v10408_v8, %v2312_v2  ;;  %v3642_v59 = vrot.slane %v10700_v20, 1 }
 0x25e   : > { %3009 = vst [vmem:[#allocation2 + $0x90] sm:$0xf] %v3008_v27  ;;  %v2380_v57 = vmax.f32 %v2348_v3, 0.0  ;;  %v2378_v63 = vmax.f32 %v2346_v7, 0.0  ;;  %v3421_v5 = vor.u32 %v3420_v32, %v3416_v60  ;;  %v10767_v61 = vadd.f32 %v10611_v45, %v10604_v37  ;;  %v3004_v60 = vld [vmem:[#allocation2 + $0x8c] sm:$0x1] }
 0x25f   : > { %v7443_v35 = vpack.c.bf16 %v2377_v44, %v2377_v44  ;;  %v2088_v62 = vadd.f32 %v10625_v36, %v12103_v12  ;;  %v2383_v4 = vmax.f32 %v2351_v33, 0.0  ;;  %v3643_v25 = vsel %vm781_vm4, %v3641_v30, %v3642_v59  ;;  %v10786_v27 = vld [vmem:[#allocation2 + $0x38] ss:$0 sps:$4 sm:$0x11]   ;;  %v10798_v30 = vld [vmem:[#allocation2 + $0x34] sm:$0xf] }
 0x260   : > { %v7446_v39 = vpack.c.bf16 %v2380_v57, %v2380_v57  ;;  %v7444_v19 = vpack.c.bf16 %v2378_v63, %v2378_v63  ;;  %v3426_v8 = vsel %vm572_vm0, %v3421_v5, %v3425_v58  ;;  %5413 = vmatmul.mubr.bf16.gmra.mrb[152].mxu0 %v3643_v25  ;;  %v10780_v55 = vcombine.low %v3112_v54, %v3113_v42  ;;  %v8900_v57 = vld [vmem:[%s12033_s3] sm:$0xff]   ;;  %v3021_v5 = vld [vmem:[#allocation2 + $0xa8] sm:$0xf] }
 0x261   : > { %v2778_v38 = vshrl.u32 %v7443_v35, 16  ;;  %v2249_v20 = vadd.f32 %v10613_v14, %v2088_v62  ;;  %v2781_v37 = vshll.u32 %v7443_v35, 16  ;;  %5259 = vmatprep.mubr.bf16.mxu1 %v3426_v8  ;;  %v7449_v40 = vpack.c.bf16 %v2383_v4, %v2383_v4  ;;  %v3050_v12 = vld [vmem:[#allocation2 + $0x30] sm:$0xf]  ;;  %8520 = vmatprep.subr.bf16.mxu0 %v8900_v57  ;;  %v3093_v8 = vld [vmem:[#allocation2 + $0x24] sm:$0xe] }
 0x262   : > { %v2803_v45 = vshrl.u32 %v7446_v39, 16  ;;  %v2806_v50 = vshll.u32 %v7446_v39, 16  ;;  %v2786_v6 = vshrl.u32 %v7444_v19, 16  ;;  %5260 = vmatmul.mubr.bf16.gmra.mrb[156].mxu1 %v7177_v51  ;;  %v2789_v56 = vshll.u32 %v7444_v19, 16  ;;  %5420 = vmatprep.mubr.bf16.mxu0 %v10780_v55  ;;  %v12105_v4 = vld [vmem:[#allocation20_spill] sm:$0xff] }
 0x263   : > { %v2780_v36 = vrot.slane %v2778_v38, 7  ;;  %v2310_v10 = vmul.f32 %v10777_v1, %v2249_v20  ;;  %v2099_v52 = vadd.f32 %v10737_v17, %v12104_v21  ;;  %v2801_v31 = vrot.slane %v10748_v46, 4  ;;  %v10795_v46 = vld [vmem:[%s12035_s5] ss:$0 sm:$0xff] }
 0x264   : > { %v2805_v14 = vrot.slane %v2803_v45, 7  ;;  %v2788_v23 = vrot.slane %v2786_v6, 7  ;;  %v2829_v11 = vshrl.u32 %v7449_v40, 16  ;;  %v2832_v17 = vshll.u32 %v7449_v40, 16  ;;  %v3115_v45 = vld [vmem:[#allocation2 + $0x40] sm:$0xf] }
 0x265   : > { %v2783_v53 = vor.u32 %v2781_v37, %v2780_v36  ;;  %v2784_v13 = vrot.slane %v2780_v36, 4  ;;  %v2349_v32 = vadd.f32 %v10795_v46, %v2310_v10  ;;  %v2260_v39 = vadd.f32 %v10617_v24, %v2099_v52 }
 0x266   : > { %v2808_v3 = vor.u32 %v2806_v50, %v2805_v14  ;;  %v2810_v7 = vrot.slane %v2805_v14, 4  ;;  %v2791_v2 = vor.u32 %v2789_v56, %v2788_v23  ;;  %v2793_v58 = vrot.slane %v2788_v23, 4  ;;  %v12106_v50 = vld [vmem:[#allocation27_spill] sm:$0xff]  ;;  %v3114_v56 = vld [vmem:[#allocation2 + $0x3c] sm:$0xf] }
 0x267   : > { %v3001_v51 = vsel %vm10440_vm12, %v2783_v53, %v3000_v16  ;;  %v10790_v44 = vrot.slane %v2829_v11, 7  ;;  %v2381_v9 = vmax.f32 %v2349_v32, 0.0  ;;  %v7897_v19 = vadd.f32 %v10627_v48, %v10615_v15 }
 0x268   : > { %3002 = vst [vmem:[#allocation2 + $0x84] sm:$0xf] %v3001_v51  ;;  %v2809_v63 = vsel %vm10447_vm13, %v2801_v31, %v2808_v3  ;;  %v3012_v33 = vsel %vm10130_vm7, %v2810_v7, %v3011_v28  ;;  %v2792_v59 = vsel %vm10447_vm13, %v2784_v13, %v2791_v2  ;;  %v3005_v35 = vsel %vm10130_vm7, %v2793_v58, %v3004_v60  ;;  %v12107_v31 = vld [vmem:[#allocation22_spill] sm:$0xff]  ;;  %v3014_v60 = vld [vmem:[#allocation2 + $0x9c] sm:$0xf]  ;;  %v12108_v2 = vld [vmem:[#allocation24_spill] sm:$0xff] }
 0x269   : > { %3010 = vst [vmem:[#allocation2 + $0x94] sm:$0xf] %v2809_v63  ;;  %3013 = vst [vmem:[#allocation2 + $0x98] sm:$0x1] %v3012_v33  ;;  %v2834_v62 = vor.u32 %v2832_v17, %v10790_v44  ;;  %v2091_v25 = vadd.f32 %v10660_v29, %v12105_v4  ;;  %v7178_v42 = vcombine.low %v3050_v12, %v10798_v30  ;;  %v3435_v38 = vshll.u32 %v10786_v27, 16 }
 0x26a   : > { %3003 = vst [vmem:[#allocation2 + $0x88] sm:$0xf] %v2792_v59  ;;  %3006 = vst [vmem:[#allocation2 + $0x8c] sm:$0x1] %v3005_v35  ;;  %v7447_v54 = vpack.c.bf16 %v2381_v9, %v2381_v9  ;;  %v2313_v37 = vmul.f32 %v10777_v1, %v2260_v39  ;;  %v7209_v24 = vcombine.low %v3093_v8, %v10724_v0  ;;  %v3645_v23 = vrot.slane %v10731_v18, 1  ;;  %v12111_v9 = vld [vmem:[#allocation32_spill] sm:$0xff] }
 0x26b   : > { %v3022_v20 = vsel %vm10440_vm12, %v2834_v62, %v3021_v5  ;;  %v2252_v15 = vadd.f32 %v12106_v50, %v2091_v25  ;;  %v3428_v48 = vshrl.u32 %v7178_v42, 16  ;;  %v3430_v6 = vshll.u32 %v7178_v42, 16  ;;  %v10847_v35 = vld [vmem:[#allocation2 + $0x40] sm:$0xf] }
 0x26c   : > { %3023 = vst [vmem:[#allocation2 + $0xa8] sm:$0xf] %v3022_v20  ;;  %v3437_v29 = vrot.slane %v3435_v38, 1  ;;  %v2812_v36 = vshrl.u32 %v7447_v54, 16  ;;  %v2815_v16 = vshll.u32 %v7447_v54, 16  ;;  %v2352_v28 = vadd.f32 %v10795_v46, %v2313_v37  ;;  %v12110_v62 = vld [vmem:[#allocation30_spill] sm:$0xff] }
 0x26d   : > { %v3644_v40 = vrot.slane %v7209_v24, 1  ;;  %v2311_v10 = vmul.f32 %v10777_v1, %v2252_v15  ;;  %v3432_v14 = vrot.slane %v3430_v6, 1  ;;  %v7900_v0 = vadd.f32 %v10667_v47, %v10653_v34  ;;  %v12112_v38 = vld [vmem:[#allocation23_spill] sm:$0xff]  ;;  %v3052_v20 = vld [vmem:[#allocation2 + $0x3c] sm:$0xf] }
 0x26e   : > { %v10829_v21 = vrot.slane %v2812_v36, 7  ;;  %v2384_v52 = vmax.f32 %v2352_v28, 0.0  ;;  %v2104_v53 = vadd.f32 %v10767_v61, %v12107_v31  ;;  %v10833_v13 = vcombine.low %v3114_v56, %v3115_v45  ;;  %v12109_v61 = vld [vmem:[#allocation29_spill] sm:$0xff]  ;;  %v3025_v54 = vld [vmem:[#allocation2 + $0xb0] sm:$0x1] }
 0x26f   : > { %v2350_v11 = vadd.f32 %v10795_v46, %v2311_v10  ;;  %v3433_v3 = vor.u32 %v3432_v14, %v3428_v48  ;;  %v3646_v7 = vsel %vm781_vm4, %v3644_v40, %v3645_v23  ;;  %v2112_v18 = vadd.f32 %v7900_v0, %v12108_v2  ;;  %v12113_v45 = vld [vmem:[#allocation25_spill] sm:$0xff]  ;;  %v12115_v10 = vld [vmem:[#allocation31_spill] sm:$0xff]  ;;  %v3018_v0 = vld [vmem:[#allocation2 + $0xa4] sm:$0x1] }
 0x270   : > { %v2817_v58 = vor.u32 %v2815_v16, %v10829_v21  ;;  %v7450_v34 = vpack.c.bf16 %v2384_v52, %v2384_v52  ;;  %5421 = vmatmul.mubr.bf16.gmra.mrb[156].mxu0 %v3646_v7  ;;  %v2265_v47 = vadd.f32 %v10669_v26, %v2104_v53  ;;  %v2835_v57 = vrot.slane %v10790_v44, 4 }
 0x271   : > { %v2382_v51 = vmax.f32 %v2350_v11, 0.0  ;;  %v3438_v17 = vsel %vm572_vm0, %v3433_v3, %v3437_v29  ;;  %v2273_v32 = vadd.f32 %v12109_v61, %v2112_v18  ;;  %5428 = vmatprep.mubr.bf16.mxu0 %v10833_v13  ;;  %v2818_v26 = vrot.slane %v10829_v21, 4  ;;  %v10868_v11 = vld [vmem:[#allocation2 + $0x44] ss:$0 sps:$4 sm:$0x11]  }
 0x272   : > { %v3015_v63 = vsel %vm10440_vm12, %v2817_v58, %v3014_v60  ;;  %v2837_v33 = vshrl.u32 %v7450_v34, 16  ;;  %5267 = vmatprep.mubr.bf16.mxu1 %v3438_v17  ;;  %v2314_v59 = vmul.f32 %v10777_v1, %v2265_v47  ;;  %v7903_v39 = vadd.f32 %v12111_v9, %v12110_v62 }
 0x273   : > { %3016 = vst [vmem:[#allocation2 + $0x9c] sm:$0xf] %v3015_v63  ;;  %v7448_v5 = vpack.c.bf16 %v2382_v51, %v2382_v51  ;;  %v2316_v12 = vmul.f32 %v10777_v1, %v2273_v32  ;;  %5268 = vmatmul.mubr.bf16.gmra.mrb[160].mxu1 %v7178_v42  ;;  %v2840_v4 = vshll.u32 %v7450_v34, 16  ;;  %v2107_v8 = vadd.f32 %v7897_v19, %v12112_v38  ;;  %v12114_v42 = vld [vmem:[#allocation33_spill] sm:$0xff] }
 0x274   : > { %v2839_v44 = vrot.slane %v2837_v33, 7  ;;  %v2353_v25 = vadd.f32 %v10795_v46, %v2314_v59  ;;  %v2115_v50 = vadd.f32 %v7903_v39, %v12113_v45  ;;  %v10858_v15 = vcombine.low %v3052_v20, %v10847_v35  ;;  %v3028_v59 = vld [vmem:[#allocation2 + $0xb4] sm:$0xf] }
 0x275   : > { %v2820_v37 = vshrl.u32 %v7448_v5, 16  ;;  %v2355_v24 = vadd.f32 %v10795_v46, %v2316_v12  ;;  %v2268_v36 = vadd.f32 %v12114_v42, %v2107_v8  ;;  %v2823_v28 = vshll.u32 %v7448_v5, 16  ;;  %v3035_v12 = vld [vmem:[#allocation2 + $0xc0] sm:$0xf] }
 0x276   : > { %v2842_v48 = vor.u32 %v2840_v4, %v2839_v44  ;;  %v2844_v6 = vrot.slane %v2839_v44, 4  ;;  %v2385_v29 = vmax.f32 %v2353_v25, 0.0  ;;  %v2276_v19 = vadd.f32 %v12115_v10, %v2115_v50 }
 0x277   : > { %v2822_v16 = vrot.slane %v2820_v37, 7  ;;  %v2387_v40 = vmax.f32 %v2355_v24, 0.0  ;;  %v2315_v21 = vmul.f32 %v10777_v1, %v2268_v36  ;;  %v3440_v2 = vshrl.u32 %v10858_v15, 16  ;;  %v10886_v37 = vld [vmem:[#allocation2 + $0x4c] sm:$0xf] }
 0x278   : > { %v2843_v14 = vsel %vm10447_vm13, %v2835_v57, %v2842_v48  ;;  %v3026_v23 = vsel %vm10130_vm7, %v2844_v6, %v3025_v54  ;;  %v7451_v56 = vpack.c.bf16 %v2385_v29, %v2385_v29  ;;  %v2317_v60 = vmul.f32 %v10777_v1, %v2276_v19  ;;  %v3094_v57 = vld [vmem:[#allocation2 + $0x30] sm:$0xe]  ;;  %v3116_v54 = vld [vmem:[#allocation2 + $0x48] sm:$0xf]  ;;  %v10888_v24 = vld [vmem:[#allocation2 + $0x4c] sm:$0xf] }
 0x279   : > { %3024 = vst [vmem:[#allocation2 + $0xac] sm:$0xf] %v2843_v14  ;;  %3027 = vst [vmem:[#allocation2 + $0xb0] sm:$0x1] %v3026_v23  ;;  %v2825_v52 = vor.u32 %v2823_v28, %v2822_v16  ;;  %v2827_v31 = vrot.slane %v2822_v16, 4  ;;  %v7453_v53 = vpack.c.bf16 %v2387_v40, %v2387_v40  ;;  %v2354_v7 = vadd.f32 %v10795_v46, %v2315_v21 }
 0x27a   : > { %v2846_v3 = vshrl.u32 %v7451_v56, 16  ;;  %v3442_v18 = vshll.u32 %v10858_v15, 16  ;;  %v2849_v51 = vshll.u32 %v7451_v56, 16  ;;  %v2356_v17 = vadd.f32 %v10795_v46, %v2317_v60  ;;  %v10893_v48 = vld [vmem:[#allocation2 + $0x50] ss:$0 sps:$4 sm:$0x11]  }
 0x27b   : > { %v2826_v58 = vsel %vm10447_vm13, %v2818_v26, %v2825_v52  ;;  %v3019_v34 = vsel %vm10130_vm7, %v2827_v31, %v3018_v0  ;;  %v2863_v47 = vshrl.u32 %v7453_v53, 16  ;;  %v2386_v61 = vmax.f32 %v2354_v7, 0.0  ;;  %v3054_v36 = vld [vmem:[#allocation2 + $0x48] sm:$0xf]  ;;  %v3032_v40 = vld [vmem:[#allocation2 + $0xbc] sm:$0x1] }
 0x27c   : > { %3017 = vst [vmem:[#allocation2 + $0xa0] sm:$0xf] %v2826_v58  ;;  %3020 = vst [vmem:[#allocation2 + $0xa4] sm:$0x1] %v3019_v34  ;;  %v2848_v1 = vrot.slane %v2846_v3, 7  ;;  %v3444_v32 = vrot.slane %v3442_v18, 1  ;;  %v7210_v26 = vcombine.low %v3094_v57, %v10798_v30  ;;  %v10897_v22 = vcombine.low %v3116_v54, %v10886_v37 }
 0x27d   : > { %v10878_v63 = vrot.slane %v2863_v47, 7  ;;  %v2866_v33 = vshll.u32 %v7453_v53, 16  ;;  %v3447_v5 = vshll.u32 %v10868_v11, 16  ;;  %v2388_v9 = vmax.f32 %v2356_v17, 0.0  ;;  %v3039_v28 = vld [vmem:[#allocation2 + $0xc8] sm:$0x1] }
 0x27e   : > { %v2851_v62 = vor.u32 %v2849_v51, %v2848_v1  ;;  %v7452_v39 = vpack.c.bf16 %v2386_v61, %v2386_v61  ;;  %v3445_v4 = vor.u32 %v3444_v32, %v3440_v2  ;;  %v3648_v46 = vrot.slane %v10786_v27, 1  ;;  %v3095_v14 = vld [vmem:[#allocation2 + $0x3c] sm:$0xe]  ;;  %v10905_v60 = vld [vmem:[#allocation2 + $0x58] sm:$0xf] }
 0x27f   : > { %v2868_v44 = vor.u32 %v2866_v33, %v10878_v63  ;;  %v3449_v25 = vrot.slane %v3447_v5, 1  ;;  %v7454_v8 = vpack.c.bf16 %v2388_v9, %v2388_v9  ;;  %v3647_v50 = vrot.slane %v7210_v26, 1  ;;  %v10911_v18 = vld [vmem:[#allocation2 + $0x5c] ss:$0 sps:$4 sm:$0x11]  }
 0x280   : > { %v3029_v38 = vsel %vm10440_vm12, %v2851_v62, %v3028_v59  ;;  %v2854_v20 = vshrl.u32 %v7452_v39, 16  ;;  %v2852_v27 = vrot.slane %v2848_v1, 4  ;;  %v2857_v42 = vshll.u32 %v7452_v39, 16  ;;  %v3056_v51 = vld [vmem:[#allocation2 + $0x54] sm:$0xf] }
 0x281   : > { %v3036_v30 = vsel %vm10440_vm12, %v2868_v44, %v3035_v12  ;;  %3030 = vst [vmem:[#allocation2 + $0xb4] sm:$0xf] %v3029_v38  ;;  %v3450_v45 = vsel %vm572_vm0, %v3445_v4, %v3449_v25  ;;  %v2871_v6 = vshrl.u32 %v7454_v8, 16  ;;  %v2874_v16 = vshll.u32 %v7454_v8, 16  ;;  %v10918_v61 = vld [vmem:[#allocation2 + $0x58] sm:$0xf] }
 0x282   : > { %3037 = vst [vmem:[#allocation2 + $0xc0] sm:$0xf] %v3036_v30  ;;  %v2856_v29 = vrot.slane %v2854_v20, 7  ;;  %5275 = vmatprep.mubr.bf16.mxu1 %v3450_v45  ;;  %v3649_v10 = vsel %vm781_vm4, %v3647_v50, %v3648_v46  ;;  %v7180_v19 = vcombine.low %v3054_v36, %v10888_v24  ;;  %v7211_v21 = vcombine.low %v3095_v14, %v10847_v35  ;;  %v3118_v33 = vld [vmem:[#allocation2 + $0x54] sm:$0xf] }
 0x283   : > { %5276 = vmatmul.mubr.bf16.gmra.mrb[164].mxu1 %v10858_v15  ;;  %v2873_v23 = vrot.slane %v2871_v6, 7  ;;  %5429 = vmatmul.mubr.bf16.gmra.mrb[160].mxu0 %v3649_v10  ;;  %v2869_v52 = vrot.slane %v10878_v63, 4  ;;  %v3459_v53 = vshll.u32 %v10893_v48, 16  ;;  %v3651_v47 = vrot.slane %v10868_v11, 1  ;;  %v10921_v59 = vld [vmem:[#allocation2 + $0x64] sm:$0xf] }
 0x284   : > { %v2859_v0 = vor.u32 %v2857_v42, %v2856_v29  ;;  %v2861_v56 = vrot.slane %v2856_v29, 4  ;;  %5436 = vmatprep.mubr.bf16.mxu0 %v10897_v22  ;;  %v3454_v31 = vshll.u32 %v7180_v19, 16  ;;  %v3452_v35 = vshrl.u32 %v7180_v19, 16  ;;  %v3096_v26 = vld [vmem:[#allocation2 + $0x48] sm:$0xe] }
 0x285   : > { %v2876_v3 = vor.u32 %v2874_v16, %v2873_v23  ;;  %v2878_v15 = vrot.slane %v2873_v23, 4  ;;  %v3650_v34 = vrot.slane %v7211_v21, 1  ;;  %v7181_v32 = vcombine.low %v3056_v51, %v10905_v60  ;;  %v10930_v44 = vld [vmem:[#allocation2 + $0x68] ss:$0 sps:$4 sm:$0x11]  }
 0x286   : > { %v2860_v7 = vsel %vm10447_vm13, %v2852_v27, %v2859_v0  ;;  %v3033_v2 = vsel %vm10130_vm7, %v2861_v56, %v3032_v40  ;;  %v3456_v58 = vrot.slane %v3454_v31, 1  ;;  %v3461_v63 = vrot.slane %v3459_v53, 1  ;;  %v10932_v4 = vld [vmem:[#allocation2 + $0x70] sm:$0xf]  ;;  %v3060_v30 = vld [vmem:[#allocation2 + $0x6c] sm:$0xf] }
 0x287   : > { %3031 = vst [vmem:[#allocation2 + $0xb8] sm:$0xf] %v2860_v7  ;;  %3034 = vst [vmem:[#allocation2 + $0xbc] sm:$0x1] %v3033_v2  ;;  %v2877_v1 = vsel %vm10447_vm13, %v2869_v52, %v2876_v3  ;;  %v3040_v17 = vsel %vm10130_vm7, %v2878_v15, %v3039_v28  ;;  %v3466_v5 = vshll.u32 %v7181_v32, 16  ;;  %v3471_v11 = vshll.u32 %v10911_v18, 16 }
 0x288   : > { %3038 = vst [vmem:[#allocation2 + $0xc4] sm:$0xf] %v2877_v1  ;;  %3041 = vst [vmem:[#allocation2 + $0xc8] sm:$0x1] %v3040_v17  ;;  %v3457_v57 = vor.u32 %v3456_v58, %v3452_v35  ;;  %v3652_v62 = vsel %vm781_vm4, %v3650_v34, %v3651_v47  ;;  %v10927_v9 = vcombine.low %v3118_v33, %v10918_v61  ;;  %v3464_v25 = vshrl.u32 %v7181_v32, 16 }
 0x289   : > { %v7212_v39 = vcombine.low %v3096_v26, %v10888_v24  ;;  %v3468_v46 = vrot.slane %v3466_v5, 1  ;;  %v7182_v38 = vcombine.low %v3058_v43, %v10921_v59  ;;  %v3473_v20 = vrot.slane %v3471_v11, 1  ;;  %v10942_v29 = vld [vmem:[#allocation2 + $0x64] sm:$0xf]  ;;  %v3120_v28 = vld [vmem:[#allocation2 + $0x60] sm:$0xf] }
 0x28a   : > { %v3462_v12 = vsel %vm572_vm0, %v3457_v57, %v3461_v63  ;;  %v3654_v24 = vrot.slane %v10893_v48, 1  ;;  %v3483_v50 = vshll.u32 %v10930_v44, 16  ;;  %v10939_v27 = vcombine.low %v3060_v30, %v10932_v4  ;;  %v3097_v10 = vld [vmem:[#allocation2 + $0x54] sm:$0xe]  ;;  %v3062_v21 = vld [vmem:[#allocation2 + $0x78] sm:$0xf] }
 0x28b   : > { %5283 = vmatprep.mubr.bf16.mxu1 %v3462_v12  ;;  %5437 = vmatmul.mubr.bf16.gmra.mrb[164].mxu0 %v3652_v62  ;;  %v3469_v8 = vor.u32 %v3468_v46, %v3464_v25  ;;  %v3478_v54 = vshll.u32 %v7182_v38, 16  ;;  %v3653_v45 = vrot.slane %v7212_v39, 1  ;;  %v3476_v42 = vshrl.u32 %v7182_v38, 16  ;;  %v10952_v56 = vld [vmem:[#allocation2 + $0x74] ss:$0 sps:$4 sm:$0x11]  }
 0x28c   : > { %5444 = vmatprep.mubr.bf16.mxu0 %v10927_v9  ;;  %5284 = vmatmul.mubr.bf16.gmra.mrb[168].mxu1 %v7180_v19  ;;  %v3490_v16 = vshll.u32 %v10939_v27, 16  ;;  %v10945_v19 = vld [vmem:[#allocation2 + $0x7c] sm:$0xf]  ;;  %v10949_v14 = vcombine.low %v3120_v28, %v10942_v29  ;;  %v3485_v23 = vrot.slane %v3483_v50, 1  ;;  %v7213_v0 = vcombine.low %v3097_v10, %v10905_v60  ;;  %v10962_v2 = vld [vmem:[#allocation2 + $0x70] sm:$0xf] }
 0x28d   : > { %v3474_v6 = vsel %vm572_vm0, %v3469_v8, %v3473_v20  ;;  %v3480_v36 = vrot.slane %v3478_v54, 1  ;;  %v3655_v48 = vsel %vm781_vm4, %v3653_v45, %v3654_v24  ;;  %v10957_v53 = vcombine.low %v3062_v21, %v10945_v19  ;;  %v3098_v58 = vld [vmem:[#allocation2 + $0x60] sm:$0xe]  ;;  %v3122_v47 = vld [vmem:[#allocation2 + $0x6c] sm:$0xf] }
 0x28e   : > { %5291 = vmatprep.mubr.bf16.mxu1 %v3474_v6  ;;  %v3492_v31 = vrot.slane %v3490_v16, 1  ;;  %v3656_v3 = vrot.slane %v7213_v0, 1  ;;  %v3657_v15 = vrot.slane %v10911_v18, 1  ;;  %v3488_v7 = vshrl.u32 %v10939_v27, 16  ;;  %v10965_v51 = vld [vmem:[#allocation2 + $0x88] sm:$0xf] }
 0x28f   : > { %v3481_v40 = vor.u32 %v3480_v36, %v3476_v42  ;;  %v3495_v60 = vshll.u32 %v10952_v56, 16  ;;  %v3502_v34 = vshll.u32 %v10957_v53, 16  ;;  %v10969_v17 = vcombine.low %v3122_v47, %v10962_v2  ;;  %v10972_v57 = vld [vmem:[#allocation2 + $0x80] ss:$0 sps:$4 sm:$0x11]   ;;  %v11020_v47 = vpop.f32.mrb[144].mxu1 }
 0x290   : > { %v3493_v35 = vor.u32 %v3492_v31, %v3488_v7  ;;  %v3658_v1 = vsel %vm781_vm4, %v3656_v3, %v3657_v15  ;;  %v7214_v18 = vcombine.low %v3098_v58, %v10921_v59  ;;  %v3064_v63 = vld [vmem:[#allocation2 + $0x84] sm:$0xf]  ;;  %v3660_v43 = vrot.slane %v10930_v44, 1  ;;  %v10982_v62 = vld [vmem:[#allocation2 + $0x7c] sm:$0xf] }
 0x291   : > { %v3486_v52 = vsel %vm572_vm0, %v3481_v40, %v3485_v23  ;;  %v3504_v5 = vrot.slane %v3502_v34, 1  ;;  %v10977_v11 = vcombine.low %v3064_v63, %v10965_v51  ;;  %v3500_v12 = vshrl.u32 %v10957_v53, 16  ;;  %v3124_v39 = vld [vmem:[#allocation2 + $0x78] sm:$0xf]  ;;  %v10985_v8 = vld [vmem:[#allocation2 + $0x94] sm:$0xf] }
 0x292   : > { %v3659_v26 = vrot.slane %v7214_v18, 1  ;;  %v3507_v59 = vshll.u32 %v10972_v57, 16  ;;  %v10989_v54 = vcombine.low %v3124_v39, %v10982_v62  ;;  %v10992_v45 = vld [vmem:[#allocation2 + $0x8c] ss:$0 sps:$4 sm:$0x11]   ;;  %v3663_v16 = vrot.slane %v10952_v56, 1 }
 0x293   : > { %5445 = vmatmul.mubr.bf16.gmra.mrb[168].mxu0 %v3655_v48  ;;  %v3505_v25 = vor.u32 %v3504_v5, %v3500_v12  ;;  %v3514_v46 = vshll.u32 %v10977_v11, 16  ;;  %v3066_v24 = vld [vmem:[#allocation2 + $0x90] sm:$0xf]  ;;  %v3519_v28 = vshll.u32 %v10992_v45, 16  ;;  %v3127_v40 = vld [vmem:[#allocation2 + $0x88] sm:$0xf] }
 0x294   : > { %5452 = vmatprep.mubr.bf16.mxu0 %v10949_v14  ;;  %5292 = vmatmul.mubr.bf16.gmra.mrb[172].mxu1 %v7181_v32  ;;  %v3497_v32 = vrot.slane %v3495_v60, 1  ;;  %v3661_v20 = vsel %vm781_vm4, %v3659_v26, %v3660_v43  ;;  %v3509_v30 = vrot.slane %v3507_v59, 1  ;;  %v10998_v42 = vcombine.low %v3066_v24, %v10985_v8  ;;  %v3126_v23 = vld [vmem:[#allocation2 + $0x84] sm:$0xf]  ;;  %v11004_v0 = vld [vmem:[#allocation2 + $0xa0] sm:$0xf] }
 0x295   : > { %5299 = vmatprep.mubr.bf16.mxu1 %v3486_v52  ;;  %v3516_v6 = vrot.slane %v3514_v46, 1  ;;  %v11007_v52 = vcombine.low %v3126_v23, %v3127_v40  ;;  %v3521_v31 = vrot.slane %v3519_v28, 1  ;;  %v11010_v56 = vld [vmem:[#allocation2 + $0x98] ss:$0 sps:$4 sm:$0x11]   ;;  %v3669_v28 = vrot.slane %v10992_v45, 1 }
 0x296   : > { %v3498_v33 = vsel %vm572_vm0, %v3493_v35, %v3497_v32  ;;  %v3510_v50 = vsel %vm572_vm0, %v3505_v25, %v3509_v30  ;;  %v3526_v48 = vshll.u32 %v10998_v42, 16  ;;  %v3068_v15 = vld [vmem:[#allocation2 + $0x9c] sm:$0xf]  ;;  %v3129_v58 = vld [vmem:[#allocation2 + $0x94] sm:$0xf]  ;;  %v3524_v32 = vshrl.u32 %v10998_v42, 16 }
 0x297   : > { %v11016_v35 = vcombine.low %v3068_v15, %v11004_v0  ;;  %v11018_v34 = vld [vmem:[#allocation2 + $0x2c] ss:$0 sps:$4 sm:$0x11]   ;;  %v3531_v18 = vshll.u32 %v11010_v56, 16  ;;  %v11025_v63 = vld [vmem:[#allocation2 + $0x28] sm:$0xf] }
 0x298   : > { %v3528_v60 = vrot.slane %v3526_v48, 1  ;;  %v3101_v5 = vld [vmem:[#allocation2 + $0x84] sm:$0xe]  ;;  %v11031_v59 = vld [vmem:[#allocation2 + $0xac] sm:$0xf] }
 0x299   : > { %v3538_v26 = vshll.u32 %v11016_v35, 16  ;;  %v7217_v12 = vcombine.low %v3101_v5, %v10965_v51  ;;  %v3220_v39 = vld [vmem:[#allocation2 + $0x24] sm:$0xe]  ;;  %v3533_v25 = vrot.slane %v3531_v18, 1  ;;  %v3070_v30 = vld [vmem:[#allocation2 + $0xa8] sm:$0xf] }
 0x29a   : > { %v11034_v46 = vld [vmem:[#allocation2 + $0xa4] ss:$0 sps:$4 sm:$0x11]   ;;  %v3536_v40 = vshrl.u32 %v11016_v35, 16  ;;  %v3131_v48 = vld [vmem:[#allocation2 + $0xa0] sm:$0xf] }
 0x29b   : > { %5453 = vmatmul.mubr.bf16.gmra.mrb[172].mxu0 %v3658_v1  ;;  %v3666_v1 = vrot.slane %v10972_v57, 1  ;;  %v3540_v24 = vrot.slane %v3538_v26, 1  ;;  %v3133_v26 = vld [vmem:[#allocation2 + $0xac] sm:$0xf] }
 0x29c   : > { %5460 = vmatprep.mubr.bf16.mxu0 %v10969_v17  ;;  %5300 = vmatmul.mubr.bf16.gmra.mrb[176].mxu1 %v7182_v38  ;;  %v3099_v38 = vld [vmem:[#allocation2 + $0x6c] sm:$0xe] }
 0x29d   : > { %5307 = vmatprep.mubr.bf16.mxu1 %v3498_v33  ;;  %v7215_v44 = vcombine.low %v3099_v38, %v10932_v4  ;;  %v3512_v4 = vshrl.u32 %v10977_v11, 16  ;;  %v3529_v33 = vor.u32 %v3528_v60, %v3524_v32  ;;  %v7303_v38 = vcombine.low %v3220_v39, %v11025_v63 }
 0x29e   : > { %v3541_v23 = vor.u32 %v3540_v24, %v3536_v40 }
 0x29f   : > { %v3662_v36 = vrot.slane %v7215_v44, 1  ;;  %v3517_v10 = vor.u32 %v3516_v6, %v3512_v4  ;;  %v11038_v44 = vpop.f32.mrb[145].mxu1  ;;  %v3534_v51 = vsel %vm572_vm0, %v3529_v33, %v3533_v25  ;;  %v4566_v6 = vrot.slane %v7303_v38, 1 }
 0x2a0   : > { %v3672_v33 = vrot.slane %v11010_v56, 1 }
 0x2a1   : > { %v3664_v21 = vsel %vm781_vm4, %v3662_v36, %v3663_v16  ;;  %v3522_v7 = vsel %vm572_vm0, %v3517_v10, %v3521_v31  ;;  %v11046_v36 = vpop.f32.mrb[146].mxu1  ;;  %v3668_v16 = vrot.slane %v7217_v12, 1  ;;  %v3543_v10 = vshll.u32 %v11034_v46, 16  ;;  %v3102_v31 = vld [vmem:[#allocation2 + $0x90] sm:$0xe] }
 0x2a2   : > { %v11048_v4 = vpop.f32.mrb[147].mxu1  ;;  %v7218_v60 = vcombine.low %v3102_v31, %v10985_v8 }
 0x2a3   : > { %5461 = vmatmul.mubr.bf16.gmra.mrb[176].mxu0 %v3661_v20  ;;  %v4567_v20 = vrot.slane %v11018_v34, 1  ;;  %v3670_v15 = vsel %vm781_vm4, %v3668_v16, %v3669_v28  ;;  %v3545_v45 = vrot.slane %v3543_v10, 1  ;;  %v3675_v16 = vrot.slane %v11034_v46, 1  ;;  %v3135_v10 = vld [vmem:[#allocation2 + $0xb8] sm:$0xf] }
 0x2a4   : > { %5468 = vmatprep.mubr.bf16.mxu0 %v10989_v54  ;;  %5308 = vmatmul.mubr.bf16.gmra.mrb[180].mxu1 %v10939_v27  ;;  %v3100_v27 = vld [vmem:[#allocation2 + $0x78] sm:$0xe] }
 0x2a5   : > { %5315 = vmatprep.mubr.bf16.mxu1 %v3510_v50  ;;  %v7216_v3 = vcombine.low %v3100_v27, %v10945_v19  ;;  %v11044_v50 = vcombine.low %v3070_v30, %v11031_v59 }
 0x2a7   : > { %v3665_v19 = vrot.slane %v7216_v3, 1  ;;  %v3550_v27 = vshll.u32 %v11044_v50, 16  ;;  %v11057_v3 = vld [vmem:[#allocation2 + $0xb8] sm:$0xf]  ;;  %v3548_v8 = vshrl.u32 %v11044_v50, 16 }
 0x2a9   : > { %v3667_v57 = vsel %vm781_vm4, %v3665_v19, %v3666_v1  ;;  %v3072_v19 = vld [vmem:[#allocation2 + $0xb4] sm:$0xf]  ;;  %v3546_v1 = vsel %vm572_vm0, %v3541_v23, %v3545_v45  ;;  %v3552_v32 = vrot.slane %v3550_v27, 1  ;;  %v3104_v27 = vld [vmem:[#allocation2 + $0xa8] sm:$0xe] }
 0x2aa   : > { %v11069_v18 = vcombine.low %v3072_v19, %v11057_v3  ;;  %v3134_v23 = vld [vmem:[#allocation2 + $0xb4] sm:$0xf]  ;;  %v3171_v45 = vld [vmem:[#allocation2 + $0x18] sm:$0xf]  ;;  %v8974_v19 = vld [vmem:[#allocation2 + $0x10] sm:$0xf] }
 0x2ab   : > { %5469 = vmatmul.mubr.bf16.gmra.mrb[180].mxu0 %v3664_v21  ;;  %v3130_v21 = vld [vmem:[#allocation2 + $0x9c] sm:$0xf]  ;;  %v3553_v12 = vor.u32 %v3552_v32, %v3548_v8  ;;  %v11088_v31 = vcombine.low %v3134_v23, %v3135_v10 }
 0x2ac   : > { %5476 = vmatprep.mubr.bf16.mxu0 %v11007_v52  ;;  %5316 = vmatmul.mubr.bf16.gmra.mrb[184].mxu1 %v10957_v53  ;;  %v3128_v53 = vld [vmem:[#allocation2 + $0x90] sm:$0xf]  ;;  %v3562_v39 = vshll.u32 %v11069_v18, 16  ;;  %v3560_v28 = vshrl.u32 %v11069_v18, 16 }
 0x2ad   : > { %5323 = vmatprep.mubr.bf16.mxu1 %v3522_v7  ;;  %v11028_v43 = vcombine.low %v3128_v53, %v3129_v58  ;;  %v11060_v7 = vcombine.low %v3130_v21, %v3131_v48  ;;  %v11063_v58 = vld [vmem:[#allocation2 + $0xb0] ss:$0 sps:$4 sm:$0x11]   ;;  %v3671_v53 = vrot.slane %v7218_v60, 1  ;;  %v3172_v48 = vld [vmem:[#allocation2 + $0x1c] sm:$0xf] }
 0x2ae   : > { %v3555_v5 = vshll.u32 %v11063_v58, 16  ;;  %v3564_v24 = vrot.slane %v3562_v39, 1  ;;  %v3154_v60 = vld [vmem:[#allocation2 + $0xc] sm:$0xe]  ;;  %v11091_v46 = vcombine.low %v3171_v45, %v3172_v48  ;;  %v3678_v8 = vrot.slane %v11063_v58, 1 }
 0x2af   : > { %v3673_v25 = vsel %vm781_vm4, %v3671_v53, %v3672_v33  ;;  %v8892_v53 = vld [vmem:[#allocation2 + $0x14] ss:$0 sps:$4 sm:$0x11]   ;;  %v8896_v48 = vld [vmem:[#allocation2 + $0x20] ss:$0 sps:$4 sm:$0x11]  }
 0x2b3   : > { %5477 = vmatmul.mubr.bf16.gmra.mrb[184].mxu0 %v3667_v57  ;;  %v3132_v57 = vld [vmem:[#allocation2 + $0xa8] sm:$0xf] }
 0x2b4   : > { %5484 = vmatprep.mubr.bf16.mxu0 %v11028_v43  ;;  %5324 = vmatmul.mubr.bf16.gmra.mrb[188].mxu1 %v10977_v11  ;;  %v11054_v11 = vsel %vm781_vm4, %v4566_v6, %v4567_v20  ;;  %v11076_v38 = vcombine.low %v3132_v57, %v3133_v26  ;;  %v3557_v20 = vrot.slane %v3555_v5, 1  ;;  %v12116_v5 = vld [vmem:[#allocation26_spill] sm:$0xff]  ;;  %v4100_v57 = vrot.slane %v8892_v53, 1 }
 0x2b5   : > { %5331 = vmatprep.mubr.bf16.mxu1 %v3534_v51  ;;  %v11079_v51 = vld [vmem:[#allocation2 + $0xbc] ss:$0 sps:$4 sm:$0x11]   ;;  %v3137_v26 = vld [vmem:[#allocation2 + $0xc4] sm:$0xf]  ;;  %v3844_v23 = vshrl.u32 %v12116_v5, 16 }
 0x2b6   : > { %v3558_v56 = vsel %vm572_vm0, %v3553_v12, %v3557_v20  ;;  %v3567_v40 = vshll.u32 %v11079_v51, 16  ;;  %v4310_v12 = vshll.u32 %v11091_v46, 16  ;;  %v3105_v20 = vld [vmem:[#allocation2 + $0xb4] sm:$0xe] }
 0x2b8   : > { %v4312_v58 = vrot.slane %v4310_v12, 1 }
 0x2bb   : > { %5485 = vmatmul.mubr.bf16.gmra.mrb[188].mxu0 %v3670_v15  ;;  %v7220_v15 = vcombine.low %v3104_v27, %v11031_v59  ;;  %v3846_v59 = vshll.u32 %v12116_v5, 16  ;;  %v4308_v27 = vshrl.u32 %v11091_v46, 16 }
 0x2bc   : > { %5492 = vmatprep.mubr.bf16.mxu0 %v11060_v7  ;;  %5332 = vmatmul.mubr.bf16.gmra.mrb[192].mxu1 %v10998_v42  ;;  %v3103_v42 = vld [vmem:[#allocation2 + $0x9c] sm:$0xe] }
 0x2bd   : > { %5339 = vmatprep.mubr.bf16.mxu1 %v3546_v1  ;;  %v7219_v30 = vcombine.low %v3103_v42, %v11004_v0  ;;  %v3565_v0 = vor.u32 %v3564_v24, %v3560_v28  ;;  %v7254_v1 = vcombine.low %v3154_v60, %v8974_v19  ;;  %v3677_v33 = vrot.slane %v7220_v15, 1  ;;  %v8894_v42 = vld [vmem:[#allocation2 + $0x20] ss:$0 sps:$4 sm:$0x11]   ;;  %v3173_v24 = vld [vmem:[#allocation2 + $0x24] sm:$0xf] }
 0x2be   : > { %v11104_v28 = vcombine.low %v3173_v24, %v11025_v63  ;;  %v3681_v63 = vrot.slane %v11079_v51, 1  ;;  %v4313_v15 = vor.u32 %v4312_v58, %v4308_v27  ;;  %v12117_v19 = vld [vmem:[#allocation28_spill] sm:$0xff]  ;;  %v8977_v24 = vld [vmem:[#allocation3 + $0x200] sm:$0xff]   ;;  %v8901_v58 = vld [vmem:[#allocation2 + $0x2c] ss:$0 sps:$4 sm:$0x11]   ;;  %v11129_v27 = vadd.f32 %v11038_v44, %v11020_v47 }
 0x2bf   : > { %v3674_v6 = vrot.slane %v7219_v30, 1  ;;  %v4099_v39 = vrot.slane %v7254_v1, 1  ;;  %v3679_v30 = vsel %vm781_vm4, %v3677_v33, %v3678_v8  ;;  %v3858_v1 = vshll.u32 %v12117_v19, 16  ;;  %v11114_v33 = vld [vmem:[#allocation2 + $0x34] sm:$0xf] }
 0x2c0   : > { %v4322_v60 = vshll.u32 %v11104_v28, 16 }
 0x2c1   : > { %v3676_v21 = vsel %vm781_vm4, %v3674_v6, %v3675_v16  ;;  %v3848_v6 = vrot.slane %v3846_v59, 1  ;;  %v3155_v16 = vld [vmem:[#allocation2 + $0x18] sm:$0xe]  ;;  %v3175_v59 = vld [vmem:[#allocation2 + $0x30] sm:$0xf] }
 0x2c3   : > { %5493 = vmatmul.mubr.bf16.gmra.mrb[192].mxu0 %v3673_v25  ;;  %v3136_v25 = vld [vmem:[#allocation2 + $0xc0] sm:$0xf]  ;;  %v3849_v45 = vor.u32 %v3848_v6, %v3844_v23  ;;  %v4320_v6 = vshrl.u32 %v11104_v28, 16 }
 0x2c4   : > { %5500 = vmatprep.mubr.bf16.mxu0 %v11076_v38  ;;  %5340 = vmatmul.mubr.bf16.gmra.mrb[196].mxu1 %v11016_v35  ;;  %v3569_v35 = vrot.slane %v3567_v40, 1  ;;  %v8975_v40 = vld [vmem:[#allocation2 + $0x1c] sm:$0xf] }
 0x2c5   : > { %5347 = vmatprep.mubr.bf16.mxu1 %v3558_v56  ;;  %v7221_v56 = vcombine.low %v3105_v20, %v11057_v3  ;;  %v7255_v10 = vcombine.low %v3155_v16, %v8975_v40  ;;  %v3851_v3 = vshll.u32 %v8892_v53, 16  ;;  %v3860_v20 = vrot.slane %v3858_v1, 1  ;;  %v3177_v1 = vld [vmem:[#allocation2 + $0x3c] sm:$0xf] }
 0x2c6   : > { %v3570_v32 = vsel %vm572_vm0, %v3565_v0, %v3569_v35  ;;  %v4101_v0 = vsel %vm781_vm4, %v4099_v39, %v4100_v57  ;;  %v4324_v39 = vrot.slane %v4322_v60, 1  ;;  %v11120_v57 = vcombine.low %v3175_v59, %v11114_v33 }
 0x2c7   : > { %v3680_v35 = vrot.slane %v7221_v56, 1  ;;  %v3853_v5 = vrot.slane %v3851_v3, 1  ;;  %v4327_v16 = vshll.u32 %v11018_v34, 16  ;;  %v3856_v40 = vshrl.u32 %v12117_v19, 16 }
 0x2c8   : > { %v4325_v23 = vor.u32 %v4324_v39, %v4320_v6  ;;  %v4334_v3 = vshll.u32 %v11120_v57, 16  ;;  %v4106_v60 = vrot.slane %v8901_v58, 1  ;;  %v4332_v39 = vshrl.u32 %v11120_v57, 16 }
 0x2c9   : > { %v3682_v53 = vsel %vm781_vm4, %v3680_v35, %v3681_v63  ;;  %v3854_v51 = vsel %vm572_vm0, %v3849_v45, %v3853_v5  ;;  %v3861_v35 = vor.u32 %v3860_v20, %v3856_v40  ;;  %v11132_v63 = vld [vmem:[#allocation2 + $0x38] ss:$0 sps:$4 sm:$0x11]   ;;  %v4329_v34 = vrot.slane %v4327_v16, 1  ;;  %v3157_v5 = vld [vmem:[#allocation2 + $0x30] sm:$0xe] }
 0x2ca   : > { %v4336_v44 = vrot.slane %v4334_v3, 1  ;;  %v3875_v20 = vshll.u32 %v8901_v58, 16  ;;  %v3882_v6 = vshll.u32 %v10780_v55, 16  ;;  %v11163_v40 = vld [vmem:[#allocation2 + $0x44] ss:$0 sps:$4 sm:$0x11]  }
 0x2cb   : > { %5501 = vmatmul.mubr.bf16.gmra.mrb[196].mxu0 %v3676_v21  ;;  %v4315_v21 = vshll.u32 %v8894_v42, 16  ;;  %v3156_v42 = vld [vmem:[#allocation2 + $0x24] sm:$0xe]  ;;  %v4330_v47 = vsel %vm572_vm0, %v4325_v23, %v4329_v34 }
 0x2cc   : > { %5508 = vmatprep.mubr.bf16.mxu0 %v11088_v31  ;;  %5348 = vmatmul.mubr.bf16.gmra.mrb[200].mxu1 %v11044_v50  ;;  %v11100_v50 = vcombine.low %v3136_v25, %v3137_v26  ;;  %v8904_v26 = vld [vmem:[#allocation3 + $0x208] sm:$0xff]   ;;  %v3877_v58 = vrot.slane %v3875_v20, 1  ;;  %v3894_v20 = vshll.u32 %v10833_v13, 16 }
 0x2cd   : > { %5355 = vmatprep.mubr.bf16.mxu1 %v3570_v32  ;;  %v4103_v32 = vrot.slane %v8896_v48, 1  ;;  %v4317_v8 = vrot.slane %v4315_v21, 1  ;;  %v3870_v21 = vshll.u32 %v10729_v41, 16 }
 0x2cf   : > { %v4318_v12 = vsel %vm572_vm0, %v4313_v15, %v4317_v8  ;;  %v11134_v15 = vld [vmem:[#allocation2 + $0x40] sm:$0xf]  ;;  %v11146_v8 = vadd.f32 %v11048_v4, %v11046_v36  ;;  %v3872_v59 = vrot.slane %v3870_v21, 1  ;;  %v4339_v36 = vshll.u32 %v11132_v63, 16 }
 0x2d0   : > { %v11155_v4 = vld [vmem:[#allocation2 + $0x38] ss:$0 sps:$4 sm:$0x11]  }
 0x2d1   : > { %v4341_v23 = vrot.slane %v4339_v36, 1  ;;  %v4109_v21 = vrot.slane %v11155_v4, 1 }
 0x2d3   : > { %5509 = vmatmul.mubr.bf16.gmra.mrb[200].mxu0 %v3679_v30  ;;  %v8976_v30 = vld [vmem:[#allocation2 + $0x28] sm:$0xf] }
 0x2d4   : > { %5516 = vmatprep.mubr.bf16.mxu0 %v11100_v50  ;;  %5356 = vmatmul.mubr.bf16.gmra.mrb[204].mxu1 %v11069_v18  ;;  %v4102_v18 = vrot.slane %v7255_v10, 1  ;;  %v7256_v56 = vcombine.low %v3156_v42, %v8976_v30  ;;  %v3863_v10 = vshll.u32 %v8896_v48, 16  ;;  %v8909_v48 = vld [vmem:[%s12033_s3 + $0x8] sm:$0xff]   ;;  %v8918_v42 = vld [vmem:[%s12033_s3 + $0x10] sm:$0xff]   ;;  %v4337_v30 = vor.u32 %v4336_v44, %v4332_v39 }
 0x2d5   : > { %5557 = vmatprep.mubr.bf16.mxu1 %v4101_v0  ;;  %v8913_v0 = vld [vmem:[#allocation3 + $0x210] sm:$0xff]  }
 0x2d6   : > { %v4104_v25 = vsel %vm781_vm4, %v4102_v18, %v4103_v32  ;;  %v4105_v45 = vrot.slane %v7256_v56, 1  ;;  %v3865_v19 = vrot.slane %v3863_v10, 1  ;;  %v11142_v18 = vcombine.low %v3177_v1, %v11134_v15  ;;  %v8922_v32 = vld [vmem:[#allocation3 + $0x218] sm:$0xff]   ;;  %v11165_v10 = vld [vmem:[#allocation2 + $0x4c] sm:$0xf] }
 0x2d7   : > { %v3884_v1 = vrot.slane %v3882_v6, 1  ;;  %v11190_v6 = vld [vmem:[#allocation2 + $0x50] ss:$0 sps:$4 sm:$0x11]  }
 0x2d8   : > { %v4346_v56 = vshll.u32 %v11142_v18, 16 }
 0x2da   : > { %v4348_v34 = vrot.slane %v4346_v56, 1 }
 0x2db   : > { %5517 = vmatmul.mubr.bf16.gmra.mrb[204].mxu0 %v3682_v53  ;;  %v8978_v53 = vld [vmem:[%s12033_s3] sm:$0xff]  }
 0x2dc   : > { %5718 = vmatprep.mubr.bf16.mxu0 %v4318_v12  ;;  %5558 = vmatmul.mubr.bf16.vlgmr.msra.gmra.mrb[208].mxu1 %v3854_v51  ;;  %v4107_v51 = vsel %vm781_vm4, %v4105_v45, %v4106_v60  ;;  %v8940_v60 = vld [vmem:[#allocation3 + $0x228] sm:$0xff]  }
 0x2dd   : > { %5565 = vmatprep.mubr.bf16.mxu1 %v4104_v25  ;;  %8473 = vmatpush3.bf16.msra.mxu1 %v8977_v24  ;;  %v3868_v25 = vshrl.u32 %v10729_v41, 16  ;;  %v8931_v24 = vld [vmem:[#allocation3 + $0x220] sm:$0xff]   ;;  %v8927_v41 = vld [vmem:[%s12033_s3 + $0x18] sm:$0xff]  }
 0x2de   : > { %8474 = vmatprep.subr.bf16.mxu1 %v8904_v26 }
 0x2df   : > { %v3873_v16 = vor.u32 %v3872_v59, %v3868_v25  ;;  %v3880_v59 = vshrl.u32 %v10780_v55, 16  ;;  %v2506_v25 = vld [vmem:[#allocation2 + $0xd4] sm:$0x1] }
 0x2e1   : > { %8475 = vmatpush3.bf16.msra.mxu1 %v8904_v26  ;;  %v8979_v26 = vld [vmem:[#allocation2 + $0x34] sm:$0xf]  ;;  %v3885_v56 = vor.u32 %v3884_v1, %v3880_v59  ;;  %v4573_v1 = vrot.slane %v11163_v40, 1  ;;  %v3221_v59 = vld [vmem:[#allocation2 + $0x30] sm:$0xe] }
 0x2e2   : > { %8476 = vmatprep.subr.bf16.mxu1 %v8913_v0  ;;  %v7257_v12 = vcombine.low %v3157_v5, %v8979_v26  ;;  %v4351_v5 = vshll.u32 %v11163_v40, 16  ;;  %v3887_v26 = vshll.u32 %v11155_v4, 16  ;;  %v8954_v40 = vld [vmem:[%s12033_s3 + $0x30] sm:$0xff]  }
 0x2e3   : > { %5719 = vmatmul.mubr.bf16.vlgmr.msra.gmra.mrb[208].mxu0 %v11091_v46  ;;  %v3866_v46 = vsel %vm572_vm0, %v3861_v35, %v3865_v19  ;;  %v4342_v35 = vsel %vm572_vm0, %v4337_v30, %v4341_v23  ;;  %v3878_v19 = vsel %vm572_vm0, %v3873_v16, %v3877_v58  ;;  %v11192_v16 = vld [vmem:[#allocation2 + $0x58] sm:$0xf]  ;;  %v3186_v58 = vld [vmem:[#allocation2 + $0x70] sm:$0xf] }
 0x2e4   : > { %5726 = vmatprep.mubr.bf16.mxu0 %v4330_v47  ;;  %8521 = vmatpush3.bf16.msra.mxu0 %v8978_v53  ;;  %v4108_v3 = vrot.slane %v7257_v12, 1  ;;  %v8980_v47 = vld [vmem:[#allocation2 + $0x40] sm:$0xf]  ;;  %v11180_v53 = vld [vmem:[#allocation2 + $0x44] ss:$0 sps:$4 sm:$0x11]  }
 0x2e5   : > { %5566 = vmatmul.mubr.bf16.gmra.mrb[212].mxu1 %v3866_v46  ;;  %8522 = vmatprep.subr.bf16.mxu0 %v8909_v48  ;;  %v8936_v46 = vld [vmem:[%s12033_s3 + $0x20] sm:$0xff]   ;;  %v2450_v12 = vld [vmem:[#allocation2 + $0xcc] sm:$0x1]  ;;  %v4353_v55 = vrot.slane %v4351_v5, 1  ;;  %v8945_v23 = vld [vmem:[%s12033_s3 + $0x28] sm:$0xff]   ;;  %v4363_v5 = vshll.u32 %v11190_v6, 16 }
 0x2e6   : > { %5573 = vmatprep.mubr.bf16.mxu1 %v4107_v51  ;;  %8477 = vmatpush3.bf16.msra.mxu1 %v8913_v0  ;;  %v3179_v0 = vld [vmem:[#allocation2 + $0x48] sm:$0xf]  ;;  %v3222_v51 = vld [vmem:[#allocation2 + $0x3c] sm:$0xe] }
 0x2e7   : > { %8478 = vmatprep.subr.bf16.mxu1 %v8922_v32  ;;  %v11174_v45 = vcombine.low %v3179_v0, %v11165_v10  ;;  %v7305_v30 = vcombine.low %v3222_v51, %v11134_v15  ;;  %v3181_v15 = vld [vmem:[#allocation2 + $0x54] sm:$0xf]  ;;  %v2507_v0 = vsel %vm10137_vm9, 0, %v2506_v25  ;;  %v3906_v51 = vshll.u32 %v10897_v22, 16 }
 0x2e8   : > { %8523 = vmatpush3.bf16.msra.mxu0 %v8909_v48  ;;  %v3158_v48 = vld [vmem:[#allocation2 + $0x3c] sm:$0xe]  ;;  %2508 = vst [vmem:[#allocation2 + $0xd4] sm:$0x1] %v2507_v0 }
 0x2e9   : > { %8524 = vmatprep.subr.bf16.mxu0 %v8918_v42  ;;  %v7258_v44 = vcombine.low %v3158_v48, %v8980_v47  ;;  %v4358_v36 = vshll.u32 %v11174_v45, 16  ;;  %v11205_v48 = vcombine.low %v3181_v15, %v11192_v16  ;;  %v4572_v49 = vrot.slane %v7305_v30, 1  ;;  %v8916_v25 = vld [vmem:[#allocation2 + $0x5c] ss:$0 sps:$4 sm:$0x11]  }
 0x2ea   : > { %8479 = vmatpush3.bf16.msra.mxu1 %v8922_v32  ;;  %v4110_v32 = vsel %vm781_vm4, %v4108_v3, %v4109_v21  ;;  %v2451_v3 = vsel %vm10130_vm7, 0, %v2450_v12  ;;  %v3889_v21 = vrot.slane %v3887_v26, 1  ;;  %v3896_v47 = vrot.slane %v3894_v20, 1  ;;  %v3224_v12 = vld [vmem:[#allocation2 + $0x54] sm:$0xe] }
 0x2eb   : > { %5727 = vmatmul.mubr.bf16.gmra.mrb[212].mxu0 %v11104_v28  ;;  %8480 = vmatprep.subr.bf16.mxu1 %v8931_v24  ;;  %v4344_v28 = vshrl.u32 %v11142_v18, 16  ;;  %v4111_v4 = vrot.slane %v7258_v44, 1  ;;  %2452 = vst [vmem:[#allocation2 + $0xcc] sm:$0x1] %v2451_v3  ;;  %v3892_v26 = vshrl.u32 %v10833_v13, 16  ;;  %v4370_v20 = vshll.u32 %v11205_v48, 16 }
 0x2ec   : > { %5734 = vmatprep.mubr.bf16.mxu0 %v4342_v35  ;;  %8525 = vmatpush3.bf16.msra.mxu0 %v8918_v42  ;;  %v8949_v42 = vld [vmem:[#allocation3 + $0x230] sm:$0xff]   ;;  %v11209_v44 = vld [vmem:[#allocation2 + $0x50] ss:$0 sps:$4 sm:$0x11]   ;;  %v4570_v30 = vrot.slane %v11132_v63, 1 }
 0x2ed   : > { %5574 = vmatmul.mubr.bf16.gmra.mrb[216].mxu1 %v3878_v19  ;;  %8526 = vmatprep.subr.bf16.mxu0 %v8927_v41  ;;  %v4349_v39 = vor.u32 %v4348_v34, %v4344_v28  ;;  %v4360_v34 = vrot.slane %v4358_v36, 1  ;;  %v8958_v19 = vld [vmem:[#allocation3 + $0x238] sm:$0xff]   ;;  %v4356_v28 = vshrl.u32 %v11174_v45, 16  ;;  %v3183_v13 = vld [vmem:[#allocation2 + $0x60] sm:$0xf]  ;;  %v4115_v3 = vrot.slane %v11209_v44, 1 }
 0x2ee   : > { %5581 = vmatprep.mubr.bf16.mxu1 %v4110_v32  ;;  %8481 = vmatpush3.bf16.msra.mxu1 %v8931_v24  ;;  %v4112_v24 = vrot.slane %v11180_v53, 1  ;;  %v8960_v63 = vld [vmem:[%s12033_s3 + $0x38] sm:$0xff]  }
 0x2ef   : > { %8482 = vmatprep.subr.bf16.mxu1 %v8940_v60  ;;  %v4354_v35 = vsel %vm572_vm0, %v4349_v39, %v4353_v55  ;;  %v3160_v39 = vld [vmem:[#allocation2 + $0x54] sm:$0xe]  ;;  %v4361_v36 = vor.u32 %v4360_v34, %v4356_v28  ;;  %v7307_v55 = vcombine.low %v3224_v12, %v11192_v16  ;;  %v4375_v34 = vshll.u32 %v8916_v25, 16  ;;  %v8921_v12 = vld [vmem:[#allocation2 + $0x68] ss:$0 sps:$4 sm:$0x11]  }
 0x2f0   : > { %8527 = vmatpush3.bf16.msra.mxu0 %v8927_v41  ;;  %v3159_v41 = vld [vmem:[#allocation2 + $0x48] sm:$0xe]  ;;  %v4113_v32 = vsel %vm781_vm4, %v4111_v4, %v4112_v24  ;;  %v11225_v4 = vld [vmem:[#allocation2 + $0x64] sm:$0xf]  ;;  %v7260_v16 = vcombine.low %v3160_v39, %v10918_v61  ;;  %v11246_v61 = vld [vmem:[#allocation2 + $0x60] sm:$0xe] }
 0x2f1   : > { %8528 = vmatprep.subr.bf16.mxu0 %v8936_v46  ;;  %v4368_v28 = vshrl.u32 %v11205_v48, 16 }
 0x2f2   : > { %8483 = vmatpush3.bf16.msra.mxu1 %v8940_v60  ;;  %v3890_v60 = vsel %vm572_vm0, %v3885_v56, %v3889_v21  ;;  %v3897_v56 = vor.u32 %v3896_v47, %v3892_v26  ;;  %v3223_v21 = vld [vmem:[#allocation2 + $0x48] sm:$0xe]  ;;  %v4579_v47 = vrot.slane %v8916_v25, 1  ;;  %v3904_v26 = vshrl.u32 %v10897_v22, 16 }
 0x2f3   : > { %5735 = vmatmul.mubr.bf16.gmra.mrb[216].mxu0 %v11120_v57  ;;  %8484 = vmatprep.subr.bf16.mxu1 %v8949_v42  ;;  %v7259_v57 = vcombine.low %v3159_v41, %v10886_v37  ;;  %v7304_v37 = vcombine.low %v3221_v59, %v11114_v33  ;;  %v11228_v33 = vsel %vm781_vm4, %v4572_v49, %v4573_v1  ;;  %v11241_v49 = vld [vmem:[#allocation2 + $0x5c] ss:$0 sps:$4 sm:$0x11]   ;;  %v4576_v25 = vrot.slane %v11190_v6, 1 }
 0x2f4   : > { %5742 = vmatprep.mubr.bf16.mxu0 %v4354_v35  ;;  %8529 = vmatpush3.bf16.msra.mxu0 %v8936_v46  ;;  %v3899_v46 = vshll.u32 %v11180_v53, 16  ;;  %v7306_v0 = vcombine.low %v3223_v21, %v11165_v10  ;;  %v4372_v35 = vrot.slane %v4370_v20, 1  ;;  %v11244_v1 = vcombine.low %v3183_v13, %v11225_v4  ;;  %v3226_v10 = vld [vmem:[#allocation2 + $0x6c] sm:$0xe]  ;;  %v3228_v13 = vld [vmem:[#allocation2 + $0x84] sm:$0xe] }
 0x2f5   : > { %5582 = vmatmul.mubr.bf16.gmra.mrb[220].mxu1 %v3890_v60  ;;  %8530 = vmatprep.subr.bf16.mxu0 %v8945_v23  ;;  %v4569_v53 = vrot.slane %v7304_v37, 1  ;;  %v4114_v24 = vrot.slane %v7259_v57, 1  ;;  %v4578_v60 = vrot.slane %v7307_v55, 1  ;;  %v3908_v57 = vrot.slane %v3906_v51, 1  ;;  %v3185_v55 = vld [vmem:[#allocation2 + $0x6c] sm:$0xf] }
 0x2f6   : > { %5589 = vmatprep.mubr.bf16.mxu1 %v4113_v32  ;;  %8485 = vmatpush3.bf16.msra.mxu1 %v8949_v42  ;;  %v4365_v42 = vrot.slane %v4363_v5, 1  ;;  %v3901_v15 = vrot.slane %v3899_v46, 1  ;;  %v11252_v5 = vld [vmem:[#allocation2 + $0x74] ss:$0 sps:$4 sm:$0x11]   ;;  %v7309_v59 = vcombine.low %v3226_v10, %v3186_v58  ;;  %v3911_v46 = vshll.u32 %v11209_v44, 16 }
 0x2f7   : > { %8486 = vmatprep.subr.bf16.mxu1 %v8958_v19  ;;  %v4116_v32 = vsel %vm781_vm4, %v4114_v24, %v4115_v3  ;;  %v4575_v37 = vrot.slane %v7306_v0, 1  ;;  %v4373_v51 = vor.u32 %v4372_v35, %v4368_v28  ;;  %v4382_v39 = vshll.u32 %v11244_v1, 16  ;;  %v11285_v10 = vld [vmem:[#allocation2 + $0x80] ss:$0 sps:$4 sm:$0x11]  }
 0x2f8   : > { %8531 = vmatpush3.bf16.msra.mxu0 %v8945_v23  ;;  %v11236_v23 = vsel %vm781_vm4, %v4569_v53, %v4570_v30  ;;  %v4366_v41 = vsel %vm572_vm0, %v4361_v36, %v4365_v42  ;;  %v11259_v36 = vld [vmem:[#allocation2 + $0x88] sm:$0xf]  ;;  %v4377_v20 = vrot.slane %v4375_v34, 1  ;;  %v3909_v30 = vor.u32 %v3908_v57, %v3904_v26  ;;  %v11267_v42 = vld [vmem:[#allocation2 + $0x8c] ss:$0 sps:$4 sm:$0x11]  }
 0x2f9   : > { %8532 = vmatprep.subr.bf16.mxu0 %v8954_v40  ;;  %v11263_v22 = vsel %vm781_vm4, %v4578_v60, %v4579_v47  ;;  %v4118_v44 = vrot.slane %v11241_v49, 1  ;;  %v4584_v53 = vrot.slane %v7309_v59, 1  ;;  %v11270_v24 = vsel %vm781_vm4, %v4575_v37, %v4576_v25  ;;  %v11281_v60 = vld [vmem:[#allocation2 + $0x68] ss:$0 sps:$4 sm:$0x11]  }
 0x2fa   : > { %8487 = vmatpush3.bf16.msra.mxu1 %v8958_v19  ;;  %v3902_v19 = vsel %vm572_vm0, %v3897_v56, %v3901_v15  ;;  %v4117_v56 = vrot.slane %v7260_v16, 1  ;;  %v3913_v6 = vrot.slane %v3911_v46, 1  ;;  %v4387_v3 = vshll.u32 %v8921_v12, 16  ;;  %v3225_v15 = vld [vmem:[#allocation2 + $0x60] sm:$0xe] }
 0x2fb   : > { %5743 = vmatmul.mubr.bf16.gmra.mrb[220].mxu0 %v11142_v18  ;;  %v3918_v18 = vshll.u32 %v10927_v9, 16  ;;  %v7311_v16 = vcombine.low %v3228_v13, %v11259_v36  ;;  %v4384_v0 = vrot.slane %v4382_v39, 1  ;;  %v7308_v35 = vcombine.low %v3225_v15, %v11225_v4  ;;  %v11291_v28 = vld [vmem:[#allocation2 + $0xa0] sm:$0xf]  ;;  %v3162_v26 = vld [vmem:[#allocation2 + $0x6c] sm:$0xe] }
 0x2fc   : > { %5750 = vmatprep.mubr.bf16.mxu0 %v4366_v41  ;;  %8533 = vmatpush3.bf16.msra.mxu0 %v8954_v40  ;;  %v7261_v40 = vcombine.low %v11246_v61, %v10942_v29  ;;  %v4585_v29 = vrot.slane %v11252_v5, 1  ;;  %v11275_v41 = vcombine.low %v3185_v55, %v3186_v58  ;;  %v3914_v34 = vsel %vm572_vm0, %v3909_v30, %v3913_v6  ;;  %v3230_v37 = vld [vmem:[#allocation2 + $0x9c] sm:$0xe]  ;;  %v3227_v55 = vld [vmem:[#allocation2 + $0x78] sm:$0xe] }
 0x2fd   : > { %5590 = vmatmul.mubr.bf16.gmra.mrb[224].mxu1 %v3902_v19  ;;  %8534 = vmatprep.subr.bf16.mxu0 %v8960_v63  ;;  %v3920_v21 = vrot.slane %v3918_v18, 1  ;;  %v3916_v61 = vshrl.u32 %v10927_v9, 16  ;;  %v3923_v19 = vshll.u32 %v11241_v49, 16  ;;  %v4582_v47 = vrot.slane %v8921_v12, 1 }
 0x2fe   : > { %5597 = vmatprep.mubr.bf16.mxu1 %v4116_v32  ;;  %v4380_v57 = vshrl.u32 %v11244_v1, 16  ;;  %v4581_v58 = vrot.slane %v7308_v35, 1  ;;  %v11288_v4 = vsel %vm781_vm4, %v4584_v53, %v4585_v29  ;;  %v3188_v32 = vld [vmem:[#allocation2 + $0x7c] sm:$0xf]  ;;  %v4590_v9 = vrot.slane %v7311_v16, 1 }
 0x2ff   : > { %v3921_v18 = vor.u32 %v3920_v21, %v3916_v61  ;;  %v4591_v49 = vrot.slane %v11267_v42, 1  ;;  %v3930_v59 = vshll.u32 %v10949_v14, 16  ;;  %v4394_v12 = vshll.u32 %v11275_v41, 16  ;;  %v11313_v61 = vld [vmem:[#allocation2 + $0x74] ss:$0 sps:$4 sm:$0x11]  }
 0x300   : > { %8535 = vmatpush3.bf16.msra.mxu0 %v8960_v63  ;;  %v4378_v63 = vsel %vm572_vm0, %v4373_v51, %v4377_v20  ;;  %v4385_v46 = vor.u32 %v4384_v0, %v4380_v57  ;;  %v11296_v51 = vsel %vm781_vm4, %v4581_v58, %v4582_v47  ;;  %v7262_v39 = vcombine.low %v3162_v26, %v10962_v2  ;;  %v3187_v2 = vld [vmem:[#allocation2 + $0x78] sm:$0xf] }
 0x301   : > { %v3925_v25 = vrot.slane %v3923_v19, 1  ;;  %v4120_v20 = vrot.slane %v7261_v40, 1  ;;  %v4121_v30 = vrot.slane %v11281_v60, 1  ;;  %v4389_v13 = vrot.slane %v4387_v3, 1 }
 0x302   : > { %v7313_v53 = vcombine.low %v3230_v37, %v11291_v28  ;;  %v7310_v6 = vcombine.low %v3227_v55, %v3188_v32  ;;  %v4588_v21 = vrot.slane %v11285_v10, 1  ;;  %v4399_v15 = vshll.u32 %v11252_v5, 16 }
 0x303   : > { %5751 = vmatmul.mubr.bf16.gmra.mrb[224].mxu0 %v11174_v45  ;;  %v4119_v45 = vsel %vm781_vm4, %v4117_v56, %v4118_v44  ;;  %v11300_v44 = vld [vmem:[#allocation2 + $0xa4] ss:$0 sps:$4 sm:$0x11]   ;;  %v3926_v16 = vsel %vm572_vm0, %v3921_v18, %v3925_v25  ;;  %v11309_v35 = vsel %vm781_vm4, %v4590_v9, %v4591_v49  ;;  %v4390_v3 = vsel %vm572_vm0, %v4385_v46, %v4389_v13  ;;  %v11320_v18 = vld [vmem:[#allocation2 + $0x98] ss:$0 sps:$4 sm:$0x11]  }
 0x304   : > { %5758 = vmatprep.mubr.bf16.mxu0 %v4378_v63  ;;  %v11306_v63 = vld [vmem:[#allocation2 + $0x94] sm:$0xf]  ;;  %v11315_v19 = vcombine.low %v3187_v2, %v3188_v32  ;;  %v4587_v5 = vrot.slane %v7310_v6, 1  ;;  %v4122_v57 = vsel %vm781_vm4, %v4120_v20, %v4121_v30  ;;  %v3932_v58 = vrot.slane %v3930_v59, 1  ;;  %v3229_v30 = vld [vmem:[#allocation2 + $0x90] sm:$0xe] }
 0x305   : > { %5598 = vmatmul.mubr.bf16.gmra.mrb[228].mxu1 %v3914_v34  ;;  %v4396_v34 = vrot.slane %v4394_v12, 1  ;;  %v3232_v49 = vld [vmem:[#allocation2 + $0xb4] sm:$0xe]  ;;  %v4392_v26 = vshrl.u32 %v11275_v41, 16  ;;  %v4596_v32 = vrot.slane %v7313_v53, 1  ;;  %v4597_v46 = vrot.slane %v11300_v44, 1 }
 0x306   : > { %5605 = vmatprep.mubr.bf16.mxu1 %v4119_v45  ;;  %v11317_v45 = vld [vmem:[#allocation2 + $0xb8] sm:$0xf]  ;;  %v11327_v12 = vld [vmem:[#allocation2 + $0xbc] ss:$0 sps:$4 sm:$0x11]   ;;  %v11330_v37 = vsel %vm781_vm4, %v4587_v5, %v4588_v21  ;;  %v3928_v59 = vshrl.u32 %v10949_v14, 16  ;;  %v7312_v53 = vcombine.low %v3229_v30, %v11306_v63 }
 0x307   : > { %v3935_v25 = vshll.u32 %v11281_v60, 16  ;;  %v7315_v20 = vcombine.low %v3232_v49, %v11317_v45  ;;  %v4397_v55 = vor.u32 %v4396_v34, %v4392_v26  ;;  %v4406_v13 = vshll.u32 %v11315_v19, 16  ;;  %v11341_v14 = vld [vmem:[#allocation2 + $0xb0] ss:$0 sps:$4 sm:$0x11]  }
 0x308   : > { %v4401_v6 = vrot.slane %v4399_v15, 1  ;;  %v3933_v21 = vor.u32 %v3932_v58, %v3928_v59  ;;  %v4594_v60 = vrot.slane %v11320_v18, 1  ;;  %v4124_v2 = vrot.slane %v11313_v61, 1  ;;  %v11349_v5 = vld [vmem:[#allocation2 + $0xac] sm:$0xf] }
 0x309   : > { %v4602_v15 = vrot.slane %v7315_v20, 1  ;;  %v11359_v26 = vld [vmem:[#allocation2 + $0xd0] sm:$0xf]  ;;  %v11369_v30 = vld [vmem:[#allocation2 + $0xc4] sm:$0xf] }
 0x30a   : > { %v8056_v56 = vpop.f32.mrb[144].mxu0  ;;  %v4402_v58 = vsel %vm572_vm0, %v4397_v55, %v4401_v6  ;;  %v4600_v55 = vrot.slane %v11341_v14, 1 }
 0x30b   : > { %v8057_v29 = vpop.f32.mrb[145].mxu0  ;;  %5759 = vmatmul.mubr.bf16.gmra.mrb[228].mxu0 %v11205_v48 }
 0x30c   : > { %v8058_v40 = vadd.f32 %v8057_v29, %v8056_v56  ;;  %v8059_v0 = vpop.f32.mrb[146].mxu0  ;;  %5766 = vmatprep.mubr.bf16.mxu0 %v4390_v3  ;;  %v3163_v56 = vld [vmem:[#allocation2 + $0x78] sm:$0xe]  ;;  %v3942_v29 = vshll.u32 %v10969_v17, 16  ;;  %v11346_v3 = vsel %vm781_vm4, %v4596_v32, %v4597_v46  ;;  %v4411_v46 = vshll.u32 %v11285_v10, 16 }
 0x30d   : > { %v8060_v47 = vpop.f32.mrb[147].mxu0  ;;  %5606 = vmatmul.mubr.bf16.gmra.mrb[232].mxu1 %v3926_v16  ;;  %v3189_v16 = vld [vmem:[#allocation2 + $0x84] sm:$0xf]  ;;  %v7263_v34 = vcombine.low %v3163_v56, %v10982_v62  ;;  %v3947_v10 = vshll.u32 %v11313_v61, 16 }
 0x30e   : > { %v11323_v9 = vadd.f32 %v8058_v40, %v11129_v27  ;;  %v8061_v48 = vadd.f32 %v8060_v47, %v8059_v0  ;;  %5613 = vmatprep.mubr.bf16.mxu1 %v4122_v57  ;;  %v3234_v40 = vld [vmem:[#allocation2 + $0xcc] sm:$0xe]  ;;  %v4593_v0 = vrot.slane %v7312_v53, 1  ;;  %v3937_v47 = vrot.slane %v3935_v25, 1  ;;  %v3231_v25 = vld [vmem:[#allocation2 + $0xa8] sm:$0xe] }
 0x30f   : > { %v4603_v57 = vrot.slane %v11327_v12, 1  ;;  %v11357_v49 = vcombine.low %v3189_v16, %v11259_v36  ;;  %v3944_v59 = vrot.slane %v3942_v29, 1  ;;  %v4404_v36 = vshrl.u32 %v11315_v19, 16  ;;  %v11375_v53 = vld [vmem:[#allocation2 + $0xd4] ss:$0 sps:$4 sm:$0x11]  }
 0x310   : > { %v11335_v27 = vadd.f32 %v8061_v48, %v11146_v8  ;;  %v4123_v8 = vrot.slane %v7262_v39, 1  ;;  %v4408_v39 = vrot.slane %v4406_v13, 1  ;;  %v11354_v48 = vld [vmem:[#allocation2 + $0x80] ss:$0 sps:$4 sm:$0x11]   ;;  %v11362_v62 = vsel %vm781_vm4, %v4593_v0, %v4594_v60 }
 0x311   : > { %v3938_v32 = vsel %vm572_vm0, %v3933_v21, %v3937_v47  ;;  %v7314_v56 = vcombine.low %v3231_v25, %v11349_v5  ;;  %v3940_v13 = vshrl.u32 %v10969_v17, 16  ;;  %v11378_v29 = vsel %vm781_vm4, %v4602_v15, %v4603_v57  ;;  %v11381_v16 = vld [vmem:[#allocation2 + $0xc8] ss:$0 sps:$4 sm:$0x11]   ;;  %v3233_v57 = vld [vmem:[#allocation2 + $0xc0] sm:$0xe] }
 0x312   : > { %v4125_v20 = vsel %vm781_vm4, %v4123_v8, %v4124_v2  ;;  %v4409_v6 = vor.u32 %v4408_v39, %v4404_v36  ;;  %v4418_v21 = vshll.u32 %v11357_v49, 16  ;;  %v3954_v8 = vshll.u32 %v10989_v54, 16 }
 0x313   : > { %5767 = vmatmul.mubr.bf16.gmra.mrb[232].mxu0 %v11244_v1  ;;  %v7317_v1 = vcombine.low %v3234_v40, %v11359_v26  ;;  %v4599_v60 = vrot.slane %v7314_v56, 1  ;;  %v3945_v2 = vor.u32 %v3944_v59, %v3940_v13  ;;  %v3191_v40 = vld [vmem:[#allocation2 + $0x90] sm:$0xf]  ;;  %v4609_v17 = vrot.slane %v11375_v53, 1 }
 0x314   : > { %5774 = vmatprep.mubr.bf16.mxu0 %v4402_v58  ;;  %v4413_v47 = vrot.slane %v4411_v46, 1  ;;  %v4126_v61 = vrot.slane %v7263_v34, 1  ;;  %v4127_v58 = vrot.slane %v11354_v48, 1  ;;  %v3949_v39 = vrot.slane %v3947_v10, 1  ;;  %v3164_v34 = vld [vmem:[#allocation2 + $0x84] sm:$0xe] }
 0x315   : > { %5614 = vmatmul.mubr.bf16.gmra.mrb[236].mxu1 %v3938_v32  ;;  %v4608_v0 = vrot.slane %v7317_v1, 1  ;;  %v11387_v15 = vsel %vm781_vm4, %v4599_v60, %v4600_v55  ;;  %v11390_v32 = vcombine.low %v3191_v40, %v11306_v63  ;;  %v7316_v25 = vcombine.low %v3233_v57, %v11369_v30  ;;  %v8981_v63 = vld [vmem:[#allocation2 + $0x88] sm:$0xf] }
 0x316   : > { %5621 = vmatprep.mubr.bf16.mxu1 %v4125_v20  ;;  %v4414_v59 = vsel %vm572_vm0, %v4409_v6, %v4413_v47  ;;  %v4420_v1 = vrot.slane %v4418_v21, 1  ;;  %v4606_v46 = vrot.slane %v11381_v16, 1  ;;  %v3950_v20 = vsel %vm572_vm0, %v3945_v2, %v3949_v39  ;;  %v8937_v21 = vld [vmem:[#allocation2 + $0x8c] ss:$0 sps:$4 sm:$0x11]  }
 0x317   : > { %v3956_v36 = vrot.slane %v3954_v8, 1  ;;  %v4605_v56 = vrot.slane %v7316_v25, 1  ;;  %v11398_v55 = vsel %vm781_vm4, %v4608_v0, %v4609_v17  ;;  %v7264_v13 = vcombine.low %v3164_v34, %v8981_v63  ;;  %v3165_v63 = vld [vmem:[#allocation2 + $0x90] sm:$0xe] }
 0x318   : > { %v4128_v10 = vsel %vm781_vm4, %v4126_v61, %v4127_v58  ;;  %v4423_v6 = vshll.u32 %v11267_v42, 16  ;;  %v3952_v60 = vshrl.u32 %v10989_v54, 16  ;;  %v3959_v2 = vshll.u32 %v11354_v48, 16 }
 0x319   : > { %v4430_v8 = vshll.u32 %v11390_v32, 16  ;;  %v11407_v40 = vsel %vm781_vm4, %v4605_v56, %v4606_v46  ;;  %v3966_v47 = vshll.u32 %v11007_v52, 16  ;;  %v4129_v39 = vrot.slane %v7264_v13, 1 }
 0x31a   : > { %v3957_v61 = vor.u32 %v3956_v36, %v3952_v60  ;;  %v4425_v57 = vrot.slane %v4423_v6, 1  ;;  %v4130_v42 = vrot.slane %v8937_v21, 1  ;;  %v3961_v34 = vrot.slane %v3959_v2, 1  ;;  %v8982_v6 = vld [vmem:[#allocation2 + $0x94] sm:$0xf] }
 0x31b   : > { %5775 = vmatmul.mubr.bf16.gmra.mrb[236].mxu0 %v11275_v41  ;;  %v4416_v41 = vshrl.u32 %v11357_v49, 16  ;;  %v4432_v54 = vrot.slane %v4430_v8, 1  ;;  %v4428_v13 = vshrl.u32 %v11390_v32, 16  ;;  %v7265_v60 = vcombine.low %v3165_v63, %v8982_v6  ;;  %v8941_v2 = vld [vmem:[#allocation2 + $0x98] ss:$0 sps:$4 sm:$0x11]  }
 0x31c   : > { %5782 = vmatprep.mubr.bf16.mxu0 %v4414_v59  ;;  %v3962_v36 = vsel %vm572_vm0, %v3957_v61, %v3961_v34  ;;  %v3978_v61 = vshll.u32 %v11028_v43, 16  ;;  %v3195_v63 = vld [vmem:[#allocation2 + $0xa8] sm:$0xf] }
 0x31d   : > { %5622 = vmatmul.mubr.bf16.gmra.mrb[240].mxu1 %v3950_v20  ;;  %v4421_v0 = vor.u32 %v4420_v1, %v4416_v41  ;;  %v3193_v20 = vld [vmem:[#allocation2 + $0x9c] sm:$0xf]  ;;  %v3968_v41 = vrot.slane %v3966_v47, 1  ;;  %v4433_v8 = vor.u32 %v4432_v54, %v4428_v13  ;;  %v4132_v34 = vrot.slane %v7265_v60, 1 }
 0x31e   : > { %5629 = vmatprep.mubr.bf16.mxu1 %v4128_v10  ;;  %v11413_v1 = vcombine.low %v3193_v20, %v11291_v28  ;;  %v4435_v10 = vshll.u32 %v11320_v18, 16  ;;  %v3964_v28 = vshrl.u32 %v11007_v52, 16  ;;  %v4133_v20 = vrot.slane %v8941_v2, 1  ;;  %v3166_v13 = vld [vmem:[#allocation2 + $0x9c] sm:$0xe] }
 0x31f   : > { %v4426_v46 = vsel %vm572_vm0, %v4421_v0, %v4425_v57  ;;  %v3971_v0 = vshll.u32 %v8937_v21, 16 }
 0x320   : > { %v4437_v57 = vrot.slane %v4435_v10, 1  ;;  %v11425_v10 = vcombine.low %v3195_v63, %v11349_v5  ;;  %v8946_v5 = vld [vmem:[#allocation2 + $0xa4] ss:$0 sps:$4 sm:$0x11]   ;;  %v3197_v63 = vld [vmem:[#allocation2 + $0xb4] sm:$0xf] }
 0x321   : > { %v7950_v17 = vpop.f32.mrb[148].mxu1  ;;  %v3973_v54 = vrot.slane %v3971_v0, 1  ;;  %v3980_v0 = vrot.slane %v3978_v61, 1  ;;  %v3990_v61 = vshll.u32 %v11060_v7, 16 }
 0x322   : > { %v7951_v58 = vpop.f32.mrb[149].mxu1 }
 0x323   : > { %v7952_v25 = vadd.f32 %v7951_v58, %v7950_v17  ;;  %v7953_v59 = vpop.f32.mrb[150].mxu1  ;;  %5783 = vmatmul.mubr.bf16.gmra.mrb[240].mxu0 %v11315_v19  ;;  %v4131_v19 = vsel %vm781_vm4, %v4129_v39, %v4130_v42  ;;  %v4442_v17 = vshll.u32 %v11413_v1, 16  ;;  %v4438_v42 = vsel %vm572_vm0, %v4433_v8, %v4437_v57 }
 0x324   : > { %v7954_v48 = vpop.f32.mrb[151].mxu1  ;;  %5790 = vmatprep.mubr.bf16.mxu0 %v4426_v46 }
 0x325   : > { %v7955_v56 = vadd.f32 %v7954_v48, %v7953_v59  ;;  %5630 = vmatmul.mubr.bf16.gmra.mrb[244].mxu1 %v3962_v36  ;;  %v3969_v59 = vor.u32 %v3968_v41, %v3964_v28  ;;  %v4444_v6 = vrot.slane %v4442_v17, 1  ;;  %v8983_v28 = vld [vmem:[#allocation2 + $0xa0] sm:$0xf]  ;;  %v4447_v17 = vshll.u32 %v11300_v44, 16 }
 0x326   : > { %5637 = vmatprep.mubr.bf16.mxu1 %v4131_v19  ;;  %v3988_v44 = vshrl.u32 %v11060_v7, 16 }
 0x327   : > { %v3974_v8 = vsel %vm572_vm0, %v3969_v59, %v3973_v54 }
 0x329   : > { %v8062_v58 = vpop.f32.mrb[148].mxu0 }
 0x32a   : > { %v8063_v18 = vpop.f32.mrb[149].mxu0  ;;  %v7956_v47 = vpop.f32.mrb[152].mxu1 }
 0x32b   : > { %v8064_v48 = vadd.f32 %v8063_v18, %v8062_v58  ;;  %v8065_v46 = vpop.f32.mrb[150].mxu0  ;;  %v7957_v39 = vpop.f32.mrb[153].mxu1  ;;  %5791 = vmatmul.mubr.bf16.gmra.mrb[244].mxu0 %v11357_v49  ;;  %v7266_v58 = vcombine.low %v3166_v13, %v8983_v28  ;;  %v4134_v18 = vsel %vm781_vm4, %v4132_v34, %v4133_v20  ;;  %v4440_v49 = vshrl.u32 %v11413_v1, 16 }
 0x32c   : > { %v8066_v52 = vpop.f32.mrb[151].mxu0  ;;  %v7958_v21 = vadd.f32 %v7957_v39, %v7956_v47  ;;  %v7959_v36 = vpop.f32.mrb[154].mxu1  ;;  %5798 = vmatprep.mubr.bf16.mxu0 %v4438_v42  ;;  %v4454_v39 = vshll.u32 %v11425_v10, 16  ;;  %v4449_v42 = vrot.slane %v4447_v17, 1  ;;  %v4136_v34 = vrot.slane %v8946_v5, 1 }
 0x32d   : > { %v11427_v41 = vadd.f32 %v8064_v48, %v7952_v25  ;;  %v8067_v60 = vadd.f32 %v8066_v52, %v8065_v46  ;;  %v7960_v19 = vpop.f32.mrb[155].mxu1  ;;  %5638 = vmatmul.mubr.bf16.gmra.mrb[248].mxu1 %v3974_v8  ;;  %v3976_v25 = vshrl.u32 %v11028_v43, 16  ;;  %v3983_v48 = vshll.u32 %v8941_v2, 16 }
 0x32e   : > { %v7961_v57 = vadd.f32 %v7960_v19, %v7959_v36  ;;  %5645 = vmatprep.mubr.bf16.mxu1 %v4134_v18  ;;  %v4445_v46 = vor.u32 %v4444_v6, %v4440_v49  ;;  %v4135_v54 = vrot.slane %v7266_v58, 1  ;;  %v4456_v2 = vrot.slane %v4454_v39, 1  ;;  %v8950_v58 = vld [vmem:[#allocation2 + $0xb0] ss:$0 sps:$4 sm:$0x11]  }
 0x32f   : > { %v11433_v47 = vadd.f32 %v8067_v60, %v7955_v56  ;;  %v3981_v59 = vor.u32 %v3980_v0, %v3976_v25  ;;  %v3985_v20 = vrot.slane %v3983_v48, 1  ;;  %v3167_v56 = vld [vmem:[#allocation2 + $0xa8] sm:$0xe]  ;;  %v11442_v36 = vcombine.low %v3197_v63, %v11317_v45  ;;  %v8984_v60 = vld [vmem:[#allocation2 + $0xac] sm:$0xf] }
 0x330   : > { %v4450_v43 = vsel %vm572_vm0, %v4445_v46, %v4449_v42  ;;  %v3992_v6 = vrot.slane %v3990_v61, 1  ;;  %v7267_v19 = vcombine.low %v3167_v56, %v8984_v60  ;;  %v4002_v18 = vshll.u32 %v11076_v38, 16  ;;  %v3199_v60 = vld [vmem:[#allocation2 + $0xc0] sm:$0xf] }
 0x331   : > { %v3986_v28 = vsel %vm572_vm0, %v3981_v59, %v3985_v20  ;;  %v4452_v49 = vshrl.u32 %v11425_v10, 16  ;;  %v4459_v45 = vshll.u32 %v11341_v14, 16  ;;  %v3995_v48 = vshll.u32 %v8946_v5, 16 }
 0x332   : > { %v4466_v20 = vshll.u32 %v11442_v36, 16  ;;  %v4138_v56 = vrot.slane %v7267_v19, 1  ;;  %v4004_v5 = vrot.slane %v4002_v18, 1  ;;  %v4007_v19 = vshll.u32 %v8950_v58, 16 }
 0x333   : > { %v8068_v52 = vpop.f32.mrb[152].mxu0  ;;  %5799 = vmatmul.mubr.bf16.gmra.mrb[248].mxu0 %v11390_v32  ;;  %v4137_v32 = vsel %vm781_vm4, %v4135_v54, %v4136_v34  ;;  %v4457_v42 = vor.u32 %v4456_v2, %v4452_v49  ;;  %v4461_v14 = vrot.slane %v4459_v45, 1  ;;  %v8955_v49 = vld [vmem:[#allocation2 + $0xbc] ss:$0 sps:$4 sm:$0x11]  }
 0x334   : > { %v8069_v13 = vpop.f32.mrb[153].mxu0  ;;  %5806 = vmatprep.mubr.bf16.mxu0 %v4450_v43  ;;  %v4139_v43 = vrot.slane %v8950_v58, 1  ;;  %v4009_v58 = vrot.slane %v4007_v19, 1  ;;  %v8988_v19 = vld [vmem:[%s9289_s18 + $0x10] sm:$0xf] }
 0x335   : > { %v8070_v8 = vadd.f32 %v8069_v13, %v8068_v52  ;;  %v8071_v0 = vpop.f32.mrb[154].mxu0  ;;  %v7962_v7 = vpop.f32.mrb[156].mxu1  ;;  %5646 = vmatmul.mubr.bf16.gmra.mrb[252].mxu1 %v3986_v28  ;;  %v3993_v52 = vor.u32 %v3992_v6, %v3988_v44  ;;  %v3997_v13 = vrot.slane %v3995_v48, 1  ;;  %v4462_v2 = vsel %vm572_vm0, %v4457_v42, %v4461_v14  ;;  %v3168_v44 = vld [vmem:[#allocation2 + $0xb4] sm:$0xe] }
 0x336   : > { %v8072_v17 = vpop.f32.mrb[155].mxu0  ;;  %v7963_v25 = vpop.f32.mrb[157].mxu1  ;;  %5653 = vmatprep.mubr.bf16.mxu1 %v4137_v32  ;;  %v4468_v28 = vrot.slane %v4466_v20, 1  ;;  %v4140_v18 = vsel %vm781_vm4, %v4138_v56, %v4139_v43  ;;  %v4471_v32 = vshll.u32 %v11327_v12, 16  ;;  %v4012_v48 = vshrl.u32 %v11088_v31, 16 }
 0x337   : > { %v11449_v46 = vadd.f32 %v8070_v8, %v7958_v21  ;;  %v8073_v39 = vadd.f32 %v8072_v17, %v8071_v0  ;;  %v11451_v61 = vadd.f32 %v7963_v25, %v7962_v7  ;;  %v7965_v59 = vpop.f32.mrb[158].mxu1  ;;  %v4014_v21 = vshll.u32 %v11088_v31, 16  ;;  %v8985_v0 = vld [vmem:[#allocation2 + $0xb8] sm:$0xf]  ;;  %v3201_v17 = vld [vmem:[#allocation2 + $0xcc] sm:$0xf] }
 0x338   : > { %v7966_v63 = vpop.f32.mrb[159].mxu1  ;;  %v11462_v8 = vcombine.low %v3199_v60, %v11369_v30  ;;  %v3998_v6 = vsel %vm572_vm0, %v3993_v52, %v3997_v13  ;;  %v7268_v7 = vcombine.low %v3168_v44, %v8985_v0  ;;  %v4142_v20 = vrot.slane %v8955_v49, 1  ;;  %v8986_v14 = vld [vmem:[#allocation2 + $0xc4] sm:$0xf] }
 0x339   : > { %v11454_v54 = vadd.f32 %v8073_v39, %v7961_v57  ;;  %v11456_v34 = vadd.f32 %v7966_v63, %v7965_v59  ;;  %v4000_v57 = vshrl.u32 %v11076_v38, 16  ;;  %v4016_v30 = vrot.slane %v4014_v21, 1  ;;  %v3169_v39 = vld [vmem:[#allocation2 + $0xc0] sm:$0xe] }
 0x33a   : > { %v4478_v25 = vshll.u32 %v11462_v8, 16  ;;  %v4473_v59 = vrot.slane %v4471_v32, 1  ;;  %v4141_v42 = vrot.slane %v7268_v7, 1  ;;  %v11472_v63 = vcombine.low %v3201_v17, %v11359_v26  ;;  %v11476_v21 = vld [vmem:[#allocation2 + $0xc8] ss:$0 sps:$4 sm:$0x11]  }
 0x33b   : > { %5807 = vmatmul.mubr.bf16.gmra.mrb[252].mxu0 %v11413_v1  ;;  %v4464_v1 = vshrl.u32 %v11442_v36, 16  ;;  %v4005_v45 = vor.u32 %v4004_v5, %v4000_v57  ;;  %v4017_v12 = vor.u32 %v4016_v30, %v4012_v48  ;;  %v4026_v52 = vshll.u32 %v11100_v50, 16 }
 0x33c   : > { %5814 = vmatprep.mubr.bf16.mxu0 %v4462_v2  ;;  %v7269_v56 = vcombine.low %v3169_v39, %v8986_v14  ;;  %v4480_v13 = vrot.slane %v4478_v25, 1  ;;  %v4483_v60 = vshll.u32 %v11381_v16, 16  ;;  %v8987_v2 = vld [vmem:[%s9289_s18 + $0xc] sm:$0xf]  ;;  %v6099_v0 = vshll.u32 %v8988_v19, 16 }
 0x33d   : > { %5654 = vmatmul.mubr.bf16.gmra.mrb[0].mxu1 %v3998_v6  ;;  %v4469_v38 = vor.u32 %v4468_v28, %v4464_v1  ;;  %v4010_v43 = vsel %vm572_vm0, %v4005_v45, %v4009_v58  ;;  %v6090_v28 = vshrl.u32 %v8987_v2, 16  ;;  %v6093_v6 = vshll.u32 %v8987_v2, 16  ;;  %v8989_v2 = vld [vmem:[%s9289_s18 + $0x24] sm:$0xf] }
 0x33e   : > { %5661 = vmatprep.mubr.bf16.mxu1 %v4140_v18  ;;  %v6103_v7 = vshrl.u32 %v8988_v19, 16  ;;  %v4019_v18 = vshll.u32 %v8955_v49, 16  ;;  %v4143_v1 = vsel %vm781_vm4, %v4141_v42, %v4142_v20  ;;  %v4490_v16 = vshll.u32 %v11472_v63, 16  ;;  %v8990_v19 = vld [vmem:[%s9289_s18 + $0x28] sm:$0xf] }
 0x33f   : > { %v4474_v31 = vsel %vm572_vm0, %v4469_v38, %v4473_v59  ;;  %v4144_v38 = vrot.slane %v7269_v56, 1  ;;  %v4145_v25 = vrot.slane %v11476_v21, 1  ;;  %v4485_v49 = vrot.slane %v4483_v60, 1 }
 0x340   : > { %v6092_v42 = vrot.slane %v6090_v28, 4  ;;  %v4021_v60 = vrot.slane %v4019_v18, 1  ;;  %v6138_v28 = vshrl.u32 %v8989_v2, 16 }
 0x343   : > { %v8074_v5 = vpop.f32.mrb[156].mxu0  ;;  %5815 = vmatmul.mubr.bf16.gmra.mrb[0].mxu0 %v11425_v10  ;;  %v4476_v10 = vshrl.u32 %v11462_v8, 16 }
 0x344   : > { %v8075_v26 = vpop.f32.mrb[157].mxu0  ;;  %5822 = vmatprep.mubr.bf16.mxu0 %v4474_v31  ;;  %v4488_v31 = vshrl.u32 %v11472_v63, 16 }
 0x345   : > { %v8076_v57 = vadd.f32 %v8075_v26, %v8074_v5  ;;  %v8077_v44 = vpop.f32.mrb[158].mxu0  ;;  %5662 = vmatmul.mubr.bf16.gmra.mrb[4].mxu1 %v4010_v43  ;;  %v4481_v58 = vor.u32 %v4480_v13, %v4476_v10  ;;  %v6095_v43 = vrot.slane %v6093_v6, 5  ;;  %v6105_v5 = vrot.slane %v6103_v7, 4  ;;  %v3219_v6 = vld [vmem:[#allocation2 + $0x18] sm:$0xe] }
 0x346   : > { %v8078_v32 = vpop.f32.mrb[159].mxu0  ;;  %v7968_v45 = vpop.f32.mrb[160].mxu1  ;;  %5669 = vmatprep.mubr.bf16.mxu1 %v4143_v1  ;;  %v4492_v26 = vrot.slane %v4490_v16, 1  ;;  %v4495_v13 = vshll.u32 %v11375_v53, 16  ;;  %v6151_v7 = vshrl.u32 %v8990_v19, 16  ;;  %v4022_v1 = vsel %vm572_vm0, %v4017_v12, %v4021_v60 }
 0x347   : > { %v11487_v30 = vadd.f32 %v8076_v57, %v11451_v61  ;;  %v8079_v17 = vadd.f32 %v8078_v32, %v8077_v44  ;;  %v7969_v48 = vpop.f32.mrb[161].mxu1  ;;  %v11495_v61 = vrot.slane %v6099_v0, 5  ;;  %v6141_v57 = vshll.u32 %v8989_v2, 16  ;;  %v8991_v53 = vld [vmem:[#allocation2 + $0x1c] sm:$0xf] }
 0x348   : > { %v11490_v39 = vadd.f32 %v7969_v48, %v7968_v45  ;;  %v7971_v59 = vpop.f32.mrb[162].mxu1  ;;  %v4486_v44 = vsel %vm572_vm0, %v4481_v58, %v4485_v49  ;;  %v6147_v0 = vshll.u32 %v8990_v19, 16  ;;  %v4146_v10 = vsel %vm781_vm4, %v4144_v38, %v4145_v25  ;;  %v8992_v32 = vld [vmem:[%s9289_s18 + $0x14] sm:$0x1]  ;;  %v8996_v19 = vld [vmem:[%s9289_s18 + $0x40] sm:$0xf] }
 0x349   : > { %v11493_v20 = vadd.f32 %v8079_v17, %v11456_v34  ;;  %v7972_v14 = vpop.f32.mrb[163].mxu1  ;;  %v4028_v34 = vrot.slane %v4026_v52, 1  ;;  %v7302_v18 = vcombine.low %v3219_v6, %v8991_v53  ;;  %v6109_v45 = vshll.u32 %v8992_v32, 16  ;;  %v8993_v60 = vld [vmem:[#allocation2 + $0x20] ss:$0 sps:$4 sm:$0x11]  }
 0x34a   : > { %v11497_v56 = vadd.f32 %v7972_v14, %v7971_v59  ;;  %v4493_v16 = vor.u32 %v4492_v26, %v4488_v31  ;;  %v4497_v52 = vrot.slane %v4495_v13, 1  ;;  %v6096_v17 = vor.u32 %v6095_v43, %v6092_v42  ;;  %v8994_v13 = vld [vmem:[%s9289_s18 + $0x2c] sm:$0x1] }
 0x34b   : > { %5823 = vmatmul.mubr.bf16.gmra.mrb[4].mxu0 %v11442_v36  ;;  %v6106_v36 = vor.u32 %v6105_v5, %v11495_v61  ;;  %v4024_v48 = vshrl.u32 %v11100_v50, 16  ;;  %v4031_v58 = vshll.u32 %v11476_v21, 16  ;;  %v6140_v49 = vrot.slane %v6138_v28, 4 }
 0x34c   : > { %5830 = vmatprep.mubr.bf16.mxu0 %v4486_v44  ;;  %v6143_v12 = vrot.slane %v6141_v57, 5  ;;  %v11511_v59 = vrot.slane %v6147_v0, 5  ;;  %v6153_v38 = vrot.slane %v6151_v7, 4  ;;  %v4563_v14 = vrot.slane %v7302_v18, 1  ;;  %v8995_v57 = vld [vmem:[%s9289_s18 + $0x3c] sm:$0xf] }
 0x34d   : > { %5670 = vmatmul.mubr.bf16.gmra.mrb[8].mxu1 %v4022_v1  ;;  %v4029_v25 = vor.u32 %v4028_v34, %v4024_v48  ;;  %v4564_v31 = vrot.slane %v8993_v60, 1  ;;  %v4498_v42 = vsel %vm572_vm0, %v4493_v16, %v4497_v52  ;;  %v6097_v43 = vrot.slane %v6096_v17, 4 }
 0x34e   : > { %5677 = vmatprep.mubr.bf16.mxu1 %v4146_v10  ;;  %v6107_v5 = vrot.slane %v6106_v36, 4  ;;  %v6111_v50 = vrot.slane %v6109_v45, 5  ;;  %v4033_v26 = vrot.slane %v4031_v58, 1  ;;  %v6144_v21 = vor.u32 %v6143_v12, %v6140_v49 }
 0x34f   : > { %v6157_v2 = vshll.u32 %v8994_v13, 16  ;;  %v6154_v28 = vor.u32 %v6153_v38, %v11511_v59  ;;  %v6186_v44 = vshrl.u32 %v8995_v57, 16  ;;  %v6189_v34 = vshll.u32 %v8995_v57, 16  ;;  %v8998_v57 = vld [vmem:[%s9289_s18 + $0x54] sm:$0xf] }
 0x350   : > { %v4034_v6 = vsel %vm572_vm0, %v4029_v25, %v4033_v26  ;;  %v6195_v0 = vshll.u32 %v8996_v19, 16  ;;  %v6199_v7 = vshrl.u32 %v8996_v19, 16  ;;  %v4565_v1 = vsel %vm781_vm4, %v4563_v14, %v4564_v31  ;;  %v8999_v19 = vld [vmem:[%s9289_s18 + $0x58] sm:$0xf] }
 0x351   : > { %v6102_v18 = vsel %vm9332_vm3, %v6097_v43, %v11495_v61  ;;  %v6145_v16 = vrot.slane %v6144_v21, 4  ;;  %v6159_v52 = vrot.slane %v6157_v2, 5  ;;  %v6155_v58 = vrot.slane %v6154_v28, 4  ;;  %v8997_v2 = vld [vmem:[%s9289_s18 + $0x44] sm:$0x1] }
 0x352   : > { %v6188_v49 = vrot.slane %v6186_v44, 4  ;;  %v6191_v12 = vrot.slane %v6189_v34, 5  ;;  %v11526_v60 = vrot.slane %v6195_v0, 5  ;;  %v6201_v31 = vrot.slane %v6199_v7, 4 }
 0x353   : > { %5831 = vmatmul.mubr.bf16.gmra.mrb[8].mxu0 %v11462_v8  ;;  %v6112_v8 = vsel %vm9332_vm3, %v6107_v5, %v6111_v50  ;;  %v6150_v26 = vsel %vm9332_vm3, %v6145_v16, %v11511_v59  ;;  %v6160_v21 = vsel %vm9332_vm3, %v6155_v58, %v6159_v52  ;;  %v6205_v28 = vshll.u32 %v8997_v2, 16 }
 0x354   : > { %5838 = vmatprep.mubr.bf16.mxu0 %v4498_v42  ;;  %v7392_v61 = vcombine.low %v6102_v18, %v6112_v8  ;;  %v6192_v13 = vor.u32 %v6191_v12, %v6188_v49  ;;  %v6234_v44 = vshrl.u32 %v8998_v57, 16  ;;  %v6243_v0 = vshll.u32 %v8999_v19, 16 }
 0x355   : > { %5678 = vmatmul.mubr.bf16.gmra.mrb[12].mxu1 %v4034_v6  ;;  %v6237_v6 = vshll.u32 %v8998_v57, 16  ;;  %v6207_v8 = vrot.slane %v6205_v28, 5 }
 0x356   : > { %v7974_v10 = vpop.f32.mrb[164].mxu1  ;;  %v8080_v32 = vpop.f32.mrb[160].mxu0  ;;  %8488 = vmatprep.mubr.bf16.mxu1 %v4565_v1  ;;  %v6193_v18 = vrot.slane %v6192_v13, 4 }
 0x357   : > { %v7975_v45 = vpop.f32.mrb[165].mxu1  ;;  %v8081_v17 = vpop.f32.mrb[161].mxu0 }
 0x358   : > { %v7976_v36 = vadd.f32 %v7975_v45, %v7974_v10  ;;  %v7977_v48 = vpop.f32.mrb[166].mxu1  ;;  %v8082_v38 = vadd.f32 %v8081_v17, %v8080_v32  ;;  %v8083_v25 = vpop.f32.mrb[162].mxu0  ;;  %v7394_v10 = vcombine.low %v6150_v26, %v6160_v21  ;;  %v6239_v17 = vrot.slane %v6237_v6, 5  ;;  %v12120_v21 = vld [vmem:[#allocation11_spill] sm:$0xff] }
 0x359   : > { %v7978_v14 = vpop.f32.mrb[167].mxu1  ;;  %v8084_v42 = vpop.f32.mrb[163].mxu0  ;;  %v6198_v28 = vsel %vm9332_vm3, %v6193_v18, %v11526_v60 }
 0x35a   : > { %v7979_v43 = vadd.f32 %v7978_v14, %v7977_v48  ;;  %v11529_v5 = vadd.f32 %v8082_v38, %v11490_v39  ;;  %v8085_v50 = vadd.f32 %v8084_v42, %v8083_v25  ;;  %v6202_v39 = vor.u32 %v6201_v31, %v11526_v60  ;;  %v9001_v42 = vld [vmem:[%s9289_s18 + $0x70] sm:$0xf] }
 0x35b   : > { %5839 = vmatmul.mubr.bf16.gmra.mrb[12].mxu0 %v11472_v63  ;;  %v6247_v63 = vshrl.u32 %v8999_v19, 16  ;;  %v11546_v48 = vrot.slane %v6243_v0, 5  ;;  %v6295_v26 = vshrl.u32 %v9001_v42, 16 }
 0x35c   : > { %v11540_v34 = vadd.f32 %v8085_v50, %v11497_v56  ;;  %8536 = vmatprep.mubr.bf16.mxu0 %v7392_v61  ;;  %v6236_v56 = vrot.slane %v6234_v44, 4  ;;  %v6203_v52 = vrot.slane %v6202_v39, 4  ;;  %v6291_v50 = vshll.u32 %v9001_v42, 16  ;;  %v9002_v44 = vld [vmem:[%s9289_s18 + $0x5c] sm:$0x1] }
 0x35d   : > { %8489 = vmatmul.mubr.bf16.vlgmr.msra.gmra.mrb[16].mxu1 %v11054_v11  ;;  %v6249_v12 = vrot.slane %v6247_v63, 4  ;;  %v6253_v39 = vshll.u32 %v9002_v44, 16 }
 0x35e   : > { %v8086_v59 = vpop.f32.mrb[164].mxu0  ;;  %8492 = vmatprep.mubr.bf16.mxu1 %v11236_v23  ;;  %v9000_v23 = vld [vmem:[%s9289_s18 + $0x6c] sm:$0xf]  ;;  %v6240_v57 = vor.u32 %v6239_v17, %v6236_v56 }
 0x35f   : > { %v8087_v7 = vpop.f32.mrb[165].mxu0  ;;  %v7980_v1 = vpop.f32.mrb[168].mxu1  ;;  %v6282_v38 = vshrl.u32 %v9000_v23, 16  ;;  %v6285_v25 = vshll.u32 %v9000_v23, 16  ;;  %v6250_v6 = vor.u32 %v6249_v12, %v11546_v48 }
 0x360   : > { %v8088_v32 = vadd.f32 %v8087_v7, %v8086_v59  ;;  %v8089_v45 = vpop.f32.mrb[166].mxu0  ;;  %v7981_v16 = vpop.f32.mrb[169].mxu1  ;;  %v6297_v59 = vrot.slane %v6295_v26, 4  ;;  %v6241_v56 = vrot.slane %v6240_v57, 4  ;;  %v9005_v26 = vld [vmem:[%s9289_s18 + $0x88] sm:$0xf] }
 0x361   : > { %v8090_v11 = vpop.f32.mrb[167].mxu0  ;;  %v7982_v58 = vadd.f32 %v7981_v16, %v7980_v1  ;;  %v7983_v49 = vpop.f32.mrb[170].mxu1  ;;  %v6284_v19 = vrot.slane %v6282_v38, 4  ;;  %v6287_v0 = vrot.slane %v6285_v25, 5  ;;  %v9004_v25 = vld [vmem:[%s9289_s18 + $0x84] sm:$0xf] }
 0x362   : > { %v11549_v14 = vadd.f32 %v8088_v32, %v7976_v36  ;;  %v8091_v61 = vadd.f32 %v8090_v11, %v8089_v45  ;;  %v7984_v31 = vpop.f32.mrb[171].mxu1  ;;  %v6208_v36 = vsel %vm9332_vm3, %v6203_v52, %v6207_v8  ;;  %v6255_v8 = vrot.slane %v6253_v39, 5 }
 0x363   : > { %8537 = vmatmul.mubr.bf16.vlgmr.msra.gmra.mrb[16].mxu0 %v12120_v21  ;;  %v7985_v13 = vadd.f32 %v7984_v31, %v7983_v49  ;;  %v7396_v18 = vcombine.low %v6198_v28, %v6208_v36  ;;  %v6251_v52 = vrot.slane %v6250_v6, 4  ;;  %v6288_v17 = vor.u32 %v6287_v0, %v6284_v19  ;;  %v12121_v31 = vld [vmem:[#allocation14_spill] sm:$0xff] }
 0x364   : > { %v11553_v2 = vadd.f32 %v8091_v61, %v7979_v43  ;;  %8540 = vmatprep.mubr.bf16.mxu0 %v7394_v10  ;;  %v11564_v43 = vrot.slane %v6291_v50, 5  ;;  %v6330_v61 = vshrl.u32 %v9004_v25, 16  ;;  %v6333_v50 = vshll.u32 %v9004_v25, 16  ;;  %v9007_v25 = vld [vmem:[%s9289_s18 + $0x9c] sm:$0xf] }
 0x365   : > { %8493 = vmatmul.mubr.bf16.gmra.mrb[20].mxu1 %v11228_v33  ;;  %v6339_v21 = vshll.u32 %v9005_v26, 16  ;;  %v6343_v28 = vshrl.u32 %v9005_v26, 16  ;;  %v6256_v44 = vsel %vm9332_vm3, %v6251_v52, %v6255_v8  ;;  %v6289_v36 = vrot.slane %v6288_v17, 4 }
 0x366   : > { %v8092_v63 = vpop.f32.mrb[168].mxu0  ;;  %8496 = vmatprep.mubr.bf16.mxu1 %v11270_v24  ;;  %v9003_v24 = vld [vmem:[%s9289_s18 + $0x74] sm:$0x1]  ;;  %v6298_v38 = vor.u32 %v6297_v59, %v11564_v43  ;;  %v6335_v59 = vrot.slane %v6333_v50, 5  ;;  %v9008_v50 = vld [vmem:[%s9289_s18 + $0xa0] sm:$0xf] }
 0x367   : > { %v8093_v60 = vpop.f32.mrb[169].mxu0  ;;  %v7986_v7 = vpop.f32.mrb[172].mxu1  ;;  %v6301_v11 = vshll.u32 %v9003_v24, 16  ;;  %v6294_v17 = vsel %vm9332_vm3, %v6289_v36, %v11564_v43  ;;  %v6387_v26 = vshll.u32 %v9008_v50, 16 }
 0x368   : > { %v8094_v1 = vadd.f32 %v8093_v60, %v8092_v63  ;;  %v8095_v10 = vpop.f32.mrb[170].mxu0  ;;  %v7987_v33 = vpop.f32.mrb[173].mxu1  ;;  %v6299_v6 = vrot.slane %v6298_v38, 4  ;;  %v6332_v63 = vrot.slane %v6330_v61, 4  ;;  %v11582_v60 = vrot.slane %v6339_v21, 5 }
 0x369   : > { %v8096_v32 = vpop.f32.mrb[171].mxu0  ;;  %v7988_v45 = vadd.f32 %v7987_v33, %v7986_v7  ;;  %v7989_v16 = vpop.f32.mrb[174].mxu1  ;;  %v6303_v19 = vrot.slane %v6301_v11, 5  ;;  %v12122_v11 = vld [vmem:[#allocation16_spill] sm:$0xff]  ;;  %v6378_v61 = vshrl.u32 %v9007_v25, 16  ;;  %v6391_v21 = vshrl.u32 %v9008_v50, 16 }
 0x36a   : > { %v11567_v49 = vadd.f32 %v8094_v1, %v7982_v58  ;;  %v8097_v12 = vadd.f32 %v8096_v32, %v8095_v10  ;;  %v7990_v23 = vpop.f32.mrb[175].mxu1  ;;  %v6246_v58 = vsel %vm9332_vm3, %v6241_v56, %v11546_v48 }
 0x36b   : > { %8541 = vmatmul.mubr.bf16.gmra.mrb[20].mxu0 %v12121_v31  ;;  %v7991_v42 = vadd.f32 %v7990_v23, %v7989_v16  ;;  %v7398_v10 = vcombine.low %v6246_v58, %v6256_v44  ;;  %v6304_v24 = vsel %vm9332_vm3, %v6299_v6, %v6303_v19  ;;  %v6336_v23 = vor.u32 %v6335_v59, %v6332_v63 }
 0x36c   : > { %v11573_v57 = vadd.f32 %v8097_v12, %v7985_v13  ;;  %8544 = vmatprep.mubr.bf16.mxu0 %v7396_v18  ;;  %v6380_v19 = vrot.slane %v6378_v61, 4  ;;  %v11600_v59 = vrot.slane %v6387_v26, 5 }
 0x36d   : > { %8497 = vmatmul.mubr.bf16.gmra.mrb[24].mxu1 %v11263_v22  ;;  %v6345_v22 = vrot.slane %v6343_v28, 4  ;;  %v6337_v36 = vrot.slane %v6336_v23, 4 }
 0x36e   : > { %v8098_v39 = vpop.f32.mrb[172].mxu0  ;;  %8500 = vmatprep.mubr.bf16.mxu1 %v11296_v51  ;;  %v9006_v51 = vld [vmem:[%s9289_s18 + $0x8c] sm:$0x1] }
 0x36f   : > { %v8099_v0 = vpop.f32.mrb[173].mxu0  ;;  %v7992_v13 = vpop.f32.mrb[176].mxu1  ;;  %v6349_v8 = vshll.u32 %v9006_v51, 16  ;;  %v6346_v38 = vor.u32 %v6345_v22, %v11582_v60  ;;  %v6393_v22 = vrot.slane %v6391_v21, 4  ;;  %v6342_v51 = vsel %vm9332_vm3, %v6337_v36, %v11582_v60 }
 0x370   : > { %v8100_v7 = vadd.f32 %v8099_v0, %v8098_v39  ;;  %v8101_v1 = vpop.f32.mrb[174].mxu0  ;;  %v7993_v48 = vpop.f32.mrb[177].mxu1  ;;  %v7400_v39 = vcombine.low %v6294_v17, %v6304_v24 }
 0x371   : > { %v8102_v33 = vpop.f32.mrb[175].mxu0  ;;  %v7994_v18 = vadd.f32 %v7993_v48, %v7992_v13  ;;  %v7995_v56 = vpop.f32.mrb[178].mxu1  ;;  %v6351_v28 = vrot.slane %v6349_v8, 5  ;;  %v6347_v6 = vrot.slane %v6346_v38, 4  ;;  %v6394_v24 = vor.u32 %v6393_v22, %v11600_v59 }
 0x372   : > { %v11585_v32 = vadd.f32 %v8100_v7, %v7988_v45  ;;  %v8103_v16 = vadd.f32 %v8102_v33, %v8101_v1  ;;  %v7996_v52 = vpop.f32.mrb[179].mxu1  ;;  %v6381_v45 = vshll.u32 %v9007_v25, 16  ;;  %v12123_v33 = vld [vmem:[#allocation17_spill] sm:$0xff]  ;;  %v9011_v25 = vld [vmem:[%s9289_s18 + $0xb8] sm:$0xf] }
 0x373   : > { %8545 = vmatmul.mubr.bf16.gmra.mrb[24].mxu0 %v12122_v11  ;;  %v7997_v12 = vadd.f32 %v7996_v52, %v7995_v56  ;;  %v6352_v8 = vsel %vm9332_vm3, %v6347_v6, %v6351_v28  ;;  %v9010_v11 = vld [vmem:[%s9289_s18 + $0xb4] sm:$0xf]  ;;  %v6435_v61 = vshll.u32 %v9011_v25, 16 }
 0x374   : > { %v11595_v31 = vadd.f32 %v8103_v16, %v7991_v42  ;;  %8548 = vmatprep.mubr.bf16.mxu0 %v7398_v10  ;;  %v6383_v63 = vrot.slane %v6381_v45, 5  ;;  %v9009_v16 = vld [vmem:[%s9289_s18 + $0xa4] sm:$0x1]  ;;  %v6426_v23 = vshrl.u32 %v9010_v11, 16  ;;  %v6429_v38 = vshll.u32 %v9010_v11, 16 }
 0x375   : > { %8501 = vmatmul.mubr.bf16.gmra.mrb[28].mxu1 %v11288_v4  ;;  %v6397_v52 = vshll.u32 %v9009_v16, 16  ;;  %v6439_v45 = vshrl.u32 %v9011_v25, 16  ;;  %v7402_v21 = vcombine.low %v6342_v51, %v6352_v8 }
 0x376   : > { %v8104_v43 = vpop.f32.mrb[176].mxu0  ;;  %8504 = vmatprep.mubr.bf16.mxu1 %v11330_v37  ;;  %v6428_v36 = vrot.slane %v6426_v23, 4 }
 0x377   : > { %v8105_v58 = vpop.f32.mrb[177].mxu0  ;;  %v7998_v44 = vpop.f32.mrb[180].mxu1 }
 0x378   : > { %v8106_v0 = vadd.f32 %v8105_v58, %v8104_v43  ;;  %v8107_v42 = vpop.f32.mrb[178].mxu0  ;;  %v7999_v13 = vpop.f32.mrb[181].mxu1 }
 0x379   : > { %v8108_v7 = vpop.f32.mrb[179].mxu0  ;;  %v8000_v4 = vadd.f32 %v7999_v13, %v7998_v44  ;;  %v8001_v1 = vpop.f32.mrb[182].mxu1  ;;  %v6441_v13 = vrot.slane %v6439_v45, 4 }
 0x37a   : > { %v11602_v37 = vadd.f32 %v8106_v0, %v7994_v18  ;;  %v8109_v48 = vadd.f32 %v8108_v7, %v8107_v42  ;;  %v8002_v10 = vpop.f32.mrb[183].mxu1  ;;  %v6384_v18 = vor.u32 %v6383_v63, %v6380_v19  ;;  %v6431_v0 = vrot.slane %v6429_v38, 5  ;;  %v12124_v7 = vld [vmem:[#allocation18_spill] sm:$0xff] }
 0x37b   : > { %8549 = vmatmul.mubr.bf16.gmra.mrb[28].mxu0 %v12123_v33  ;;  %v8003_v56 = vadd.f32 %v8002_v10, %v8001_v1  ;;  %v6437_v42 = vrot.slane %v6435_v61, 5  ;;  %v9012_v10 = vld [vmem:[%s9289_s18 + $0xbc] sm:$0x1]  ;;  %s7455_s18 = sshll.u32 %s9192_s17, 12  ;;  %s11989_s17 = scalar_lea.sflag [#allocation5], %s365_s30 }
 0x37c   : > { %v11611_v17 = vadd.f32 %v8109_v48, %v7997_v12  ;;  %8552 = vmatprep.mubr.bf16.mxu0 %v7400_v39  ;;  %v6399_v12 = vrot.slane %v6397_v52, 5  ;;  %v6385_v44 = vrot.slane %v6384_v18, 4  ;;  %v6395_v39 = vrot.slane %v6394_v24, 4  ;;  %s11980_s26 = scalar_lea.hbm %s12040_s10, %s7455_s18 }
 0x37d   : > { %8505 = vmatmul.mubr.bf16.gmra.mrb[32].mxu1 %v11309_v35  ;;  %v6445_v33 = vshll.u32 %v9012_v10, 16  ;;  %v6432_v8 = vor.u32 %v6431_v0, %v6428_v36  ;;  %v6442_v16 = vor.u32 %v6441_v13, %v6437_v42 }
 0x37e   : > { %v8110_v60 = vpop.f32.mrb[180].mxu0  ;;  %8508 = vmatprep.mubr.bf16.mxu1 %v11362_v62  ;;  %v6390_v51 = vsel %vm9332_vm3, %v6385_v44, %v11600_v59 }
 0x37f   : > { %v8111_v50 = vpop.f32.mrb[181].mxu0  ;;  %v8004_v26 = vpop.f32.mrb[184].mxu1  ;;  %v6433_v45 = vrot.slane %v6432_v8, 4  ;;  %v6447_v59 = vrot.slane %v6445_v33, 5 }
 0x380   : > { %v8112_v43 = vadd.f32 %v8111_v50, %v8110_v60  ;;  %v8113_v28 = vpop.f32.mrb[182].mxu0  ;;  %v8005_v58 = vpop.f32.mrb[185].mxu1  ;;  %v6443_v60 = vrot.slane %v6442_v16, 4 }
 0x381   : > { %v8114_v6 = vpop.f32.mrb[183].mxu0  ;;  %v8006_v35 = vadd.f32 %v8005_v58, %v8004_v26  ;;  %v8007_v19 = vpop.f32.mrb[186].mxu1 }
 0x382   : > { %v11618_v63 = vadd.f32 %v8112_v43, %v8000_v4  ;;  %v8115_v62 = vadd.f32 %v8114_v6, %v8113_v28  ;;  %v8008_v22 = vpop.f32.mrb[187].mxu1  ;;  %v6400_v4 = vsel %vm9332_vm3, %v6395_v39, %v6399_v12  ;;  %v12125_v12 = vld [vmem:[#allocation10_spill] sm:$0xff]  ;;  %v6438_v28 = vsel %vm9332_vm3, %v6433_v45, %v6437_v42  ;;  %v12126_v42 = vld [vmem:[#allocation12_spill] sm:$0xff] }
 0x383   : > { %8553 = vmatmul.mubr.bf16.gmra.mrb[32].mxu0 %v12124_v7  ;;  %v8009_v1 = vadd.f32 %v8008_v22, %v8007_v19  ;;  %v7404_v38 = vcombine.low %v6390_v51, %v6400_v4  ;;  %v6448_v58 = vsel %vm9332_vm3, %v6443_v60, %v6447_v59 }
 0x384   : > { %v11621_v48 = vadd.f32 %v8115_v62, %v8003_v56  ;;  %8556 = vmatprep.mubr.bf16.mxu0 %v7402_v21  ;;  %v7406_v0 = vcombine.low %v6438_v28, %v6448_v58 }
 0x385   : > { %8509 = vmatmul.mubr.bf16.gmra.mrb[36].mxu1 %v11346_v3 }
 0x386   : > { %v8116_v52 = vpop.f32.mrb[184].mxu0  ;;  %8512 = vmatprep.mubr.bf16.mxu1 %v11387_v15 }
 0x387   : > { %v8117_v18 = vpop.f32.mrb[185].mxu0  ;;  %v8010_v56 = vpop.f32.mrb[188].mxu1 }
 0x388   : > { %v8118_v24 = vadd.f32 %v8117_v18, %v8116_v52  ;;  %v8119_v11 = vpop.f32.mrb[186].mxu0  ;;  %v8011_v23 = vpop.f32.mrb[189].mxu1 }
 0x389   : > { %v8120_v25 = vpop.f32.mrb[187].mxu0  ;;  %v8012_v3 = vadd.f32 %v8011_v23, %v8010_v56  ;;  %v8013_v61 = vpop.f32.mrb[190].mxu1 }
 0x38a   : > { %v11631_v50 = vadd.f32 %v8118_v24, %v8006_v35  ;;  %v8121_v26 = vadd.f32 %v8120_v25, %v8119_v11  ;;  %v8014_v21 = vpop.f32.mrb[191].mxu1 }
 0x38b   : > { %8557 = vmatmul.mubr.bf16.gmra.mrb[36].mxu0 %v12125_v12  ;;  %v8015_v43 = vadd.f32 %v8014_v21, %v8013_v61 }
 0x38c   : > { %v11634_v15 = vadd.f32 %v8121_v26, %v8009_v1  ;;  %8560 = vmatprep.mubr.bf16.mxu0 %v7404_v38  ;;  %v12127_v38 = vld [vmem:[#allocation19_spill] sm:$0xff] }
 0x38d   : > { %8513 = vmatmul.mubr.bf16.gmra.mrb[40].mxu1 %v11378_v29 }
 0x38e   : > { %v8122_v44 = vpop.f32.mrb[188].mxu0  ;;  %8516 = vmatprep.mubr.bf16.mxu1 %v11407_v40 }
 0x38f   : > { %v8123_v39 = vpop.f32.mrb[189].mxu0  ;;  %v8016_v36 = vpop.f32.mrb[192].mxu1 }
 0x390   : > { %v8124_v6 = vadd.f32 %v8123_v39, %v8122_v44  ;;  %v8125_v35 = vpop.f32.mrb[190].mxu0  ;;  %v8017_v19 = vpop.f32.mrb[193].mxu1 }
 0x391   : > { %v8126_v13 = vpop.f32.mrb[191].mxu0  ;;  %v8018_v62 = vadd.f32 %v8017_v19, %v8016_v36  ;;  %v8019_v22 = vpop.f32.mrb[194].mxu1 }
 0x392   : > { %v11642_v7 = vadd.f32 %v8124_v6, %v8012_v3  ;;  %v8127_v29 = vadd.f32 %v8126_v13, %v8125_v35  ;;  %v8020_v1 = vpop.f32.mrb[195].mxu1 }
 0x393   : > { %8561 = vmatmul.mubr.bf16.gmra.mrb[40].mxu0 %v12126_v42  ;;  %v8021_v53 = vadd.f32 %v8020_v1, %v8019_v22 }
 0x394   : > { %v11645_v10 = vadd.f32 %v8127_v29, %v8015_v43  ;;  %8564 = vmatprep.mubr.bf16.mxu0 %v7406_v0 }
 0x395   : > { %8517 = vmatmul.mubr.bf16.gmra.mrb[44].mxu1 %v11398_v55 }
 0x396   : > { %v8128_v40 = vpop.f32.mrb[192].mxu0 }
 0x397   : > { %v8129_v33 = vpop.f32.mrb[193].mxu0  ;;  %v8022_v51 = vpop.f32.mrb[196].mxu1 }
 0x398   : > { %v8130_v4 = vadd.f32 %v8129_v33, %v8128_v40  ;;  %v8131_v8 = vpop.f32.mrb[194].mxu0  ;;  %v8023_v16 = vpop.f32.mrb[197].mxu1 }
 0x399   : > { %v8132_v52 = vpop.f32.mrb[195].mxu0  ;;  %v8024_v18 = vadd.f32 %v8023_v16, %v8022_v51  ;;  %v8025_v56 = vpop.f32.mrb[198].mxu1 }
 0x39a   : > { %v11648_v24 = vadd.f32 %v8130_v4, %v8018_v62  ;;  %v8133_v11 = vadd.f32 %v8132_v52, %v8131_v8  ;;  %v8026_v23 = vpop.f32.mrb[199].mxu1 }
 0x39b   : > { %8565 = vmatmul.mubr.bf16.gmra.mrb[44].mxu0 %v12127_v38  ;;  %v8027_v25 = vadd.f32 %v8026_v23, %v8025_v56 }
 0x39c   : > { %v11651_v3 = vadd.f32 %v8133_v11, %v8021_v53 }
 0x39e   : > { %v8134_v61 = vpop.f32.mrb[196].mxu0 }
 0x39f   : > { %v8135_v55 = vpop.f32.mrb[197].mxu0  ;;  %v8028_v45 = vpop.f32.mrb[200].mxu1 }
 0x3a0   : > { %v8136_v60 = vadd.f32 %v8135_v55, %v8134_v61  ;;  %v8137_v59 = vpop.f32.mrb[198].mxu0  ;;  %v8029_v26 = vpop.f32.mrb[201].mxu1 }
 0x3a1   : > { %v8138_v21 = vpop.f32.mrb[199].mxu0  ;;  %v8030_v12 = vadd.f32 %v8029_v26, %v8028_v45  ;;  %v8031_v43 = vpop.f32.mrb[202].mxu1 }
 0x3a2   : > { %v11653_v28 = vadd.f32 %v8136_v60, %v8024_v18  ;;  %v8139_v58 = vadd.f32 %v8138_v21, %v8137_v59  ;;  %v8032_v44 = vpop.f32.mrb[203].mxu1 }
 0x3a3   : > { %v8033_v39 = vadd.f32 %v8032_v44, %v8031_v43 }
 0x3a4   : > { %v11655_v36 = vadd.f32 %v8139_v58, %v8027_v25 }
 0x3a6   : > { %v8140_v6 = vpop.f32.mrb[200].mxu0 }
 0x3a7   : > { %v8141_v35 = vpop.f32.mrb[201].mxu0  ;;  %v8034_v19 = vpop.f32.mrb[204].mxu1 }
 0x3a8   : > { %v8142_v0 = vadd.f32 %v8141_v35, %v8140_v6  ;;  %v8143_v13 = vpop.f32.mrb[202].mxu0  ;;  %v8035_v62 = vpop.f32.mrb[205].mxu1 }
 0x3a9   : > { %v8144_v22 = vpop.f32.mrb[203].mxu0  ;;  %v8036_v29 = vadd.f32 %v8035_v62, %v8034_v19  ;;  %v8037_v1 = vpop.f32.mrb[206].mxu1 }
 0x3aa   : > { %v11657_v42 = vadd.f32 %v8142_v0, %v8030_v12  ;;  %v8145_v53 = vadd.f32 %v8144_v22, %v8143_v13  ;;  %v8038_v40 = vpop.f32.mrb[207].mxu1 }
 0x3ab   : > { %v8039_v33 = vadd.f32 %v8038_v40, %v8037_v1 }
 0x3ac   : > { %v11659_v51 = vadd.f32 %v8145_v53, %v8033_v39 }
 0x3ae   : > { %v8146_v4 = vpop.f32.mrb[204].mxu0 }
 0x3af   : > { %v8147_v8 = vpop.f32.mrb[205].mxu0  ;;  %v8168_v16 = vpop.f32.mrb[208].mxu1 }
 0x3b0   : > { %v8148_v52 = vadd.f32 %v8147_v8, %v8146_v4  ;;  %v8149_v18 = vpop.f32.mrb[206].mxu0  ;;  %v8169_v56 = vpop.f32.mrb[209].mxu1 }
 0x3b1   : > { %v8150_v11 = vpop.f32.mrb[207].mxu0  ;;  %v8170_v23 = vadd.f32 %v8169_v56, %v8168_v16  ;;  %v8171_v38 = vpop.f32.mrb[210].mxu1 }
 0x3b2   : > { %v11661_v25 = vadd.f32 %v8148_v52, %v8036_v29  ;;  %v8151_v61 = vadd.f32 %v8150_v11, %v8149_v18  ;;  %v8172_v55 = vpop.f32.mrb[211].mxu1 }
 0x3b3   : > { %v5560_v45 = vadd.f32 %v8170_v23, %v11323_v9  ;;  %v8173_v60 = vadd.f32 %v8172_v55, %v8171_v38 }
 0x3b4   : > { %v11664_v59 = vadd.f32 %v8151_v61, %v8039_v33 }
 0x3b5   : > { %v5563_v26 = vadd.f32 %v8173_v60, %v11335_v27 }
 0x3b6   : > { %v8280_v21 = vpop.f32.mrb[208].mxu0 }
 0x3b7   : > { %v8281_v12 = vpop.f32.mrb[209].mxu0 }
 0x3b8   : > { %v8282_v43 = vadd.f32 %v8281_v12, %v8280_v21  ;;  %v8283_v58 = vpop.f32.mrb[210].mxu0  ;;  %v8174_v44 = vpop.f32.mrb[212].mxu1 }
 0x3b9   : > { %v8284_v39 = vpop.f32.mrb[211].mxu0  ;;  %v8175_v6 = vpop.f32.mrb[213].mxu1 }
 0x3ba   : > { %v8285_v35 = vadd.f32 %v8284_v39, %v8283_v58  ;;  %v8176_v19 = vadd.f32 %v8175_v6, %v8174_v44  ;;  %v8177_v0 = vpop.f32.mrb[214].mxu1  ;;  %v11667_v13 = vadd.f32 %v8282_v43, %v5560_v45 }
 0x3bb   : > { %v8178_v62 = vpop.f32.mrb[215].mxu1 }
 0x3bc   : > { %v5568_v9 = vadd.f32 %v8176_v19, %v11427_v41  ;;  %v8179_v22 = vadd.f32 %v8178_v62, %v8177_v0  ;;  %v11671_v4 = vadd.f32 %v8285_v35, %v5563_v26 }
 0x3be   : > { %v8286_v29 = vpop.f32.mrb[212].mxu0  ;;  %v5571_v1 = vadd.f32 %v8179_v22, %v11433_v47 }
 0x3bf   : > { %v8287_v27 = vpop.f32.mrb[213].mxu0 }
 0x3c0   : > { %v8288_v53 = vadd.f32 %v8287_v27, %v8286_v29  ;;  %v8289_v40 = vpop.f32.mrb[214].mxu0  ;;  %v8180_v33 = vpop.f32.mrb[216].mxu1 }
 0x3c1   : > { %v8290_v8 = vpop.f32.mrb[215].mxu0  ;;  %v8181_v16 = vpop.f32.mrb[217].mxu1 }
 0x3c2   : > { %v8291_v52 = vadd.f32 %v8290_v8, %v8289_v40  ;;  %v8182_v18 = vadd.f32 %v8181_v16, %v8180_v33  ;;  %v8183_v56 = vpop.f32.mrb[218].mxu1  ;;  %v11673_v11 = vadd.f32 %v8288_v53, %v5568_v9 }
 0x3c3   : > { %v8184_v23 = vpop.f32.mrb[219].mxu1 }
 0x3c4   : > { %v5576_v41 = vadd.f32 %v8182_v18, %v11449_v46  ;;  %v8185_v38 = vadd.f32 %v8184_v23, %v8183_v56  ;;  %v11676_v61 = vadd.f32 %v8291_v52, %v5571_v1 }
 0x3c6   : > { %v8292_v47 = vpop.f32.mrb[216].mxu0  ;;  %v5579_v55 = vadd.f32 %v8185_v38, %v11454_v54 }
 0x3c7   : > { %v8293_v45 = vpop.f32.mrb[217].mxu0 }
 0x3c8   : > { %v8294_v60 = vadd.f32 %v8293_v45, %v8292_v47  ;;  %v8295_v26 = vpop.f32.mrb[218].mxu0  ;;  %v8186_v21 = vpop.f32.mrb[220].mxu1 }
 0x3c9   : > { %v8296_v12 = vpop.f32.mrb[219].mxu0  ;;  %v8187_v43 = vpop.f32.mrb[221].mxu1 }
 0x3ca   : > { %v8297_v58 = vadd.f32 %v8296_v12, %v8295_v26  ;;  %v8188_v44 = vadd.f32 %v8187_v43, %v8186_v21  ;;  %v8189_v39 = vpop.f32.mrb[222].mxu1  ;;  %v11679_v6 = vadd.f32 %v8294_v60, %v5576_v41 }
 0x3cb   : > { %v8190_v35 = vpop.f32.mrb[223].mxu1 }
 0x3cc   : > { %v5584_v46 = vadd.f32 %v8188_v44, %v11487_v30  ;;  %v8191_v19 = vadd.f32 %v8190_v35, %v8189_v39  ;;  %v11682_v0 = vadd.f32 %v8297_v58, %v5579_v55 }
 0x3ce   : > { %v8298_v62 = vpop.f32.mrb[220].mxu0  ;;  %v5587_v54 = vadd.f32 %v8191_v19, %v11493_v20 }
 0x3cf   : > { %v8299_v9 = vpop.f32.mrb[221].mxu0 }
 0x3d0   : > { %v8300_v22 = vadd.f32 %v8299_v9, %v8298_v62  ;;  %v8301_v29 = vpop.f32.mrb[222].mxu0  ;;  %v8192_v1 = vpop.f32.mrb[224].mxu1 }
 0x3d1   : > { %v8302_v27 = vpop.f32.mrb[223].mxu0  ;;  %v8193_v53 = vpop.f32.mrb[225].mxu1 }
 0x3d2   : > { %v8303_v40 = vadd.f32 %v8302_v27, %v8301_v29  ;;  %v8194_v33 = vadd.f32 %v8193_v53, %v8192_v1  ;;  %v8195_v8 = vpop.f32.mrb[226].mxu1  ;;  %v11685_v16 = vadd.f32 %v8300_v22, %v5584_v46 }
 0x3d3   : > { %v8196_v52 = vpop.f32.mrb[227].mxu1 }
 0x3d4   : > { %v5592_v30 = vadd.f32 %v8194_v33, %v11529_v5  ;;  %v8197_v18 = vadd.f32 %v8196_v52, %v8195_v8  ;;  %v11688_v56 = vadd.f32 %v8303_v40, %v5587_v54 }
 0x3d6   : > { %v8304_v23 = vpop.f32.mrb[224].mxu0  ;;  %v5595_v20 = vadd.f32 %v8197_v18, %v11540_v34 }
 0x3d7   : > { %v8305_v41 = vpop.f32.mrb[225].mxu0 }
 0x3d8   : > { %v8306_v38 = vadd.f32 %v8305_v41, %v8304_v23  ;;  %v8307_v47 = vpop.f32.mrb[226].mxu0  ;;  %v8198_v55 = vpop.f32.mrb[228].mxu1 }
 0x3d9   : > { %v8308_v45 = vpop.f32.mrb[227].mxu0  ;;  %v8199_v60 = vpop.f32.mrb[229].mxu1 }
 0x3da   : > { %v8309_v26 = vadd.f32 %v8308_v45, %v8307_v47  ;;  %v8200_v21 = vadd.f32 %v8199_v60, %v8198_v55  ;;  %v8201_v12 = vpop.f32.mrb[230].mxu1  ;;  %v11691_v43 = vadd.f32 %v8306_v38, %v5592_v30 }
 0x3db   : > { %v8202_v58 = vpop.f32.mrb[231].mxu1 }
 0x3dc   : > { %v5600_v5 = vadd.f32 %v8200_v21, %v11549_v14  ;;  %v8203_v44 = vadd.f32 %v8202_v58, %v8201_v12  ;;  %v11694_v39 = vadd.f32 %v8309_v26, %v5595_v20 }
 0x3de   : > { %v8310_v35 = vpop.f32.mrb[228].mxu0  ;;  %v5603_v34 = vadd.f32 %v8203_v44, %v11553_v2 }
 0x3df   : > { %v8311_v46 = vpop.f32.mrb[229].mxu0 }
 0x3e0   : > { %v8312_v19 = vadd.f32 %v8311_v46, %v8310_v35  ;;  %v8313_v62 = vpop.f32.mrb[230].mxu0  ;;  %v8204_v54 = vpop.f32.mrb[232].mxu1 }
 0x3e1   : > { %v8314_v9 = vpop.f32.mrb[231].mxu0  ;;  %v8205_v22 = vpop.f32.mrb[233].mxu1 }
 0x3e2   : > { %v8315_v29 = vadd.f32 %v8314_v9, %v8313_v62  ;;  %v8206_v1 = vadd.f32 %v8205_v22, %v8204_v54  ;;  %v8207_v27 = vpop.f32.mrb[234].mxu1  ;;  %v11697_v53 = vadd.f32 %v8312_v19, %v5600_v5 }
 0x3e3   : > { %v8208_v40 = vpop.f32.mrb[235].mxu1 }
 0x3e4   : > { %v5608_v14 = vadd.f32 %v8206_v1, %v11567_v49  ;;  %v8209_v33 = vadd.f32 %v8208_v40, %v8207_v27  ;;  %v11700_v8 = vadd.f32 %v8315_v29, %v5603_v34 }
 0x3e6   : > { %v8316_v52 = vpop.f32.mrb[232].mxu0  ;;  %v5611_v2 = vadd.f32 %v8209_v33, %v11573_v57 }
 0x3e7   : > { %v8317_v30 = vpop.f32.mrb[233].mxu0 }
 0x3e8   : > { %v8318_v18 = vadd.f32 %v8317_v30, %v8316_v52  ;;  %v8319_v23 = vpop.f32.mrb[234].mxu0  ;;  %v8210_v20 = vpop.f32.mrb[236].mxu1 }
 0x3e9   : > { %v8320_v41 = vpop.f32.mrb[235].mxu0  ;;  %v8211_v38 = vpop.f32.mrb[237].mxu1 }
 0x3ea   : > { %v8321_v47 = vadd.f32 %v8320_v41, %v8319_v23  ;;  %v8212_v55 = vadd.f32 %v8211_v38, %v8210_v20  ;;  %v8213_v45 = vpop.f32.mrb[238].mxu1  ;;  %v11703_v60 = vadd.f32 %v8318_v18, %v5608_v14 }
 0x3eb   : > { %v8214_v26 = vpop.f32.mrb[239].mxu1 }
 0x3ec   : > { %v5616_v49 = vadd.f32 %v8212_v55, %v11585_v32  ;;  %v8215_v21 = vadd.f32 %v8214_v26, %v8213_v45  ;;  %v11706_v12 = vadd.f32 %v8321_v47, %v5611_v2 }
 0x3ee   : > { %v8322_v58 = vpop.f32.mrb[236].mxu0  ;;  %v5619_v57 = vadd.f32 %v8215_v21, %v11595_v31 }
 0x3ef   : > { %v8323_v5 = vpop.f32.mrb[237].mxu0 }
 0x3f0   : > { %v8324_v44 = vadd.f32 %v8323_v5, %v8322_v58  ;;  %v8325_v35 = vpop.f32.mrb[238].mxu0  ;;  %v8216_v34 = vpop.f32.mrb[240].mxu1 }
 0x3f1   : > { %v8326_v46 = vpop.f32.mrb[239].mxu0  ;;  %v8217_v19 = vpop.f32.mrb[241].mxu1 }
 0x3f2   : > { %v8327_v62 = vadd.f32 %v8326_v46, %v8325_v35  ;;  %v8218_v54 = vadd.f32 %v8217_v19, %v8216_v34  ;;  %v8219_v9 = vpop.f32.mrb[242].mxu1  ;;  %v11709_v22 = vadd.f32 %v8324_v44, %v5616_v49 }
 0x3f3   : > { %v8220_v29 = vpop.f32.mrb[243].mxu1 }
 0x3f4   : > { %v5624_v32 = vadd.f32 %v8218_v54, %v11602_v37  ;;  %v8221_v1 = vadd.f32 %v8220_v29, %v8219_v9  ;;  %v11712_v27 = vadd.f32 %v8327_v62, %v5619_v57 }
 0x3f6   : > { %v8328_v40 = vpop.f32.mrb[240].mxu0  ;;  %v5627_v31 = vadd.f32 %v8221_v1, %v11611_v17 }
 0x3f7   : > { %v8329_v14 = vpop.f32.mrb[241].mxu0 }
 0x3f8   : > { %v8330_v33 = vadd.f32 %v8329_v14, %v8328_v40  ;;  %v8331_v52 = vpop.f32.mrb[242].mxu0  ;;  %v8222_v2 = vpop.f32.mrb[244].mxu1 }
 0x3f9   : > { %v8332_v30 = vpop.f32.mrb[243].mxu0  ;;  %v8223_v18 = vpop.f32.mrb[245].mxu1 }
 0x3fa   : > { %v8333_v23 = vadd.f32 %v8332_v30, %v8331_v52  ;;  %v8224_v20 = vadd.f32 %v8223_v18, %v8222_v2  ;;  %v8225_v41 = vpop.f32.mrb[246].mxu1  ;;  %v11715_v38 = vadd.f32 %v8330_v33, %v5624_v32 }
 0x3fb   : > { %v8226_v47 = vpop.f32.mrb[247].mxu1 }
 0x3fc   : > { %v5632_v37 = vadd.f32 %v8224_v20, %v11618_v63  ;;  %v8227_v55 = vadd.f32 %v8226_v47, %v8225_v41  ;;  %v11718_v45 = vadd.f32 %v8333_v23, %v5627_v31 }
 0x3fe   : > { %v8334_v26 = vpop.f32.mrb[244].mxu0  ;;  %v5635_v17 = vadd.f32 %v8227_v55, %v11621_v48 }
 0x3ff   : > { %v8335_v49 = vpop.f32.mrb[245].mxu0 }
 0x400   : > { %v8336_v21 = vadd.f32 %v8335_v49, %v8334_v26  ;;  %v8337_v58 = vpop.f32.mrb[246].mxu0  ;;  %v8228_v57 = vpop.f32.mrb[248].mxu1 }
 0x401   : > { %v8338_v5 = vpop.f32.mrb[247].mxu0  ;;  %v8229_v44 = vpop.f32.mrb[249].mxu1 }
 0x402   : > { %v8339_v35 = vadd.f32 %v8338_v5, %v8337_v58  ;;  %v8230_v34 = vadd.f32 %v8229_v44, %v8228_v57  ;;  %v8231_v46 = vpop.f32.mrb[250].mxu1  ;;  %v11721_v19 = vadd.f32 %v8336_v21, %v5632_v37 }
 0x403   : > { %v8232_v62 = vpop.f32.mrb[251].mxu1 }
 0x404   : > { %v5640_v63 = vadd.f32 %v8230_v34, %v11631_v50  ;;  %v8233_v54 = vadd.f32 %v8232_v62, %v8231_v46  ;;  %v11724_v9 = vadd.f32 %v8339_v35, %v5635_v17 }
 0x406   : > { %v8340_v29 = vpop.f32.mrb[248].mxu0  ;;  %v5643_v48 = vadd.f32 %v8233_v54, %v11634_v15 }
 0x407   : > { %v8341_v32 = vpop.f32.mrb[249].mxu0 }
 0x408   : > { %v8342_v1 = vadd.f32 %v8341_v32, %v8340_v29  ;;  %v8343_v40 = vpop.f32.mrb[250].mxu0  ;;  %v8234_v31 = vpop.f32.mrb[252].mxu1 }
 0x409   : > { %v8344_v14 = vpop.f32.mrb[251].mxu0  ;;  %v8235_v33 = vpop.f32.mrb[253].mxu1 }
 0x40a   : > { %v8345_v52 = vadd.f32 %v8344_v14, %v8343_v40  ;;  %v8236_v2 = vadd.f32 %v8235_v33, %v8234_v31  ;;  %v8237_v30 = vpop.f32.mrb[254].mxu1  ;;  %v11727_v18 = vadd.f32 %v8342_v1, %v5640_v63 }
 0x40b   : > { %v8238_v23 = vpop.f32.mrb[255].mxu1 }
 0x40c   : > { %v5648_v50 = vadd.f32 %v8236_v2, %v11642_v7  ;;  %v8239_v20 = vadd.f32 %v8238_v23, %v8237_v30  ;;  %v11730_v41 = vadd.f32 %v8345_v52, %v5643_v48 }
 0x40e   : > { %v8346_v47 = vpop.f32.mrb[252].mxu0  ;;  %v5651_v15 = vadd.f32 %v8239_v20, %v11645_v10 }
 0x40f   : > { %v8347_v37 = vpop.f32.mrb[253].mxu0 }
 0x410   : > { %v8348_v55 = vadd.f32 %v8347_v37, %v8346_v47  ;;  %v8349_v26 = vpop.f32.mrb[254].mxu0  ;;  %v8240_v17 = vpop.f32.mrb[0].mxu1 }
 0x411   : > { %v8350_v49 = vpop.f32.mrb[255].mxu0  ;;  %v8241_v21 = vpop.f32.mrb[1].mxu1 }
 0x412   : > { %v8351_v58 = vadd.f32 %v8350_v49, %v8349_v26  ;;  %v8242_v57 = vadd.f32 %v8241_v21, %v8240_v17  ;;  %v8243_v5 = vpop.f32.mrb[2].mxu1  ;;  %v11733_v44 = vadd.f32 %v8348_v55, %v5648_v50 }
 0x413   : > { %v8244_v35 = vpop.f32.mrb[3].mxu1 }
 0x414   : > { %v5656_v7 = vadd.f32 %v8242_v57, %v11648_v24  ;;  %v8245_v34 = vadd.f32 %v8244_v35, %v8243_v5  ;;  %v11736_v46 = vadd.f32 %v8351_v58, %v5651_v15 }
 0x416   : > { %v8352_v62 = vpop.f32.mrb[0].mxu0  ;;  %v5659_v10 = vadd.f32 %v8245_v34, %v11651_v3 }
 0x417   : > { %v8353_v63 = vpop.f32.mrb[1].mxu0 }
 0x418   : > { %v8354_v54 = vadd.f32 %v8353_v63, %v8352_v62  ;;  %v8355_v29 = vpop.f32.mrb[2].mxu0  ;;  %v8246_v48 = vpop.f32.mrb[4].mxu1 }
 0x419   : > { %v8356_v32 = vpop.f32.mrb[3].mxu0  ;;  %v8247_v1 = vpop.f32.mrb[5].mxu1 }
 0x41a   : > { %v8357_v40 = vadd.f32 %v8356_v32, %v8355_v29  ;;  %v8248_v31 = vadd.f32 %v8247_v1, %v8246_v48  ;;  %v8249_v14 = vpop.f32.mrb[6].mxu1  ;;  %v11739_v33 = vadd.f32 %v8354_v54, %v5656_v7 }
 0x41b   : > { %v8250_v52 = vpop.f32.mrb[7].mxu1 }
 0x41c   : > { %v5664_v24 = vadd.f32 %v8248_v31, %v11653_v28  ;;  %v8251_v2 = vadd.f32 %v8250_v52, %v8249_v14  ;;  %v11742_v30 = vadd.f32 %v8357_v40, %v5659_v10 }
 0x41e   : > { %v8358_v23 = vpop.f32.mrb[4].mxu0  ;;  %v5667_v3 = vadd.f32 %v8251_v2, %v11655_v36 }
 0x41f   : > { %v8359_v50 = vpop.f32.mrb[5].mxu0 }
 0x420   : > { %v8360_v20 = vadd.f32 %v8359_v50, %v8358_v23  ;;  %v8361_v47 = vpop.f32.mrb[6].mxu0  ;;  %v8252_v15 = vpop.f32.mrb[8].mxu1  ;;  %v11760_v50 = vld [vmem:[%s12036_s6] ss:$0 sm:$0xff] }
 0x421   : > { %v8362_v37 = vpop.f32.mrb[7].mxu0  ;;  %v8253_v55 = vpop.f32.mrb[9].mxu1 }
 0x422   : > { %v8363_v26 = vadd.f32 %v8362_v37, %v8361_v47  ;;  %v8254_v17 = vadd.f32 %v8253_v55, %v8252_v15  ;;  %v8255_v49 = vpop.f32.mrb[10].mxu1  ;;  %v11745_v21 = vadd.f32 %v8360_v20, %v5664_v24 }
 0x423   : > { %v8256_v58 = vpop.f32.mrb[11].mxu1 }
 0x424   : > { %v5672_v28 = vadd.f32 %v8254_v17, %v11657_v42  ;;  %v8257_v57 = vadd.f32 %v8256_v58, %v8255_v49  ;;  %v11748_v5 = vadd.f32 %v8363_v26, %v5667_v3  ;;  %v11771_v58 = vld [vmem:[%s12037_s7] ss:$0 sm:$0xff] }
 0x426   : > { %v8364_v35 = vpop.f32.mrb[8].mxu0  ;;  %v5675_v36 = vadd.f32 %v8257_v57, %v11659_v51 }
 0x427   : > { %v8365_v7 = vpop.f32.mrb[9].mxu0 }
 0x428   : > { %v8366_v34 = vadd.f32 %v8365_v7, %v8364_v35  ;;  %v8367_v62 = vpop.f32.mrb[10].mxu0  ;;  %v8258_v10 = vpop.f32.mrb[12].mxu1 }
 0x429   : > { %v8368_v63 = vpop.f32.mrb[11].mxu0  ;;  %v8259_v54 = vpop.f32.mrb[13].mxu1 }
 0x42a   : > { %v8369_v29 = vadd.f32 %v8368_v63, %v8367_v62  ;;  %v8260_v48 = vadd.f32 %v8259_v54, %v8258_v10  ;;  %v8261_v32 = vpop.f32.mrb[14].mxu1  ;;  %v11751_v1 = vadd.f32 %v8366_v34, %v5672_v28 }
 0x42b   : > { %v8262_v40 = vpop.f32.mrb[15].mxu1 }
 0x42c   : > { %v5680_v42 = vadd.f32 %v8260_v48, %v11661_v25  ;;  %v8263_v31 = vadd.f32 %v8262_v40, %v8261_v32  ;;  %v11754_v14 = vadd.f32 %v8369_v29, %v5675_v36  ;;  %v11787_v36 = vld [vmem:[%s12039_s9] ss:$0 sm:$0xff] }
 0x42e   : > { %v8370_v52 = vpop.f32.mrb[12].mxu0  ;;  %v5683_v51 = vadd.f32 %v8263_v31, %v11664_v59 }
 0x42f   : > { %v8371_v24 = vpop.f32.mrb[13].mxu0 }
 0x430   : > { %v8372_v2 = vadd.f32 %v8371_v24, %v8370_v52  ;;  %v8373_v23 = vpop.f32.mrb[14].mxu0  ;;  %v8490_v3 = vpop.f32.mrb[16].mxu1 }
 0x431   : > { %v8374_v20 = vpop.f32.mrb[15].mxu0  ;;  %v5890_v47 = vadd.f32 %v8490_v3, %v11673_v11  ;;  %v5881_v25 = vpop.f32.mrb[17].mxu1 }
 0x432   : > { %v8375_v15 = vadd.f32 %v8374_v20, %v8373_v23  ;;  %v5882_v37 = vadd.f32 %v5881_v25, %v11667_v13  ;;  %v8491_v55 = vpop.f32.mrb[18].mxu1  ;;  %v11764_v26 = vadd.f32 %v8372_v2, %v5680_v42  ;;  %v11777_v13 = vld [vmem:[%s12038_s8] ss:$0 sm:$0xff] }
 0x433   : > { %v6017_v59 = vmul.f32 %v11760_v50, %v5890_v47  ;;  %v5893_v17 = vadd.f32 %v8491_v55, %v11676_v61  ;;  %v5884_v49 = vpop.f32.mrb[19].mxu1 }
 0x434   : > { %v6015_v28 = vmul.f32 %v11760_v50, %v5882_v37  ;;  %v5885_v11 = vadd.f32 %v5884_v49, %v11671_v4  ;;  %v11780_v57 = vadd.f32 %v8375_v15, %v5683_v51 }
 0x435   : > { %v6018_v61 = vmul.f32 %v11760_v50, %v5893_v17  ;;  %v6056_v34 = vadd.f32 %v11771_v58, %v6017_v59 }
 0x436   : > { %v8538_v35 = vpop.f32.mrb[16].mxu0  ;;  %v6016_v7 = vmul.f32 %v11760_v50, %v5885_v11  ;;  %v6054_v4 = vadd.f32 %v11771_v58, %v6015_v28 }
 0x437   : > { %v6771_v62 = vmul.f32 %v8538_v35, %v11777_v13  ;;  %v6635_v10 = vpop.f32.mrb[17].mxu0  ;;  %v6057_v32 = vadd.f32 %v11771_v58, %v6018_v61 }
 0x438   : > { %v6769_v63 = vmul.f32 %v11777_v13, %v6635_v10  ;;  %v8539_v54 = vpop.f32.mrb[18].mxu0  ;;  %v8494_v29 = vpop.f32.mrb[20].mxu1  ;;  %v6055_v24 = vadd.f32 %v11771_v58, %v6016_v7 }
 0x439   : > { %v6810_v48 = vadd.f32 %v11787_v36, %v6771_v62  ;;  %v6772_v40 = vmul.f32 %v8539_v54, %v11777_v13  ;;  %v6638_v42 = vpop.f32.mrb[19].mxu0  ;;  %v5906_v31 = vadd.f32 %v8494_v29, %v11685_v16  ;;  %v5897_v52 = vpop.f32.mrb[21].mxu1 }
 0x43a   : > { %v6808_v51 = vadd.f32 %v11787_v36, %v6769_v63  ;;  %v6770_v2 = vmul.f32 %v11777_v13, %v6638_v42  ;;  %v5898_v23 = vadd.f32 %v5897_v52, %v11679_v6  ;;  %v8495_v3 = vpop.f32.mrb[22].mxu1 }
 0x43b   : > { %v6842_v20 = vadd.f32 %v6810_v48, %v6056_v34  ;;  %v6811_v47 = vadd.f32 %v11787_v36, %v6772_v40  ;;  %v6021_v25 = vmul.f32 %v11760_v50, %v5906_v31  ;;  %v5909_v15 = vadd.f32 %v8495_v3, %v11688_v56  ;;  %v5900_v37 = vpop.f32.mrb[23].mxu1 }
 0x43c   : > { %v6840_v55 = vadd.f32 %v6808_v51, %v6054_v4  ;;  %v6809_v16 = vadd.f32 %v11787_v36, %v6770_v2  ;;  %v6019_v59 = vmul.f32 %v11760_v50, %v5898_v23  ;;  %v5901_v17 = vadd.f32 %v5900_v37, %v11682_v0 }
 0x43d   : > { %v6874_v49 = vmax.f32 %v6842_v20, 0.0  ;;  %v6843_v28 = vadd.f32 %v6811_v47, %v6057_v32  ;;  %v6022_v6 = vmul.f32 %v11760_v50, %v5909_v15  ;;  %v6060_v34 = vadd.f32 %v11771_v58, %v6021_v25 }
 0x43e   : > { %v6872_v11 = vmax.f32 %v6840_v55, 0.0  ;;  %v6841_v61 = vadd.f32 %v6809_v16, %v6055_v24  ;;  %v8542_v35 = vpop.f32.mrb[20].mxu0  ;;  %v6020_v7 = vmul.f32 %v11760_v50, %v5901_v17  ;;  %v6058_v4 = vadd.f32 %v11771_v58, %v6019_v59 }
 0x43f   : > { %6906 = vst [vmem:[%s11812_s28 + $0x10] sm:$0xff] %v6874_v49  ;;  %v6875_v56 = vmax.f32 %v6843_v28, 0.0  ;;  %v6775_v0 = vmul.f32 %v8542_v35, %v11777_v13  ;;  %v6651_v62 = vpop.f32.mrb[21].mxu0  ;;  %v6061_v32 = vadd.f32 %v11771_v58, %v6022_v6 }
 0x440   : > { %6904 = vst [vmem:[%s11812_s28] sm:$0xff] %v6872_v11  ;;  %v6873_v10 = vmax.f32 %v6841_v61, 0.0  ;;  %v6773_v63 = vmul.f32 %v11777_v13, %v6651_v62  ;;  %v8543_v54 = vpop.f32.mrb[22].mxu0  ;;  %v8498_v29 = vpop.f32.mrb[24].mxu1  ;;  %v6059_v24 = vadd.f32 %v11771_v58, %v6020_v7 }
 0x441   : > { %6907 = vst [vmem:[%s11812_s28 + $0x18] sm:$0xff] %v6875_v56  ;;  %v6814_v48 = vadd.f32 %v11787_v36, %v6775_v0  ;;  %v6776_v40 = vmul.f32 %v8543_v54, %v11777_v13  ;;  %v6654_v42 = vpop.f32.mrb[23].mxu0  ;;  %v5922_v31 = vadd.f32 %v8498_v29, %v11697_v53  ;;  %v5913_v52 = vpop.f32.mrb[25].mxu1 }
 0x442   : > { %6905 = vst [vmem:[%s11812_s28 + $0x8] sm:$0xff] %v6873_v10  ;;  %v6812_v51 = vadd.f32 %v11787_v36, %v6773_v63  ;;  %v6774_v2 = vmul.f32 %v11777_v13, %v6654_v42  ;;  %v5914_v23 = vadd.f32 %v5913_v52, %v11691_v43  ;;  %v8499_v3 = vpop.f32.mrb[26].mxu1 }
 0x443   : > { %v6846_v20 = vadd.f32 %v6814_v48, %v6060_v34  ;;  %v6815_v47 = vadd.f32 %v11787_v36, %v6776_v40  ;;  %v6025_v25 = vmul.f32 %v11760_v50, %v5922_v31  ;;  %v5925_v15 = vadd.f32 %v8499_v3, %v11700_v8  ;;  %v5916_v53 = vpop.f32.mrb[27].mxu1 }
 0x444   : > { %v6844_v37 = vadd.f32 %v6812_v51, %v6058_v4  ;;  %v6813_v55 = vadd.f32 %v11787_v36, %v6774_v2  ;;  %v6023_v16 = vmul.f32 %v11760_v50, %v5914_v23  ;;  %v5917_v59 = vadd.f32 %v5916_v53, %v11694_v39 }
 0x445   : > { %v6878_v17 = vmax.f32 %v6846_v20, 0.0  ;;  %v6847_v43 = vadd.f32 %v6815_v47, %v6061_v32  ;;  %v6026_v49 = vmul.f32 %v11760_v50, %v5925_v15  ;;  %v6064_v35 = vadd.f32 %v11771_v58, %v6025_v25 }
 0x446   : > { %v6876_v28 = vmax.f32 %v6844_v37, 0.0  ;;  %v6845_v6 = vadd.f32 %v6813_v55, %v6059_v24  ;;  %v8546_v11 = vpop.f32.mrb[24].mxu0  ;;  %v6024_v61 = vmul.f32 %v11760_v50, %v5917_v59  ;;  %v6062_v34 = vadd.f32 %v11771_v58, %v6023_v16 }
 0x447   : > { %6910 = vst [vmem:[%s11812_s28 + $0x30] sm:$0xff] %v6878_v17  ;;  %v6879_v8 = vmax.f32 %v6847_v43, 0.0  ;;  %v6779_v7 = vmul.f32 %v8546_v11, %v11777_v13  ;;  %v6667_v56 = vpop.f32.mrb[25].mxu0  ;;  %v6065_v63 = vadd.f32 %v11771_v58, %v6026_v49 }
 0x448   : > { %6908 = vst [vmem:[%s11812_s28 + $0x20] sm:$0xff] %v6876_v28  ;;  %v6877_v39 = vmax.f32 %v6845_v6, 0.0  ;;  %v6777_v0 = vmul.f32 %v11777_v13, %v6667_v56  ;;  %v8547_v62 = vpop.f32.mrb[26].mxu0  ;;  %v8502_v10 = vpop.f32.mrb[28].mxu1  ;;  %v6063_v42 = vadd.f32 %v11771_v58, %v6024_v61 }
 0x449   : > { %6911 = vst [vmem:[%s11812_s28 + $0x38] sm:$0xff] %v6879_v8  ;;  %v6818_v4 = vadd.f32 %v11787_v36, %v6779_v7  ;;  %v6780_v54 = vmul.f32 %v8547_v62, %v11777_v13  ;;  %v6670_v29 = vpop.f32.mrb[27].mxu0  ;;  %v5938_v48 = vadd.f32 %v8502_v10, %v11709_v22  ;;  %v5929_v32 = vpop.f32.mrb[29].mxu1 }
 0x44a   : > { %6909 = vst [vmem:[%s11812_s28 + $0x28] sm:$0xff] %v6877_v39  ;;  %v6816_v40 = vadd.f32 %v11787_v36, %v6777_v0  ;;  %v6778_v31 = vmul.f32 %v11777_v13, %v6670_v29  ;;  %v5930_v52 = vadd.f32 %v5929_v32, %v11703_v60  ;;  %v8503_v51 = vpop.f32.mrb[30].mxu1 }
 0x44b   : > { %v6850_v24 = vadd.f32 %v6818_v4, %v6064_v35  ;;  %v6819_v2 = vadd.f32 %v11787_v36, %v6780_v54  ;;  %v6029_v23 = vmul.f32 %v11760_v50, %v5938_v48  ;;  %v5941_v3 = vadd.f32 %v8503_v51, %v11712_v27  ;;  %v5932_v22 = vpop.f32.mrb[31].mxu1 }
 0x44c   : > { %v6848_v20 = vadd.f32 %v6816_v40, %v6062_v34  ;;  %v6817_v47 = vadd.f32 %v11787_v36, %v6778_v31  ;;  %v6027_v25 = vmul.f32 %v11760_v50, %v5930_v52  ;;  %v5933_v15 = vadd.f32 %v5932_v22, %v11706_v12 }
 0x44d   : > { %v6882_v53 = vmax.f32 %v6850_v24, 0.0  ;;  %v6851_v60 = vadd.f32 %v6819_v2, %v6065_v63  ;;  %v6030_v37 = vmul.f32 %v11760_v50, %v5941_v3  ;;  %v6068_v43 = vadd.f32 %v11771_v58, %v6029_v23 }
 0x44e   : > { %v6880_v55 = vmax.f32 %v6848_v20, 0.0  ;;  %v6849_v16 = vadd.f32 %v6817_v47, %v6063_v42  ;;  %v8550_v59 = vpop.f32.mrb[28].mxu0  ;;  %v6028_v17 = vmul.f32 %v11760_v50, %v5933_v15  ;;  %v6066_v6 = vadd.f32 %v11771_v58, %v6027_v25 }
 0x44f   : > { %6914 = vst [vmem:[%s11812_s28 + $0x50] sm:$0xff] %v6882_v53  ;;  %v6883_v27 = vmax.f32 %v6851_v60, 0.0  ;;  %v6783_v49 = vmul.f32 %v8550_v59, %v11777_v13  ;;  %v6683_v28 = vpop.f32.mrb[29].mxu0  ;;  %v6069_v7 = vadd.f32 %v11771_v58, %v6030_v37 }
 0x450   : > { %6912 = vst [vmem:[%s11812_s28 + $0x40] sm:$0xff] %v6880_v55  ;;  %v6881_v12 = vmax.f32 %v6849_v16, 0.0  ;;  %v6781_v11 = vmul.f32 %v11777_v13, %v6683_v28  ;;  %v8551_v61 = vpop.f32.mrb[30].mxu0  ;;  %v8506_v8 = vpop.f32.mrb[32].mxu1  ;;  %v6067_v10 = vadd.f32 %v11771_v58, %v6028_v17 }
 0x451   : > { %6915 = vst [vmem:[%s11812_s28 + $0x58] sm:$0xff] %v6883_v27  ;;  %v6822_v35 = vadd.f32 %v11787_v36, %v6783_v49  ;;  %v6784_v56 = vmul.f32 %v8551_v61, %v11777_v13  ;;  %v6686_v39 = vpop.f32.mrb[31].mxu0  ;;  %v5954_v34 = vadd.f32 %v8506_v8, %v11721_v19  ;;  %v5945_v0 = vpop.f32.mrb[33].mxu1 }
 0x452   : > { %6913 = vst [vmem:[%s11812_s28 + $0x48] sm:$0xff] %v6881_v12  ;;  %v6820_v62 = vadd.f32 %v11787_v36, %v6781_v11  ;;  %v6782_v4 = vmul.f32 %v11777_v13, %v6686_v39  ;;  %v5946_v63 = vadd.f32 %v5945_v0, %v11715_v38  ;;  %v8507_v54 = vpop.f32.mrb[34].mxu1 }
 0x453   : > { %v6854_v29 = vadd.f32 %v6822_v35, %v6068_v43  ;;  %v6823_v48 = vadd.f32 %v11787_v36, %v6784_v56  ;;  %v6033_v32 = vmul.f32 %v11760_v50, %v5954_v34  ;;  %v5957_v40 = vadd.f32 %v8507_v54, %v11724_v9  ;;  %v5948_v19 = vpop.f32.mrb[35].mxu1 }
 0x454   : > { %v6852_v42 = vadd.f32 %v6820_v62, %v6066_v6  ;;  %v6821_v31 = vadd.f32 %v11787_v36, %v6782_v4  ;;  %v6031_v52 = vmul.f32 %v11760_v50, %v5946_v63  ;;  %v5949_v51 = vadd.f32 %v5948_v19, %v11718_v45 }
 0x455   : > { %v6886_v24 = vmax.f32 %v6854_v29, 0.0  ;;  %v6855_v38 = vadd.f32 %v6823_v48, %v6069_v7  ;;  %v6034_v2 = vmul.f32 %v11760_v50, %v5957_v40  ;;  %v6072_v47 = vadd.f32 %v11771_v58, %v6033_v32 }
 0x456   : > { %v6884_v23 = vmax.f32 %v6852_v42, 0.0  ;;  %v6853_v3 = vadd.f32 %v6821_v31, %v6067_v10  ;;  %v8554_v22 = vpop.f32.mrb[32].mxu0  ;;  %v6032_v20 = vmul.f32 %v11760_v50, %v5949_v51  ;;  %v6070_v53 = vadd.f32 %v11771_v58, %v6031_v52 }
 0x457   : > { %6918 = vst [vmem:[%s11812_s28 + $0x70] sm:$0xff] %v6886_v24  ;;  %v6887_v9 = vmax.f32 %v6855_v38, 0.0  ;;  %v6787_v25 = vmul.f32 %v8554_v22, %v11777_v13  ;;  %v6699_v15 = vpop.f32.mrb[33].mxu0  ;;  %v6073_v59 = vadd.f32 %v11771_v58, %v6034_v2 }
 0x458   : > { %6916 = vst [vmem:[%s11812_s28 + $0x60] sm:$0xff] %v6884_v23  ;;  %v6885_v45 = vmax.f32 %v6853_v3, 0.0  ;;  %v6785_v60 = vmul.f32 %v11777_v13, %v6699_v15  ;;  %v8555_v37 = vpop.f32.mrb[34].mxu0  ;;  %v8510_v55 = vpop.f32.mrb[36].mxu1  ;;  %v6071_v12 = vadd.f32 %v11771_v58, %v6032_v20 }
 0x459   : > { %6919 = vst [vmem:[%s11812_s28 + $0x78] sm:$0xff] %v6887_v9  ;;  %v6826_v16 = vadd.f32 %v11787_v36, %v6787_v25  ;;  %v6788_v17 = vmul.f32 %v8555_v37, %v11777_v13  ;;  %v6702_v27 = vpop.f32.mrb[35].mxu0  ;;  %v5970_v43 = vadd.f32 %v8510_v55, %v11733_v44  ;;  %v5961_v49 = vpop.f32.mrb[37].mxu1 }
 0x45a   : > { %6917 = vst [vmem:[%s11812_s28 + $0x68] sm:$0xff] %v6885_v45  ;;  %v6824_v28 = vadd.f32 %v11787_v36, %v6785_v60  ;;  %v6786_v6 = vmul.f32 %v11777_v13, %v6702_v27  ;;  %v5962_v11 = vadd.f32 %v5961_v49, %v11727_v18  ;;  %v8511_v61 = vpop.f32.mrb[38].mxu1 }
 0x45b   : > { %v6858_v8 = vadd.f32 %v6826_v16, %v6072_v47  ;;  %v6827_v35 = vadd.f32 %v11787_v36, %v6788_v17  ;;  %v6037_v7 = vmul.f32 %v11760_v50, %v5970_v43  ;;  %v5973_v56 = vadd.f32 %v8511_v61, %v11736_v46  ;;  %v5964_v44 = vpop.f32.mrb[39].mxu1 }
 0x45c   : > { %v6856_v39 = vadd.f32 %v6824_v28, %v6070_v53  ;;  %v6825_v34 = vadd.f32 %v11787_v36, %v6786_v6  ;;  %v6035_v0 = vmul.f32 %v11760_v50, %v5962_v11  ;;  %v5965_v62 = vadd.f32 %v5964_v44, %v11730_v41 }
 0x45d   : > { %v6890_v10 = vmax.f32 %v6858_v8, 0.0  ;;  %v6859_v18 = vadd.f32 %v6827_v35, %v6073_v59  ;;  %v6038_v4 = vmul.f32 %v11760_v50, %v5973_v56  ;;  %v6076_v32 = vadd.f32 %v11771_v58, %v6037_v7 }
 0x45e   : > { %v6888_v63 = vmax.f32 %v6856_v39, 0.0  ;;  %v6857_v54 = vadd.f32 %v6825_v34, %v6071_v12  ;;  %v8558_v29 = vpop.f32.mrb[36].mxu0  ;;  %v6036_v48 = vmul.f32 %v11760_v50, %v5965_v62  ;;  %v6074_v42 = vadd.f32 %v11771_v58, %v6035_v0 }
 0x45f   : > { %6922 = vst [vmem:[%s11812_s28 + $0x90] sm:$0xff] %v6890_v10  ;;  %v6891_v46 = vmax.f32 %v6859_v18, 0.0  ;;  %v6791_v40 = vmul.f32 %v8558_v29, %v11777_v13  ;;  %v6715_v19 = vpop.f32.mrb[37].mxu0  ;;  %v6077_v38 = vadd.f32 %v11771_v58, %v6038_v4 }
 0x460   : > { %6920 = vst [vmem:[%s11812_s28 + $0x80] sm:$0xff] %v6888_v63  ;;  %v6889_v41 = vmax.f32 %v6857_v54, 0.0  ;;  %v6789_v31 = vmul.f32 %v11777_v13, %v6715_v19  ;;  %v8559_v52 = vpop.f32.mrb[38].mxu0  ;;  %v8514_v51 = vpop.f32.mrb[40].mxu1  ;;  %v6075_v9 = vadd.f32 %v11771_v58, %v6036_v48 }
 0x461   : > { %6923 = vst [vmem:[%s11812_s28 + $0x98] sm:$0xff] %v6891_v46  ;;  %v6830_v24 = vadd.f32 %v11787_v36, %v6791_v40  ;;  %v6792_v2 = vmul.f32 %v8559_v52, %v11777_v13  ;;  %v6718_v23 = vpop.f32.mrb[39].mxu0  ;;  %v5986_v3 = vadd.f32 %v8514_v51, %v11745_v21  ;;  %v5977_v22 = vpop.f32.mrb[41].mxu1 }
 0x462   : > { %6921 = vst [vmem:[%s11812_s28 + $0x88] sm:$0xff] %v6889_v41  ;;  %v6828_v20 = vadd.f32 %v11787_v36, %v6789_v31  ;;  %v6790_v47 = vmul.f32 %v11777_v13, %v6718_v23  ;;  %v5978_v25 = vadd.f32 %v5977_v22, %v11739_v33  ;;  %v8515_v15 = vpop.f32.mrb[42].mxu1 }
 0x463   : > { %v6862_v45 = vadd.f32 %v6830_v24, %v6076_v32  ;;  %v6831_v53 = vadd.f32 %v11787_v36, %v6792_v2  ;;  %v6041_v60 = vmul.f32 %v11760_v50, %v5986_v3  ;;  %v5989_v37 = vadd.f32 %v8515_v15, %v11748_v5  ;;  %v5980_v21 = vpop.f32.mrb[43].mxu1 }
 0x464   : > { %v6860_v55 = vadd.f32 %v6828_v20, %v6074_v42  ;;  %v6829_v16 = vadd.f32 %v11787_v36, %v6790_v47  ;;  %v6039_v59 = vmul.f32 %v11760_v50, %v5978_v25  ;;  %v5981_v17 = vadd.f32 %v5980_v21, %v11742_v30 }
 0x465   : > { %v6894_v27 = vmax.f32 %v6862_v45, 0.0  ;;  %v6863_v33 = vadd.f32 %v6831_v53, %v6077_v38  ;;  %v6042_v43 = vmul.f32 %v11760_v50, %v5989_v37  ;;  %v6080_v11 = vadd.f32 %v11771_v58, %v6041_v60 }
 0x466   : > { %v6892_v49 = vmax.f32 %v6860_v55, 0.0  ;;  %v6861_v28 = vadd.f32 %v6829_v16, %v6075_v9  ;;  %v8562_v12 = vpop.f32.mrb[40].mxu0  ;;  %v6040_v6 = vmul.f32 %v11760_v50, %v5981_v17  ;;  %v6078_v35 = vadd.f32 %v11771_v58, %v6039_v59 }
 0x467   : > { %6926 = vst [vmem:[%s11812_s28 + $0xb0] sm:$0xff] %v6894_v27  ;;  %v6895_v5 = vmax.f32 %v6863_v33, 0.0  ;;  %v6795_v61 = vmul.f32 %v8562_v12, %v11777_v13  ;;  %v6731_v8 = vpop.f32.mrb[41].mxu0  ;;  %v6081_v34 = vadd.f32 %v11771_v58, %v6042_v43 }
 0x468   : > { %6924 = vst [vmem:[%s11812_s28 + $0xa0] sm:$0xff] %v6892_v49  ;;  %v6893_v30 = vmax.f32 %v6861_v28, 0.0  ;;  %v6793_v7 = vmul.f32 %v11777_v13, %v6731_v8  ;;  %v8563_v56 = vpop.f32.mrb[42].mxu0  ;;  %v8518_v44 = vpop.f32.mrb[44].mxu1  ;;  %v6079_v63 = vadd.f32 %v11771_v58, %v6040_v6 }
 0x469   : > { %6927 = vst [vmem:[%s11812_s28 + $0xb8] sm:$0xff] %v6895_v5  ;;  %v6834_v39 = vadd.f32 %v11787_v36, %v6795_v61  ;;  %v6796_v0 = vmul.f32 %v8563_v56, %v11777_v13  ;;  %v6734_v62 = vpop.f32.mrb[43].mxu0  ;;  %v6002_v10 = vadd.f32 %v8518_v44, %v11764_v26  ;;  %v5993_v18 = vpop.f32.mrb[45].mxu1 }
 0x46a   : > { %6925 = vst [vmem:[%s11812_s28 + $0xa8] sm:$0xff] %v6893_v30  ;;  %v6832_v4 = vadd.f32 %v11787_v36, %v6793_v7  ;;  %v6794_v54 = vmul.f32 %v11777_v13, %v6734_v62  ;;  %v5994_v29 = vadd.f32 %v5993_v18, %v11751_v1  ;;  %v8519_v48 = vpop.f32.mrb[46].mxu1 }
 0x46b   : > { %v6866_v46 = vadd.f32 %v6834_v39, %v6080_v11  ;;  %v6835_v32 = vadd.f32 %v11787_v36, %v6796_v0  ;;  %v6045_v40 = vmul.f32 %v11760_v50, %v6002_v10  ;;  %v6005_v19 = vadd.f32 %v8519_v48, %v11780_v57  ;;  %v5996_v26 = vpop.f32.mrb[47].mxu1 }
 0x46c   : > { %v6864_v41 = vadd.f32 %v6832_v4, %v6078_v35  ;;  %v6833_v42 = vadd.f32 %v11787_v36, %v6794_v54  ;;  %v6043_v31 = vmul.f32 %v11760_v50, %v5994_v29  ;;  %v5997_v52 = vadd.f32 %v5996_v26, %v11754_v14 }
 0x46d   : > { %v6898_v51 = vmax.f32 %v6866_v46, 0.0  ;;  %v6867_v1 = vadd.f32 %v6835_v32, %v6081_v34  ;;  %v6046_v24 = vmul.f32 %v11760_v50, %v6005_v19  ;;  %v6084_v22 = vadd.f32 %v11771_v58, %v6045_v40 }
 0x46e   : > { %v6896_v38 = vmax.f32 %v6864_v41, 0.0  ;;  %v6865_v2 = vadd.f32 %v6833_v42, %v6079_v63  ;;  %v8566_v23 = vpop.f32.mrb[44].mxu0  ;;  %v6044_v3 = vmul.f32 %v11760_v50, %v5997_v52  ;;  %v6082_v47 = vadd.f32 %v11771_v58, %v6043_v31 }
 0x46f   : > { %6930 = vst [vmem:[%s11812_s28 + $0xd0] sm:$0xff] %v6898_v51  ;;  %v6899_v57 = vmax.f32 %v6867_v1, 0.0  ;;  %v6799_v20 = vmul.f32 %v8566_v23, %v11777_v13  ;;  %v6747_v9 = vpop.f32.mrb[45].mxu0  ;;  %v6085_v45 = vadd.f32 %v11771_v58, %v6046_v24 }
 0x470   : > { %6928 = vst [vmem:[%s11812_s28 + $0xc0] sm:$0xff] %v6896_v38  ;;  %v6897_v14 = vmax.f32 %v6865_v2, 0.0  ;;  %v6797_v25 = vmul.f32 %v11777_v13, %v6747_v9  ;;  %v8567_v15 = vpop.f32.mrb[46].mxu0  ;;  %v6083_v21 = vadd.f32 %v11771_v58, %v6044_v3 }
 0x471   : > { %6931 = vst [vmem:[%s11812_s28 + $0xd8] sm:$0xff] %v6899_v57  ;;  %v6838_v50 = vadd.f32 %v11787_v36, %v6799_v20  ;;  %v6800_v53 = vmul.f32 %v8567_v15, %v11777_v13  ;;  %v6750_v60 = vpop.f32.mrb[47].mxu0 }
 0x472   : > { %6929 = vst [vmem:[%s11812_s28 + $0xc8] sm:$0xff] %v6897_v14  ;;  %v6836_v37 = vadd.f32 %v11787_v36, %v6797_v25  ;;  %v6798_v55 = vmul.f32 %v11777_v13, %v6750_v60 }
 0x473   : > { %v6870_v16 = vadd.f32 %v6838_v50, %v6084_v22  ;;  %v6839_v59 = vadd.f32 %v11787_v36, %v6800_v53 }
 0x474   : > { %v6868_v17 = vadd.f32 %v6836_v37, %v6082_v47  ;;  %v6837_v27 = vadd.f32 %v11787_v36, %v6798_v55 }
 0x475   : > { %v6902_v33 = vmax.f32 %v6870_v16, 0.0  ;;  %v6871_v43 = vadd.f32 %v6839_v59, %v6085_v45 }
 0x476   : > { %v6900_v49 = vmax.f32 %v6868_v17, 0.0  ;;  %v6869_v28 = vadd.f32 %v6837_v27, %v6083_v21 }
 0x477   : > { %6934 = vst [vmem:[%s11812_s28 + $0xf0] sm:$0xff] %v6902_v33  ;;  %v6903_v58 = vmax.f32 %v6871_v43, 0.0 }
 0x478   : > { %6932 = vst [vmem:[%s11812_s28 + $0xe0] sm:$0xff] %v6900_v49  ;;  %v6901_v13 = vmax.f32 %v6869_v28, 0.0 }
 0x479   : > { %6935 = vst [vmem:[%s11812_s28 + $0xf8] sm:$0xff] %v6903_v58 }
 0x47a   : > { %6933 = vst [vmem:[%s11812_s28 + $0xe8] sm:$0xff] %v6901_v13 }
 0x47b   : > { %9054 = shalt.err (!%p9051_p7)
}
 0x47c   : > { %s9055_s30 = scalar_lea.hbm %s11980_s26, 4096  ;;  %s9059_s27 = scalar_lea.hbm %s12040_s10, 8192 }
 0x47d   : > { %p9056_p8 = scmp.ne.s32.totalorder %s11980_s26, %s9055_s30  ;;  %p9060_p1 = scmp.lt.u32.totalorder %s11980_s26, %s12040_s10 }
 0x47e   : > { %p9061_p0 = scmp.lt.u32.totalorder %s9059_s27, %s9055_s30  ;;  %p9063_p6 = scmp.lt.u32.totalorder %s9055_s30, %s11980_s26 }
 0x47f   : > { %p9057_p11 = pnand %p9056_p8, %p12128_p9 }
 0x480   : > { %p9062_p5 = por %p9061_p0, %p9060_p1 }
 0x481   : > { %p9058_p13 = pneg %p9057_p11 }
 0x482   : > { %p9064_p10 = por %p9063_p6, %p9062_p5 }
 0x484   : > { %p9065_p12 = pnand %p9064_p10, %p9058_p13 }
 0x486   : > { %9068 = shalt.err (!%p9065_p12)
}
 0x487   : > { %s9114_s29 = smov 128   ;;  %s9115_s11 = smov 8  }
 0x488   : > { %8589 = dma.vmem_to_hbm [thread:$0]  (%p12128_p9), %s11982_s21, 4096, %s11980_s26, %s11989_s17, %s9114_s29, %s9114_s29, %s9115_s11  }
 0x489 PF: > { %p8601_p2 = scmp.ge.s32.totalorder %s9107_s16, 2  ;;  %s6965_s20 = sand.u32 1, %s9095_s13  }
 0x48a   : > { %p12129_p3 = scmp.ne.s32.totalorder %s12055_s24, 0  ;;  %s6966_s30 = scalar_lea.sflag [#allocation5], %s6965_s20 }
 0x48c   : > { %p8596_p4 = pnand %p8601_p2, %p12129_p3 }
 0x48e   : > { %9090 = dma.done.wait (!%p8596_p4), %s6966_s30, 4096  }
 0x48f   : > { %9092 = vsyncadd (!%p8596_p4), %s6966_s30, 4294963200  ;;  %p21_p7 = scmp.ge.s32.totalorder %s9196_s19, 4   ;;  %s12130_s13 = smov %s9099_s14 }
 0x490   : > { %s12131_s14 = smov %s9103_s15  ;;  %s12132_s15 = smov %s9207_s22 }
 0x491   : > { %s12133_s16 = smov %s9196_s19  ;;  %23 = sbr.rel (!%p21_p7) target bundleno = 4 (0x4), region = 103 }
 0x498   :  { %6971 = vsyncpa [#allocation4], 1 }
 0x499   :  { %6973 = vsyncpa [#allocation4 + $0x1], 1 }
 0x49a   :  { %6974 = vsyncpa [#allocation5], 1 }
 0x49b   :  { %6976 = vsyncpa [#allocation5 + $0x1], 1 }

</bundles_post_ra>
